<compile_context>
chip_gen: v6e
topology: v6e:2x2x1
jax: 0.10.0
libtpu: 0.0.40
codegen_flags: <defaults>
</compile_context>

<pallas_src>
import functools

import jax
import jax.numpy as jnp
from jax.experimental import pallas as pl
from jax.experimental.pallas import tpu as pltpu


# ----------------------------------------------------------------------------
# Per-generation VMEM budget
# ----------------------------------------------------------------------------

def _default_vmem_limit():
    # ~85% of physical VMEM, capped at 96 MiB (v5e/v6e: 128 MiB -> 96 MiB, v7x: 64 MiB -> ~54 MiB).
    try:
        cap = pltpu.get_tpu_info().vmem_capacity_bytes
        return int(min(96 * 1024 * 1024, cap * 0.85))
    except Exception:
        return 64 * 1024 * 1024


_VMEM_LIMIT = _default_vmem_limit()


def _cp(*sems):
    return pltpu.CompilerParams(dimension_semantics=tuple(sems),
                                vmem_limit_bytes=_VMEM_LIMIT)


def _gelu(x):
    return jax.nn.gelu(x, approximate=True)


# ----------------------------------------------------------------------------
# Fused "upscale" kernels (ConvT2x2 -> LayerNorm2d -> GELU -> ConvT2x2 [-> GELU]) in tap domain
# ----------------------------------------------------------------------------

def _upscale_branch(x, w1, b1, g, beta, w2, b2, cmid):
    """x: (tile_m, Cin) bf16; w1: (Cin, 4*cmid); w2: (cmid, 4*cout).

    Returns (4*tile_m, 4*cout) f32, rows ordered (tap1=(kh1,kw1), row): the four per-tap
    LayerNorm+GELU activations are row-stacked so the second matmul is a single MXU call.
    """
    y1 = jnp.dot(x, w1, preferred_element_type=jnp.float32) + b1
    acts = []
    for t in range(4):                               # tap1 = (kh1, kw1); LN per tap over cmid
        blk = y1[:, t * cmid:(t + 1) * cmid]
        mu = jnp.mean(blk, axis=-1, keepdims=True)
        var = jnp.mean(jnp.square(blk - mu), axis=-1, keepdims=True)
        a = (blk - mu) * jax.lax.rsqrt(var + 1e-6)
        acts.append(_gelu(a * g + beta).astype(jnp.bfloat16))
    a_all = jnp.concatenate(acts, axis=0)            # (4*tile_m, cmid), sublane-aligned stack
    return jnp.dot(a_all, w2, preferred_element_type=jnp.float32) + b2


def _upscale1_kernel(x_ref, w1_ref, b1_ref, g_ref, beta_ref, w2_ref, b2_ref, o_ref,
                     *, cmid, cout, final_gelu, tile_m):
    z = _upscale_branch(x_ref[...].astype(jnp.bfloat16), w1_ref[...], b1_ref[...],
                        g_ref[...], beta_ref[...], w2_ref[...], b2_ref[...], cmid)
    if final_gelu:
        z = _gelu(z)
    # Single store of the tap-major slab; tap reorder is done by the XLA de-interleave.
    o_ref[...] = z.reshape(4, tile_m, 4 * cout).astype(o_ref.dtype)


def _upscale2_kernel(xa_ref, w1a, b1a, ga, betaa, w2a, b2a,
                     xb_ref, w1b, b1b, gb, betab, w2b, b2b, o_ref,
                     *, cmid_a, cmid_b, cout, tile_m):
    """Fused embedding_encoder + compress_vit_feat: both branches summed in tap domain."""
    za = _upscale_branch(xa_ref[...].astype(jnp.bfloat16), w1a[...], b1a[...],
                         ga[...], betaa[...], w2a[...], b2a[...], cmid_a)
    zb = _upscale_branch(xb_ref[...].astype(jnp.bfloat16), w1b[...], b1b[...],
                         gb[...], betab[...], w2b[...], b2b[...], cmid_b)
    o_ref[...] = (za + zb).reshape(4, tile_m, 4 * cout).astype(o_ref.dtype)


def _upscale_specs(Cin, cmid, cout, tile_m):
    return [pl.BlockSpec((tile_m, Cin), lambda i: (i, 0)),
            pl.BlockSpec((Cin, 4 * cmid), lambda i: (0, 0)),
            pl.BlockSpec((1, 4 * cmid), lambda i: (0, 0)),
            pl.BlockSpec((1, cmid), lambda i: (0, 0)),
            pl.BlockSpec((1, cmid), lambda i: (0, 0)),
            pl.BlockSpec((cmid, 4 * cout), lambda i: (0, 0)),
            pl.BlockSpec((1, 4 * cout), lambda i: (0, 0))]


def _upscale_args(kp_u):
    return (kp_u["w1"], kp_u["b1"], kp_u["g"], kp_u["beta"], kp_u["w2"], kp_u["b2"])


def upscale1_call(x_slab, kp_u, final_gelu):
    """(M, Cin) row slab -> bf16 tap-major slab (4, M, 4*cout)."""
    M, Cin = x_slab.shape
    cmid, cout = kp_u["cmid"], kp_u["cout"]
    tile_m = M if M <= 1024 else 1024       # no pre-pad: ragged last block handled by Pallas
    return pl.pallas_call(
        functools.partial(_upscale1_kernel, cmid=cmid, cout=cout,
                          final_gelu=final_gelu, tile_m=tile_m),
        out_shape=jax.ShapeDtypeStruct((4, M, 4 * cout), jnp.bfloat16),
        grid=(pl.cdiv(M, tile_m),),
        in_specs=_upscale_specs(Cin, cmid, cout, tile_m),
        out_specs=pl.BlockSpec((4, tile_m, 4 * cout), lambda i: (0, i, 0)),
        compiler_params=_cp("parallel"),
    )(x_slab, *_upscale_args(kp_u))


def upscale2_call(xa_slab, xb_slab, kp_a, kp_b):
    """Fused HQ-feature branch: embedding_encoder(xa) + compress_vit_feat(xb), tap-domain sum."""
    M, Ca = xa_slab.shape
    _, Cb = xb_slab.shape
    cout = kp_a["cout"]
    tile_m = M if M <= 1024 else 1024
    return pl.pallas_call(
        functools.partial(_upscale2_kernel, cmid_a=kp_a["cmid"], cmid_b=kp_b["cmid"],
                          cout=cout, tile_m=tile_m),
        out_shape=jax.ShapeDtypeStruct((4, M, 4 * cout), jnp.bfloat16),
        grid=(pl.cdiv(M, tile_m),),
        in_specs=(_upscale_specs(Ca, kp_a["cmid"], cout, tile_m)
                  + _upscale_specs(Cb, kp_b["cmid"], cout, tile_m)),
        out_specs=pl.BlockSpec((4, tile_m, 4 * cout), lambda i: (0, i, 0)),
        compiler_params=_cp("parallel"),
    )(xa_slab, *_upscale_args(kp_a), xb_slab, *_upscale_args(kp_b))


def deinterleave_upscale(slab, N, H, W, cout):
    """bf16 tap-major slab (4, N*H*W, 4*cout) -> channels-last (N, 4H, 4W, cout)."""
    z = slab.reshape(2, 2, N, H, W, 2, 2, cout)          # (kh1, kw1, n, h, w, kh2, kw2, c)
    z = z.transpose(2, 3, 0, 5, 4, 1, 6, 7)              # (n, h, kh1, kh2, w, kw1, kw2, c)
    return z.reshape(N, 4 * H, 4 * W, cout)


# ----------------------------------------------------------------------------
# 3x3 convs of embedding_maskfeature (kw folded into channels, aligned kh slices)
# ----------------------------------------------------------------------------

def _fold_kw(x_cl):
    """channels-last (N, H, W, C) -> padded, row-flat slab with the kw taps folded into channels.

    Returns (slab (N, (H+2)*Wp, 3C) bf16, Wp, rows=H*Wp).  Wp is a multiple of 16, so the
    per-kh tap starts kh*Wp are packed-bf16 sublane-tile aligned (copy-free in-kernel slices).
    Columns w in [W, Wp) produce garbage outputs that are sliced off afterwards.
    """
    N, H, W, C = x_cl.shape
    Wp = -(-(W + 2) // 16) * 16
    pad_r = Wp + 2 - (W + 1)                              # left pad 1, padded width = Wp + 2
    xp = jnp.pad(x_cl, ((0, 0), (1, 1), (1, pad_r), (0, 0)))
    folded = jnp.concatenate([xp[:, :, 0:Wp], xp[:, :, 1:Wp + 1], xp[:, :, 2:Wp + 2]],
                             axis=-1)                     # channel groups = kw 0, 1, 2
    return folded.reshape(N, (H + 2) * Wp, 3 * C).astype(jnp.bfloat16), Wp, H * Wp


def _conv3x3_ln_gelu_kernel(x_ref, w_ref, b_ref, g_ref, beta_ref, o_ref, *, Wp, rows):
    """3x3 conv as 3 aligned shifted-slab matmuls (K=3*Cin), + LayerNorm2d + GELU epilogue."""
    acc = None
    for kh in range(3):
        start = kh * Wp                                   # multiple of 16 -> aligned slice
        xs = x_ref[0, start:start + rows, :]
        t = jnp.dot(xs, w_ref[kh], preferred_element_type=jnp.float32)
        acc = t if acc is None else acc + t
    acc = acc + b_ref[...]
    mu = jnp.mean(acc, axis=-1, keepdims=True)
    var = jnp.mean(jnp.square(acc - mu), axis=-1, keepdims=True)
    y = (acc - mu) * jax.lax.rsqrt(var + 1e-6) * g_ref[...] + beta_ref[...]
    o_ref[0] = _gelu(y).astype(o_ref.dtype)


def _conv3x3_add_kernel(x_ref, w_ref, b_ref, hq_ref, o_ref, *, Wp, rows):
    """3x3 conv with fused residual add of the (batch-broadcast) hq features."""
    acc = None
    for kh in range(3):
        start = kh * Wp
        xs = x_ref[0, start:start + rows, :]
        t = jnp.dot(xs, w_ref[kh], preferred_element_type=jnp.float32)
        acc = t if acc is None else acc + t
    o_ref[0] = (acc + b_ref[...] + hq_ref[0].astype(jnp.float32)).astype(o_ref.dtype)


# TODO(synk): strip-tile these two conv wrappers over rows (grid=(N, n_strips) with a 2-row halo)
#             for production 256x256 maps; per-batch blocks are tiny at the demo sizes.
def conv3x3_ln_gelu(x_cl, kp_c):
    N, H, W, Cin = x_cl.shape
    cout = kp_c["w"].shape[2]
    xf, Wp, rows = _fold_kw(x_cl)
    Lp = (H + 2) * Wp
    y = pl.pallas_call(
        functools.partial(_conv3x3_ln_gelu_kernel, Wp=Wp, rows=rows),
        out_shape=jax.ShapeDtypeStruct((N, rows, cout), jnp.bfloat16),
        grid=(N,),
        in_specs=[pl.BlockSpec((1, Lp, 3 * Cin), lambda n: (n, 0, 0)),
                  pl.BlockSpec((3, 3 * Cin, cout), lambda n: (0, 0, 0)),
                  pl.BlockSpec((1, cout), lambda n: (0, 0)),
                  pl.BlockSpec((1, cout), lambda n: (0, 0)),
                  pl.BlockSpec((1, cout), lambda n: (0, 0))],
        out_specs=pl.BlockSpec((1, rows, cout), lambda n: (n, 0, 0)),
        compiler_params=_cp("parallel"),
    )(xf, kp_c["w"], kp_c["b"], kp_c["g"], kp_c["beta"])
    return y.reshape(N, H, Wp, cout)[:, :, :W, :]


def conv3x3_add(x_cl, kp_c, hq_cl):
    N, H, W, Cin = x_cl.shape
    cout = kp_c["w"].shape[2]
    xf, Wp, rows = _fold_kw(x_cl)
    Lp = (H + 2) * Wp
    hqf = jnp.pad(hq_cl, ((0, 0), (0, 0), (0, Wp - W), (0, 0))
                  ).reshape(1, rows, cout).astype(jnp.bfloat16)
    y = pl.pallas_call(
        functools.partial(_conv3x3_add_kernel, Wp=Wp, rows=rows),
        out_shape=jax.ShapeDtypeStruct((N, rows, cout), jnp.bfloat16),
        grid=(N,),
        in_specs=[pl.BlockSpec((1, Lp, 3 * Cin), lambda n: (n, 0, 0)),
                  pl.BlockSpec((3, 3 * Cin, cout), lambda n: (0, 0, 0)),
                  pl.BlockSpec((1, cout), lambda n: (0, 0)),
                  pl.BlockSpec((1, rows, cout), lambda n: (0, 0, 0))],  # hq: broadcast block 0
        out_specs=pl.BlockSpec((1, rows, cout), lambda n: (n, 0, 0)),
        compiler_params=_cp("parallel"),
    )(xf, kp_c["w"], kp_c["b"], hqf)
    return y.reshape(N, H, Wp, cout)[:, :, :W, :]


# ----------------------------------------------------------------------------
# Two-way transformer stand-in (tokens <-> image), one batch element per grid step
# ----------------------------------------------------------------------------

def _transformer_kernel(tok_ref, img_ref, pe_ref, dense_ref, w_ref, hs_ref, src_ref, *, scale):
    tok = tok_ref[0]                                   # (T, C) f32
    src = img_ref[0] + dense_ref[0]                    # (HW, C) f32
    kin = src + pe_ref[0]

    def mm(a, wi):
        return jnp.dot(a.astype(jnp.bfloat16), w_ref[wi], preferred_element_type=jnp.float32)

    def mm_bf(a, wi):                                  # bf16 output -> feeds the next MXU op
        return mm(a, wi).astype(jnp.bfloat16)

    def softmax(s):
        s = s - jnp.max(s, axis=-1, keepdims=True)
        p = jnp.exp(s)
        return p * pl.reciprocal(jnp.sum(p, axis=-1, keepdims=True), approx=True)

    dims = (((1,), (1,)), ((), ()))
    # tokens -> image
    q, k, v = mm_bf(tok, 0), mm_bf(kin, 1), mm_bf(src, 2)
    p = softmax(jax.lax.dot_general(q, k, dims, preferred_element_type=jnp.float32) * scale)
    attn = jnp.dot(p.astype(jnp.bfloat16), v, preferred_element_type=jnp.float32)
    hs = tok + mm(attn, 3)
    hs_ref[0] = hs
    # image -> tokens
    q2, k2, v2 = mm_bf(kin, 4), mm_bf(hs, 5), mm_bf(hs, 6)
    p2 = softmax(jax.lax.dot_general(q2, k2, dims, preferred_element_type=jnp.float32) * scale)
    attn2 = jnp.dot(p2.astype(jnp.bfloat16), v2, preferred_element_type=jnp.float32)
    src_ref[0] = (src + mm(attn2, 7)).astype(src_ref.dtype)


def transformer_call(tokens, img_cl, pe_cl, dense_cl, wstack, scale):
    B, T, C = tokens.shape
    HW = img_cl.shape[1]
    return pl.pallas_call(
        functools.partial(_transformer_kernel, scale=scale),
        out_shape=(jax.ShapeDtypeStruct((B, T, C), jnp.float32),
                   jax.ShapeDtypeStruct((B, HW, C), jnp.bfloat16)),
        grid=(B,),
        in_specs=[pl.BlockSpec((1, T, C), lambda b: (b, 0, 0)),
                  pl.BlockSpec((1, HW, C), lambda b: (0, 0, 0)),   # image emb: broadcast block 0
                  pl.BlockSpec((1, HW, C), lambda b: (0, 0, 0)),   # image pe : broadcast block 0
                  pl.BlockSpec((1, HW, C), lambda b: (b, 0, 0)),
                  pl.BlockSpec((8, C, C), lambda b: (0, 0, 0))],
        out_specs=(pl.BlockSpec((1, T, C), lambda b: (b, 0, 0)),
                   pl.BlockSpec((1, HW, C), lambda b: (b, 0, 0))),
        compiler_params=_cp("parallel"),
    )(tokens, img_cl, pe_cl, dense_cl, wstack)


# ----------------------------------------------------------------------------
# Fused heads: all 5 hypernetwork MLPs + iou prediction head in ONE pallas_call
# ----------------------------------------------------------------------------

def _heads_kernel(tok_ref, iou_ref, hw1, hb1, hw2, hb2, hw3, hb3,
                  iw1, ib1, iw2, ib2, iw3, ib3, hyper_o, iou_o):
    n = hyper_o.shape[0]
    for i in range(n):                                   # unrolled: 5 tiny 3-layer MLPs
        x = tok_ref[i]                                   # (B, C)
        h = jnp.maximum(jnp.dot(x.astype(jnp.bfloat16), hw1[i],
                                preferred_element_type=jnp.float32) + hb1[i], 0.0)
        h = jnp.maximum(jnp.dot(h.astype(jnp.bfloat16), hw2[i],
                                preferred_element_type=jnp.float32) + hb2[i], 0.0)
        hyper_o[i] = jnp.dot(h.astype(jnp.bfloat16), hw3[i],
                             preferred_element_type=jnp.float32) + hb3[i]
    x = iou_ref[...]
    h = jnp.maximum(jnp.dot(x.astype(jnp.bfloat16), iw1[...],
                            preferred_element_type=jnp.float32) + ib1[...], 0.0)
    h = jnp.maximum(jnp.dot(h.astype(jnp.bfloat16), iw2[...],
                            preferred_element_type=jnp.float32) + ib2[...], 0.0)
    iou_o[...] = jnp.dot(h.astype(jnp.bfloat16), iw3[...],
                         preferred_element_type=jnp.float32) + ib3[...]


def heads_call(mask_tokens_out, iou_token_out, kh):
    B, n, C = mask_tokens_out.shape
    d = kh["hw3"].shape[2]
    hid = kh["iw1"].shape[1]
    no = kh["iw3"].shape[1]
    tok5 = mask_tokens_out.transpose(1, 0, 2)            # (5, B, C)
    hyper, iou = pl.pallas_call(
        _heads_kernel,
        out_shape=(jax.ShapeDtypeStruct((n, B, d), jnp.float32),
                   jax.ShapeDtypeStruct((B, no), jnp.float32)),
        grid=(1,),
        in_specs=[pl.BlockSpec((n, B, C), lambda i: (0, 0, 0)),
                  pl.BlockSpec((B, C), lambda i: (0, 0)),
                  pl.BlockSpec((n, C, C), lambda i: (0, 0, 0)),
                  pl.BlockSpec((n, 1, C), lambda i: (0, 0, 0)),
                  pl.BlockSpec((n, C, C), lambda i: (0, 0, 0)),
                  pl.BlockSpec((n, 1, C), lambda i: (0, 0, 0)),
                  pl.BlockSpec((n, C, d), lambda i: (0, 0, 0)),
                  pl.BlockSpec((n, 1, d), lambda i: (0, 0, 0)),
                  pl.BlockSpec((C, hid), lambda i: (0, 0)),
                  pl.BlockSpec((1, hid), lambda i: (0, 0)),
                  pl.BlockSpec((hid, hid), lambda i: (0, 0)),
                  pl.BlockSpec((1, hid), lambda i: (0, 0)),
                  pl.BlockSpec((hid, no), lambda i: (0, 0)),
                  pl.BlockSpec((1, no), lambda i: (0, 0))],
        out_specs=(pl.BlockSpec((n, B, d), lambda i: (0, 0, 0)),
                   pl.BlockSpec((B, no), lambda i: (0, 0))),
        compiler_params=_cp("arbitrary"),
    )(tok5, iou_token_out, kh["hw1"], kh["hb1"], kh["hw2"], kh["hb2"], kh["hw3"], kh["hb3"],
      kh["iw1"], kh["ib1"], kh["iw2"], kh["ib2"], kh["iw3"], kh["ib3"])
    return hyper.transpose(1, 0, 2), iou


# ----------------------------------------------------------------------------
# Mask batched matmuls: hyper_in @ upscaled embeddings (HW tiled into the grid, single store)
# ----------------------------------------------------------------------------

def _mask_bmm_kernel(h_ref, sam_ref, hq_ref, o_ref, *, n_sam):
    h = h_ref[0].astype(jnp.bfloat16)                    # (5, d)
    dims = (((1,), (1,)), ((), ()))                      # contract channel dim of both
    sam = jax.lax.dot_general(h[:n_sam], sam_ref[0], dims, preferred_element_type=jnp.float32)
    hq = jax.lax.dot_general(h[n_sam:], hq_ref[0], dims, preferred_element_type=jnp.float32)
    o_ref[0] = jnp.concatenate([sam, hq], axis=0)        # single (5, chunk) store


def mask_bmm(hyper_in, sam_flat, hq_flat):
    B, n, d = hyper_in.shape
    HW = sam_flat.shape[1]
    chunk = HW if HW <= 4096 else 4096
    return pl.pallas_call(
        functools.partial(_mask_bmm_kernel, n_sam=n - 1),
        out_shape=jax.ShapeDtypeStruct((B, n, HW), jnp.float32),
        grid=(B, pl.cdiv(HW, chunk)),
        in_specs=[pl.BlockSpec((1, n, d), lambda b, k: (b, 0, 0)),
                  pl.BlockSpec((1, chunk, d), lambda b, k: (b, k, 0)),
                  pl.BlockSpec((1, chunk, d), lambda b, k: (b, k, 0))],
        out_specs=pl.BlockSpec((1, n, chunk), lambda b, k: (b, 0, k)),
        compiler_params=_cp("parallel", "parallel"),
    )(hyper_in, sam_flat, hq_flat)


# ----------------------------------------------------------------------------
# Parameters (PyTorch layout) and kernel-layout preparation (done once)
# ----------------------------------------------------------------------------

def init_params(key, tdim=32, vit_dim=64, iou_hidden=64):
    keys = iter(jax.random.split(key, 128))

    def W(shape, scale=0.02):
        return scale * jax.random.normal(next(keys), shape, jnp.float32)

    def zeros(s):
        return jnp.zeros(s, jnp.float32)

    def ones(s):
        return jnp.ones(s, jnp.float32)

    t4, t8 = tdim // 4, tdim // 8

    def mlp(dims):
        return [(W((o, i)), zeros((o,))) for (i, o) in dims]

    def upscale_params(cin, cmid, cout):
        return {"ct1_w": W((cin, cmid, 2, 2)), "ct1_b": zeros((cmid,)),
                "ln_g": ones((cmid,)), "ln_b": zeros((cmid,)),
                "ct2_w": W((cmid, cout, 2, 2)), "ct2_b": zeros((cout,))}

    return {
        "iou_token": W((1, tdim)),
        "mask_tokens": W((4, tdim)),           # num_multimask_outputs + 1
        "hf_token": W((1, tdim)),
        "output_upscaling": upscale_params(tdim, t4, t8),
        "embedding_encoder": upscale_params(tdim, t4, t8),
        "compress_vit_feat": upscale_params(vit_dim, tdim, t8),
        "embedding_maskfeature": {
            "c1_w": W((t4, t8, 3, 3)), "c1_b": zeros((t4,)),
            "ln_g": ones((t4,)), "ln_b": zeros((t4,)),
            "c2_w": W((t8, t4, 3, 3)), "c2_b": zeros((t8,)),
        },
        "hyper_mlps": [mlp([(tdim, tdim), (tdim, tdim), (tdim, t8)]) for _ in range(4)],
        "hf_mlp": mlp([(tdim, tdim), (tdim, tdim), (tdim, t8)]),
        # iou head built BEFORE num_mask_tokens += 1 in the PyTorch ctor -> output dim 4
        "iou_head": mlp([(tdim, iou_hidden), (iou_hidden, iou_hidden), (iou_hidden, 4)]),
        "transformer": {n: W((tdim, tdim))
                        for n in ["wq", "wk", "wv", "wo", "wq2", "wk2", "wv2", "wo2"]},
    }


def prepare_params(p, tdim):
    """Reorder / pack weights into kernel-ready matrices; matmul weights cast to bf16."""
    bf = jnp.bfloat16
    t4, t8 = tdim // 4, tdim // 8

    def prep_upscale(pp):
        cin, cmid = pp["ct1_w"].shape[0], pp["ct1_w"].shape[1]
        cout = pp["ct2_w"].shape[1]
        return {
            # ConvT weight (Cin, Cout, kh, kw) -> (Cin, (kh, kw, Cout))
            "w1": pp["ct1_w"].transpose(0, 2, 3, 1).reshape(cin, 4 * cmid).astype(bf),
            "b1": jnp.tile(pp["ct1_b"], 4).reshape(1, 4 * cmid),
            "g": pp["ln_g"].reshape(1, cmid), "beta": pp["ln_b"].reshape(1, cmid),
            "w2": pp["ct2_w"].transpose(0, 2, 3, 1).reshape(cmid, 4 * cout).astype(bf),
            "b2": jnp.tile(pp["ct2_b"], 4).reshape(1, 4 * cout),
            "cmid": cmid, "cout": cout,
        }

    def prep_conv3(w, b, g=None, beta=None):
        cout, cin = w.shape[0], w.shape[1]
        # Conv weight (Cout, Cin, kh, kw) -> (kh, (kw, Cin), Cout)  [kw folded into channels]
        d = {"w": w.transpose(2, 3, 1, 0).reshape(3, 3 * cin, cout).astype(bf),
             "b": b.reshape(1, cout)}
        if g is not None:
            d["g"] = g.reshape(1, cout)
            d["beta"] = beta.reshape(1, cout)
        return d

    def prep_heads(hyper_mlps, hf_mlp, iou_mlp):
        mlps = hyper_mlps + [hf_mlp]
        return {"hw1": jnp.stack([m[0][0].T for m in mlps]).astype(bf),
                "hb1": jnp.stack([m[0][1] for m in mlps])[:, None, :],
                "hw2": jnp.stack([m[1][0].T for m in mlps]).astype(bf),
                "hb2": jnp.stack([m[1][1] for m in mlps])[:, None, :],
                "hw3": jnp.stack([m[2][0].T for m in mlps]).astype(bf),
                "hb3": jnp.stack([m[2][1] for m in mlps])[:, None, :],
                "iw1": iou_mlp[0][0].T.astype(bf), "ib1": iou_mlp[0][1].reshape(1, -1),
                "iw2": iou_mlp[1][0].T.astype(bf), "ib2": iou_mlp[1][1].reshape(1, -1),
                "iw3": iou_mlp[2][0].T.astype(bf), "ib3": iou_mlp[2][1].reshape(1, -1)}

    mf = p["embedding_maskfeature"]
    return {
        "t8": t8, "t4": t4,
        "iou_token": p["iou_token"], "mask_tokens": p["mask_tokens"], "hf_token": p["hf_token"],
        "embedding_encoder": prep_upscale(p["embedding_encoder"]),
        "compress_vit_feat": prep_upscale(p["compress_vit_feat"]),
        "output_upscaling": prep_upscale(p["output_upscaling"]),
        "maskfeature_c1": prep_conv3(mf["c1_w"], mf["c1_b"], mf["ln_g"], mf["ln_b"]),
        "maskfeature_c2": prep_conv3(mf["c2_w"], mf["c2_b"]),
        "heads": prep_heads(p["hyper_mlps"], p["hf_mlp"], p["iou_head"]),
        "transformer_w": jnp.stack([p["transformer"][n] for n in
                                    ["wq", "wk", "wv", "wo", "wq2", "wk2", "wv2", "wo2"]]
                                   ).astype(bf),
    }


# ----------------------------------------------------------------------------
# MaskDecoderHQ forward
# ----------------------------------------------------------------------------

def mask_decoder_hq_forward(kp, image_embeddings, image_pe, sparse_prompt_embeddings,
                            dense_prompt_embeddings, multimask_output, hq_token_only,
                            interm_embeddings):
    _, C, H, W = image_embeddings.shape
    B = sparse_prompt_embeddings.shape[0]
    HW = H * W
    t8 = kp["t8"]

    # channels-last flattened views (single cheap layout ops)
    img_cl = image_embeddings.transpose(0, 2, 3, 1).reshape(1, HW, C)
    pe_cl = image_pe.transpose(0, 2, 3, 1).reshape(1, HW, C)
    dense_cl = dense_prompt_embeddings.transpose(0, 2, 3, 1).reshape(B, HW, C)
    vit_cl = interm_embeddings[0].reshape(1, HW, -1)          # already NHWC in the reference

    # ---- HQ feature branch: ONE fused dual-upscale kernel, summed in tap domain (bf16) ----
    hq_slab = upscale2_call(img_cl.reshape(HW, C), vit_cl.reshape(HW, -1),
                            kp["embedding_encoder"], kp["compress_vit_feat"])
    hq_cl = deinterleave_upscale(hq_slab, 1, H, W, t8)        # (1, 4H, 4W, t8) bf16

    # ---- tokens + fused two-way transformer ----
    output_tokens = jnp.concatenate([kp["iou_token"], kp["mask_tokens"], kp["hf_token"]], axis=0)
    output_tokens = jnp.broadcast_to(output_tokens[None], (B,) + output_tokens.shape)
    tokens = jnp.concatenate([output_tokens, sparse_prompt_embeddings], axis=1)   # (B, T, C)

    hs, src_out = transformer_call(tokens, img_cl, pe_cl, dense_cl,
                                   kp["transformer_w"], 1.0 / (C ** 0.5))
    iou_token_out = hs[:, 0, :]
    mask_tokens_out = hs[:, 1:1 + 5, :]                                            # 5 tokens

    # ---- output upscaling (fused ConvT->LN->GELU->ConvT->GELU), bf16 slab ----
    sam_slab = upscale1_call(src_out.reshape(B * HW, C), kp["output_upscaling"], final_gelu=True)
    up_sam_cl = deinterleave_upscale(sam_slab, B, H, W, t8)   # (B, 4H, 4W, t8) bf16

    # ---- HQ mask features: two fused conv3x3 kernels (LN+GELU / hq-add epilogues) ----
    mf1 = conv3x3_ln_gelu(up_sam_cl, kp["maskfeature_c1"])    # (B, 4H, 4W, t4) bf16
    up_hq_cl = conv3x3_add(mf1, kp["maskfeature_c2"], hq_cl)  # (B, 4H, 4W, t8) bf16

    # ---- fused heads (5 hypernet MLPs + iou head) and mask matmuls ----
    hyper_in, iou_pred = heads_call(mask_tokens_out, iou_token_out, kp["heads"])
    H4, W4 = 4 * H, 4 * W
    sam_flat = up_sam_cl.reshape(B, H4 * W4, t8)
    hq_flat = up_hq_cl.reshape(B, H4 * W4, t8)
    masks = mask_bmm(hyper_in, sam_flat, hq_flat).reshape(B, 5, H4, W4)

    # ---- output selection (same semantics as the PyTorch forward) ----
    num_mask_tokens = 5
    if multimask_output:
        iou_p = iou_pred[:, 1:num_mask_tokens - 1]
        max_idx = jnp.argmax(iou_p, axis=1)
        iou_out = jnp.max(iou_p, axis=1, keepdims=True)
        masks_multi = masks[:, 1:num_mask_tokens - 1]
        masks_sam = masks_multi[jnp.arange(B), max_idx][:, None]
    else:
        iou_out = iou_pred[:, 0:1]
        masks_sam = masks[:, 0:1]
    masks_hq = masks[:, num_mask_tokens - 1:num_mask_tokens]
    out_masks = masks_hq if hq_token_only else masks_sam + masks_hq
    return out_masks, iou_out


# ----------------------------------------------------------------------------
# Main
# ----------------------------------------------------------------------------

if __name__ == "__main__":
    key = jax.random.PRNGKey(0)
    kp0, k1, k2, k3, k4, k5 = jax.random.split(key, 6)

    tdim, vit_dim = 32, 64          # small synthetic sizes (transformer_dim=32, vit_dim=64)
    B, H, W, Ns = 2, 8, 8, 2        # batch, image-embedding spatial, sparse prompt count

    raw_params = init_params(kp0, tdim=tdim, vit_dim=vit_dim, iou_hidden=64)
    params = prepare_params(raw_params, tdim)

    image_embeddings = jax.random.normal(k1, (1, tdim, H, W), jnp.float32)
    image_pe = jax.random.normal(k2, (1, tdim, H, W), jnp.float32)
    sparse_prompt_embeddings = jax.random.normal(k3, (B, Ns, tdim), jnp.float32)
    dense_prompt_embeddings = jax.random.normal(k4, (B, tdim, H, W), jnp.float32)
    interm_embeddings = [jax.random.normal(k5, (1, H, W, vit_dim), jnp.float32)]

    masks, iou_pred = mask_decoder_hq_forward(
        params, image_embeddings, image_pe, sparse_prompt_embeddings,
        dense_prompt_embeddings, multimask_output=True, hq_token_only=False,
        interm_embeddings=interm_embeddings)

    jax.block_until_ready((masks, iou_pred))
    assert masks.shape == (B, 1, 4 * H, 4 * W), masks.shape
    assert iou_pred.shape == (B, 1), iou_pred.shape
    print("KERNEL_OK")
</pallas_src>

<mosaic_0001>
module attributes {stable_mosaic.version = 11 : i64} {
  func.func @_upscale2_kernel(%arg0: i32, %arg1: memref<64x32xf32, #tpu.memory_space<vmem>>, %arg2: memref<32x32xbf16, #tpu.memory_space<vmem>>, %arg3: memref<1x32xf32, #tpu.memory_space<vmem>>, %arg4: memref<1x8xf32, #tpu.memory_space<vmem>>, %arg5: memref<1x8xf32, #tpu.memory_space<vmem>>, %arg6: memref<8x16xbf16, #tpu.memory_space<vmem>>, %arg7: memref<1x16xf32, #tpu.memory_space<vmem>>, %arg8: memref<64x64xf32, #tpu.memory_space<vmem>>, %arg9: memref<64x128xbf16, #tpu.memory_space<vmem>>, %arg10: memref<1x128xf32, #tpu.memory_space<vmem>>, %arg11: memref<1x32xf32, #tpu.memory_space<vmem>>, %arg12: memref<1x32xf32, #tpu.memory_space<vmem>>, %arg13: memref<32x16xbf16, #tpu.memory_space<vmem>>, %arg14: memref<1x16xf32, #tpu.memory_space<vmem>>, %arg15: memref<4x64x16xbf16, #tpu.memory_space<vmem>>) attributes {dimension_semantics = [#tpu.dimension_semantics<parallel>], iteration_bounds = array<i64: 1>, scalar_prefetch = 0 : i64, scratch_operands = 0 : i64, tpu.core_type = #tpu.core_type<tc>, window_params = [{transform_indices = @transform_0, window_bounds = array<i64: 64, 32>}, {pipeline_mode = #tpu.pipeline_mode<synchronous>, transform_indices = @transform_1, window_bounds = array<i64: 32, 32>}, {pipeline_mode = #tpu.pipeline_mode<synchronous>, transform_indices = @transform_2, window_bounds = array<i64: 1, 32>}, {pipeline_mode = #tpu.pipeline_mode<synchronous>, transform_indices = @transform_3, window_bounds = array<i64: 1, 8>}, {pipeline_mode = #tpu.pipeline_mode<synchronous>, transform_indices = @transform_4, window_bounds = array<i64: 1, 8>}, {pipeline_mode = #tpu.pipeline_mode<synchronous>, transform_indices = @transform_5, window_bounds = array<i64: 8, 16>}, {pipeline_mode = #tpu.pipeline_mode<synchronous>, transform_indices = @transform_6, window_bounds = array<i64: 1, 16>}, {transform_indices = @transform_7, window_bounds = array<i64: 64, 64>}, {pipeline_mode = #tpu.pipeline_mode<synchronous>, transform_indices = @transform_8, window_bounds = array<i64: 64, 128>}, {pipeline_mode = #tpu.pipeline_mode<synchronous>, transform_indices = @transform_9, window_bounds = array<i64: 1, 128>}, {pipeline_mode = #tpu.pipeline_mode<synchronous>, transform_indices = @transform_10, window_bounds = array<i64: 1, 32>}, {pipeline_mode = #tpu.pipeline_mode<synchronous>, transform_indices = @transform_11, window_bounds = array<i64: 1, 32>}, {pipeline_mode = #tpu.pipeline_mode<synchronous>, transform_indices = @transform_12, window_bounds = array<i64: 32, 16>}, {pipeline_mode = #tpu.pipeline_mode<synchronous>, transform_indices = @transform_13, window_bounds = array<i64: 1, 16>}, {transform_indices = @transform_14, window_bounds = array<i64: 4, 64, 16>}]} {
    %c0 = arith.constant 0 : index
    %c0_0 = arith.constant 0 : index
    %0 = vector.load %arg1[%c0, %c0_0] : memref<64x32xf32, #tpu.memory_space<vmem>>, vector<64x32xf32>
    %1 = arith.truncf %0 : vector<64x32xf32> to vector<64x32xbf16>
    %c0_1 = arith.constant 0 : index
    %c0_2 = arith.constant 0 : index
    %2 = vector.load %arg2[%c0_1, %c0_2] : memref<32x32xbf16, #tpu.memory_space<vmem>>, vector<32x32xbf16>
    %c0_3 = arith.constant 0 : index
    %c0_4 = arith.constant 0 : index
    %3 = vector.load %arg3[%c0_3, %c0_4] : memref<1x32xf32, #tpu.memory_space<vmem>>, vector<1x32xf32>
    %c0_5 = arith.constant 0 : index
    %c0_6 = arith.constant 0 : index
    %4 = vector.load %arg4[%c0_5, %c0_6] : memref<1x8xf32, #tpu.memory_space<vmem>>, vector<1x8xf32>
    %c0_7 = arith.constant 0 : index
    %c0_8 = arith.constant 0 : index
    %5 = vector.load %arg5[%c0_7, %c0_8] : memref<1x8xf32, #tpu.memory_space<vmem>>, vector<1x8xf32>
    %c0_9 = arith.constant 0 : index
    %c0_10 = arith.constant 0 : index
    %6 = vector.load %arg6[%c0_9, %c0_10] : memref<8x16xbf16, #tpu.memory_space<vmem>>, vector<8x16xbf16>
    %c0_11 = arith.constant 0 : index
    %c0_12 = arith.constant 0 : index
    %7 = vector.load %arg7[%c0_11, %c0_12] : memref<1x16xf32, #tpu.memory_space<vmem>>, vector<1x16xf32>
    %cst = arith.constant dense<0.000000e+00> : vector<64x32xf32>
    %8 = tpu.matmul %1, %2, %cst {dimension_numbers = #tpu.dot_dimension_numbers<[1], [0], [0], [1], [0, 0, 1, 1], [], []>} : vector<64x32xbf16>, vector<32x32xbf16>, vector<64x32xf32> -> vector<64x32xf32>
    %9 = vector.broadcast %3 : vector<1x32xf32> to vector<64x32xf32>
    %10 = arith.addf %8, %9 : vector<64x32xf32>
    %11 = vector.extract_strided_slice %10 {offsets = [0, 0], sizes = [64, 8], strides = [1, 1]} : vector<64x32xf32> to vector<64x8xf32>
    %cst_13 = arith.constant dense<0.000000e+00> : vector<64xf32>
    %12 = vector.multi_reduction <add>, %11, %cst_13 [1] : vector<64x8xf32> to vector<64xf32>
    %13 = vector.shape_cast %12 : vector<64xf32> to vector<64x1xf32>
    %cst_14 = arith.constant 8.000000e+00 : f32
    %14 = vector.broadcast %cst_14 : f32 to vector<64x1xf32>
    %15 = arith.divf %13, %14 : vector<64x1xf32>
    %16 = vector.broadcast %15 : vector<64x1xf32> to vector<64x8xf32>
    %17 = arith.subf %11, %16 : vector<64x8xf32>
    %18 = arith.mulf %17, %17 : vector<64x8xf32>
    %cst_15 = arith.constant dense<0.000000e+00> : vector<64xf32>
    %19 = vector.multi_reduction <add>, %18, %cst_15 [1] : vector<64x8xf32> to vector<64xf32>
    %20 = vector.shape_cast %19 : vector<64xf32> to vector<64x1xf32>
    %cst_16 = arith.constant 8.000000e+00 : f32
    %21 = vector.broadcast %cst_16 : f32 to vector<64x1xf32>
    %22 = arith.divf %20, %21 : vector<64x1xf32>
    %23 = vector.broadcast %15 : vector<64x1xf32> to vector<64x8xf32>
    %24 = arith.subf %11, %23 : vector<64x8xf32>
    %cst_17 = arith.constant 9.99999997E-7 : f32
    %25 = vector.broadcast %cst_17 : f32 to vector<64x1xf32>
    %26 = arith.addf %22, %25 : vector<64x1xf32>
    %27 = math.rsqrt %26 : vector<64x1xf32>
    %28 = vector.broadcast %27 : vector<64x1xf32> to vector<64x8xf32>
    %29 = arith.mulf %24, %28 : vector<64x8xf32>
    %30 = vector.broadcast %4 : vector<1x8xf32> to vector<64x8xf32>
    %31 = arith.mulf %29, %30 : vector<64x8xf32>
    %32 = vector.broadcast %5 : vector<1x8xf32> to vector<64x8xf32>
    %33 = arith.addf %31, %32 : vector<64x8xf32>
    %34 = arith.mulf %33, %33 : vector<64x8xf32>
    %35 = arith.mulf %33, %34 : vector<64x8xf32>
    %cst_18 = arith.constant 4.471500e-02 : f32
    %36 = vector.broadcast %cst_18 : f32 to vector<64x8xf32>
    %37 = arith.mulf %36, %35 : vector<64x8xf32>
    %38 = arith.addf %33, %37 : vector<64x8xf32>
    %cst_19 = arith.constant 0.797884583 : f32
    %39 = vector.broadcast %cst_19 : f32 to vector<64x8xf32>
    %40 = arith.mulf %39, %38 : vector<64x8xf32>
    %41 = math.tanh %40 : vector<64x8xf32>
    %cst_20 = arith.constant 1.000000e+00 : f32
    %42 = vector.broadcast %cst_20 : f32 to vector<64x8xf32>
    %43 = arith.addf %42, %41 : vector<64x8xf32>
    %cst_21 = arith.constant 5.000000e-01 : f32
    %44 = vector.broadcast %cst_21 : f32 to vector<64x8xf32>
    %45 = arith.mulf %44, %43 : vector<64x8xf32>
    %46 = arith.mulf %33, %45 : vector<64x8xf32>
    %47 = arith.truncf %46 : vector<64x8xf32> to vector<64x8xbf16>
    %48 = vector.extract_strided_slice %10 {offsets = [0, 8], sizes = [64, 8], strides = [1, 1]} : vector<64x32xf32> to vector<64x8xf32>
    %cst_22 = arith.constant dense<0.000000e+00> : vector<64xf32>
    %49 = vector.multi_reduction <add>, %48, %cst_22 [1] : vector<64x8xf32> to vector<64xf32>
    %50 = vector.shape_cast %49 : vector<64xf32> to vector<64x1xf32>
    %cst_23 = arith.constant 8.000000e+00 : f32
    %51 = vector.broadcast %cst_23 : f32 to vector<64x1xf32>
    %52 = arith.divf %50, %51 : vector<64x1xf32>
    %53 = vector.broadcast %52 : vector<64x1xf32> to vector<64x8xf32>
    %54 = arith.subf %48, %53 : vector<64x8xf32>
    %55 = arith.mulf %54, %54 : vector<64x8xf32>
    %cst_24 = arith.constant dense<0.000000e+00> : vector<64xf32>
    %56 = vector.multi_reduction <add>, %55, %cst_24 [1] : vector<64x8xf32> to vector<64xf32>
    %57 = vector.shape_cast %56 : vector<64xf32> to vector<64x1xf32>
    %cst_25 = arith.constant 8.000000e+00 : f32
    %58 = vector.broadcast %cst_25 : f32 to vector<64x1xf32>
    %59 = arith.divf %57, %58 : vector<64x1xf32>
    %60 = vector.broadcast %52 : vector<64x1xf32> to vector<64x8xf32>
    %61 = arith.subf %48, %60 : vector<64x8xf32>
    %cst_26 = arith.constant 9.99999997E-7 : f32
    %62 = vector.broadcast %cst_26 : f32 to vector<64x1xf32>
    %63 = arith.addf %59, %62 : vector<64x1xf32>
    %64 = math.rsqrt %63 : vector<64x1xf32>
    %65 = vector.broadcast %64 : vector<64x1xf32> to vector<64x8xf32>
    %66 = arith.mulf %61, %65 : vector<64x8xf32>
    %67 = vector.broadcast %4 : vector<1x8xf32> to vector<64x8xf32>
    %68 = arith.mulf %66, %67 : vector<64x8xf32>
    %69 = vector.broadcast %5 : vector<1x8xf32> to vector<64x8xf32>
    %70 = arith.addf %68, %69 : vector<64x8xf32>
    %71 = arith.mulf %70, %70 : vector<64x8xf32>
    %72 = arith.mulf %70, %71 : vector<64x8xf32>
    %cst_27 = arith.constant 4.471500e-02 : f32
    %73 = vector.broadcast %cst_27 : f32 to vector<64x8xf32>
    %74 = arith.mulf %73, %72 : vector<64x8xf32>
    %75 = arith.addf %70, %74 : vector<64x8xf32>
    %cst_28 = arith.constant 0.797884583 : f32
    %76 = vector.broadcast %cst_28 : f32 to vector<64x8xf32>
    %77 = arith.mulf %76, %75 : vector<64x8xf32>
    %78 = math.tanh %77 : vector<64x8xf32>
    %cst_29 = arith.constant 1.000000e+00 : f32
    %79 = vector.broadcast %cst_29 : f32 to vector<64x8xf32>
    %80 = arith.addf %79, %78 : vector<64x8xf32>
    %cst_30 = arith.constant 5.000000e-01 : f32
    %81 = vector.broadcast %cst_30 : f32 to vector<64x8xf32>
    %82 = arith.mulf %81, %80 : vector<64x8xf32>
    %83 = arith.mulf %70, %82 : vector<64x8xf32>
    %84 = arith.truncf %83 : vector<64x8xf32> to vector<64x8xbf16>
    %85 = vector.extract_strided_slice %10 {offsets = [0, 16], sizes = [64, 8], strides = [1, 1]} : vector<64x32xf32> to vector<64x8xf32>
    %cst_31 = arith.constant dense<0.000000e+00> : vector<64xf32>
    %86 = vector.multi_reduction <add>, %85, %cst_31 [1] : vector<64x8xf32> to vector<64xf32>
    %87 = vector.shape_cast %86 : vector<64xf32> to vector<64x1xf32>
    %cst_32 = arith.constant 8.000000e+00 : f32
    %88 = vector.broadcast %cst_32 : f32 to vector<64x1xf32>
    %89 = arith.divf %87, %88 : vector<64x1xf32>
    %90 = vector.broadcast %89 : vector<64x1xf32> to vector<64x8xf32>
    %91 = arith.subf %85, %90 : vector<64x8xf32>
    %92 = arith.mulf %91, %91 : vector<64x8xf32>
    %cst_33 = arith.constant dense<0.000000e+00> : vector<64xf32>
    %93 = vector.multi_reduction <add>, %92, %cst_33 [1] : vector<64x8xf32> to vector<64xf32>
    %94 = vector.shape_cast %93 : vector<64xf32> to vector<64x1xf32>
    %cst_34 = arith.constant 8.000000e+00 : f32
    %95 = vector.broadcast %cst_34 : f32 to vector<64x1xf32>
    %96 = arith.divf %94, %95 : vector<64x1xf32>
    %97 = vector.broadcast %89 : vector<64x1xf32> to vector<64x8xf32>
    %98 = arith.subf %85, %97 : vector<64x8xf32>
    %cst_35 = arith.constant 9.99999997E-7 : f32
    %99 = vector.broadcast %cst_35 : f32 to vector<64x1xf32>
    %100 = arith.addf %96, %99 : vector<64x1xf32>
    %101 = math.rsqrt %100 : vector<64x1xf32>
    %102 = vector.broadcast %101 : vector<64x1xf32> to vector<64x8xf32>
    %103 = arith.mulf %98, %102 : vector<64x8xf32>
    %104 = vector.broadcast %4 : vector<1x8xf32> to vector<64x8xf32>
    %105 = arith.mulf %103, %104 : vector<64x8xf32>
    %106 = vector.broadcast %5 : vector<1x8xf32> to vector<64x8xf32>
    %107 = arith.addf %105, %106 : vector<64x8xf32>
    %108 = arith.mulf %107, %107 : vector<64x8xf32>
    %109 = arith.mulf %107, %108 : vector<64x8xf32>
    %cst_36 = arith.constant 4.471500e-02 : f32
    %110 = vector.broadcast %cst_36 : f32 to vector<64x8xf32>
    %111 = arith.mulf %110, %109 : vector<64x8xf32>
    %112 = arith.addf %107, %111 : vector<64x8xf32>
    %cst_37 = arith.constant 0.797884583 : f32
    %113 = vector.broadcast %cst_37 : f32 to vector<64x8xf32>
    %114 = arith.mulf %113, %112 : vector<64x8xf32>
    %115 = math.tanh %114 : vector<64x8xf32>
    %cst_38 = arith.constant 1.000000e+00 : f32
    %116 = vector.broadcast %cst_38 : f32 to vector<64x8xf32>
    %117 = arith.addf %116, %115 : vector<64x8xf32>
    %cst_39 = arith.constant 5.000000e-01 : f32
    %118 = vector.broadcast %cst_39 : f32 to vector<64x8xf32>
    %119 = arith.mulf %118, %117 : vector<64x8xf32>
    %120 = arith.mulf %107, %119 : vector<64x8xf32>
    %121 = arith.truncf %120 : vector<64x8xf32> to vector<64x8xbf16>
    %122 = vector.extract_strided_slice %10 {offsets = [0, 24], sizes = [64, 8], strides = [1, 1]} : vector<64x32xf32> to vector<64x8xf32>
    %cst_40 = arith.constant dense<0.000000e+00> : vector<64xf32>
    %123 = vector.multi_reduction <add>, %122, %cst_40 [1] : vector<64x8xf32> to vector<64xf32>
    %124 = vector.shape_cast %123 : vector<64xf32> to vector<64x1xf32>
    %cst_41 = arith.constant 8.000000e+00 : f32
    %125 = vector.broadcast %cst_41 : f32 to vector<64x1xf32>
    %126 = arith.divf %124, %125 : vector<64x1xf32>
    %127 = vector.broadcast %126 : vector<64x1xf32> to vector<64x8xf32>
    %128 = arith.subf %122, %127 : vector<64x8xf32>
    %129 = arith.mulf %128, %128 : vector<64x8xf32>
    %cst_42 = arith.constant dense<0.000000e+00> : vector<64xf32>
    %130 = vector.multi_reduction <add>, %129, %cst_42 [1] : vector<64x8xf32> to vector<64xf32>
    %131 = vector.shape_cast %130 : vector<64xf32> to vector<64x1xf32>
    %cst_43 = arith.constant 8.000000e+00 : f32
    %132 = vector.broadcast %cst_43 : f32 to vector<64x1xf32>
    %133 = arith.divf %131, %132 : vector<64x1xf32>
    %134 = vector.broadcast %126 : vector<64x1xf32> to vector<64x8xf32>
    %135 = arith.subf %122, %134 : vector<64x8xf32>
    %cst_44 = arith.constant 9.99999997E-7 : f32
    %136 = vector.broadcast %cst_44 : f32 to vector<64x1xf32>
    %137 = arith.addf %133, %136 : vector<64x1xf32>
    %138 = math.rsqrt %137 : vector<64x1xf32>
    %139 = vector.broadcast %138 : vector<64x1xf32> to vector<64x8xf32>
    %140 = arith.mulf %135, %139 : vector<64x8xf32>
    %141 = vector.broadcast %4 : vector<1x8xf32> to vector<64x8xf32>
    %142 = arith.mulf %140, %141 : vector<64x8xf32>
    %143 = vector.broadcast %5 : vector<1x8xf32> to vector<64x8xf32>
    %144 = arith.addf %142, %143 : vector<64x8xf32>
    %145 = arith.mulf %144, %144 : vector<64x8xf32>
    %146 = arith.mulf %144, %145 : vector<64x8xf32>
    %cst_45 = arith.constant 4.471500e-02 : f32
    %147 = vector.broadcast %cst_45 : f32 to vector<64x8xf32>
    %148 = arith.mulf %147, %146 : vector<64x8xf32>
    %149 = arith.addf %144, %148 : vector<64x8xf32>
    %cst_46 = arith.constant 0.797884583 : f32
    %150 = vector.broadcast %cst_46 : f32 to vector<64x8xf32>
    %151 = arith.mulf %150, %149 : vector<64x8xf32>
    %152 = math.tanh %151 : vector<64x8xf32>
    %cst_47 = arith.constant 1.000000e+00 : f32
    %153 = vector.broadcast %cst_47 : f32 to vector<64x8xf32>
    %154 = arith.addf %153, %152 : vector<64x8xf32>
    %cst_48 = arith.constant 5.000000e-01 : f32
    %155 = vector.broadcast %cst_48 : f32 to vector<64x8xf32>
    %156 = arith.mulf %155, %154 : vector<64x8xf32>
    %157 = arith.mulf %144, %156 : vector<64x8xf32>
    %158 = arith.truncf %157 : vector<64x8xf32> to vector<64x8xbf16>
    %159 = tpu.concatenate %47, %84, %121, %158 in 0 : vector<64x8xbf16>, vector<64x8xbf16>, vector<64x8xbf16>, vector<64x8xbf16> -> vector<256x8xbf16>
    %cst_49 = arith.constant dense<0.000000e+00> : vector<256x16xf32>
    %160 = tpu.matmul %159, %6, %cst_49 {dimension_numbers = #tpu.dot_dimension_numbers<[1], [0], [0], [1], [0, 0, 1, 1], [], []>} : vector<256x8xbf16>, vector<8x16xbf16>, vector<256x16xf32> -> vector<256x16xf32>
    %161 = vector.broadcast %7 : vector<1x16xf32> to vector<256x16xf32>
    %162 = arith.addf %160, %161 : vector<256x16xf32>
    %c0_50 = arith.constant 0 : index
    %c0_51 = arith.constant 0 : index
    %163 = vector.load %arg8[%c0_50, %c0_51] : memref<64x64xf32, #tpu.memory_space<vmem>>, vector<64x64xf32>
    %164 = arith.truncf %163 : vector<64x64xf32> to vector<64x64xbf16>
    %c0_52 = arith.constant 0 : index
    %c0_53 = arith.constant 0 : index
    %165 = vector.load %arg9[%c0_52, %c0_53] : memref<64x128xbf16, #tpu.memory_space<vmem>>, vector<64x128xbf16>
    %c0_54 = arith.constant 0 : index
    %c0_55 = arith.constant 0 : index
    %166 = vector.load %arg10[%c0_54, %c0_55] : memref<1x128xf32, #tpu.memory_space<vmem>>, vector<1x128xf32>
    %c0_56 = arith.constant 0 : index
    %c0_57 = arith.constant 0 : index
    %167 = vector.load %arg11[%c0_56, %c0_57] : memref<1x32xf32, #tpu.memory_space<vmem>>, vector<1x32xf32>
    %c0_58 = arith.constant 0 : index
    %c0_59 = arith.constant 0 : index
    %168 = vector.load %arg12[%c0_58, %c0_59] : memref<1x32xf32, #tpu.memory_space<vmem>>, vector<1x32xf32>
    %c0_60 = arith.constant 0 : index
    %c0_61 = arith.constant 0 : index
    %169 = vector.load %arg13[%c0_60, %c0_61] : memref<32x16xbf16, #tpu.memory_space<vmem>>, vector<32x16xbf16>
    %c0_62 = arith.constant 0 : index
    %c0_63 = arith.constant 0 : index
    %170 = vector.load %arg14[%c0_62, %c0_63] : memref<1x16xf32, #tpu.memory_space<vmem>>, vector<1x16xf32>
    %cst_64 = arith.constant dense<0.000000e+00> : vector<64x128xf32>
    %171 = tpu.matmul %164, %165, %cst_64 {dimension_numbers = #tpu.dot_dimension_numbers<[1], [0], [0], [1], [0, 0, 1, 1], [], []>} : vector<64x64xbf16>, vector<64x128xbf16>, vector<64x128xf32> -> vector<64x128xf32>
    %172 = vector.broadcast %166 : vector<1x128xf32> to vector<64x128xf32>
    %173 = arith.addf %171, %172 : vector<64x128xf32>
    %174 = vector.extract_strided_slice %173 {offsets = [0, 0], sizes = [64, 32], strides = [1, 1]} : vector<64x128xf32> to vector<64x32xf32>
    %cst_65 = arith.constant dense<0.000000e+00> : vector<64xf32>
    %175 = vector.multi_reduction <add>, %174, %cst_65 [1] : vector<64x32xf32> to vector<64xf32>
    %176 = vector.shape_cast %175 : vector<64xf32> to vector<64x1xf32>
    %cst_66 = arith.constant 3.200000e+01 : f32
    %177 = vector.broadcast %cst_66 : f32 to vector<64x1xf32>
    %178 = arith.divf %176, %177 : vector<64x1xf32>
    %179 = vector.broadcast %178 : vector<64x1xf32> to vector<64x32xf32>
    %180 = arith.subf %174, %179 : vector<64x32xf32>
    %181 = arith.mulf %180, %180 : vector<64x32xf32>
    %cst_67 = arith.constant dense<0.000000e+00> : vector<64xf32>
    %182 = vector.multi_reduction <add>, %181, %cst_67 [1] : vector<64x32xf32> to vector<64xf32>
    %183 = vector.shape_cast %182 : vector<64xf32> to vector<64x1xf32>
    %cst_68 = arith.constant 3.200000e+01 : f32
    %184 = vector.broadcast %cst_68 : f32 to vector<64x1xf32>
    %185 = arith.divf %183, %184 : vector<64x1xf32>
    %186 = vector.broadcast %178 : vector<64x1xf32> to vector<64x32xf32>
    %187 = arith.subf %174, %186 : vector<64x32xf32>
    %cst_69 = arith.constant 9.99999997E-7 : f32
    %188 = vector.broadcast %cst_69 : f32 to vector<64x1xf32>
    %189 = arith.addf %185, %188 : vector<64x1xf32>
    %190 = math.rsqrt %189 : vector<64x1xf32>
    %191 = vector.broadcast %190 : vector<64x1xf32> to vector<64x32xf32>
    %192 = arith.mulf %187, %191 : vector<64x32xf32>
    %193 = vector.broadcast %167 : vector<1x32xf32> to vector<64x32xf32>
    %194 = arith.mulf %192, %193 : vector<64x32xf32>
    %195 = vector.broadcast %168 : vector<1x32xf32> to vector<64x32xf32>
    %196 = arith.addf %194, %195 : vector<64x32xf32>
    %197 = arith.mulf %196, %196 : vector<64x32xf32>
    %198 = arith.mulf %196, %197 : vector<64x32xf32>
    %cst_70 = arith.constant 4.471500e-02 : f32
    %199 = vector.broadcast %cst_70 : f32 to vector<64x32xf32>
    %200 = arith.mulf %199, %198 : vector<64x32xf32>
    %201 = arith.addf %196, %200 : vector<64x32xf32>
    %cst_71 = arith.constant 0.797884583 : f32
    %202 = vector.broadcast %cst_71 : f32 to vector<64x32xf32>
    %203 = arith.mulf %202, %201 : vector<64x32xf32>
    %204 = math.tanh %203 : vector<64x32xf32>
    %cst_72 = arith.constant 1.000000e+00 : f32
    %205 = vector.broadcast %cst_72 : f32 to vector<64x32xf32>
    %206 = arith.addf %205, %204 : vector<64x32xf32>
    %cst_73 = arith.constant 5.000000e-01 : f32
    %207 = vector.broadcast %cst_73 : f32 to vector<64x32xf32>
    %208 = arith.mulf %207, %206 : vector<64x32xf32>
    %209 = arith.mulf %196, %208 : vector<64x32xf32>
    %210 = arith.truncf %209 : vector<64x32xf32> to vector<64x32xbf16>
    %211 = vector.extract_strided_slice %173 {offsets = [0, 32], sizes = [64, 32], strides = [1, 1]} : vector<64x128xf32> to vector<64x32xf32>
    %cst_74 = arith.constant dense<0.000000e+00> : vector<64xf32>
    %212 = vector.multi_reduction <add>, %211, %cst_74 [1] : vector<64x32xf32> to vector<64xf32>
    %213 = vector.shape_cast %212 : vector<64xf32> to vector<64x1xf32>
    %cst_75 = arith.constant 3.200000e+01 : f32
    %214 = vector.broadcast %cst_75 : f32 to vector<64x1xf32>
    %215 = arith.divf %213, %214 : vector<64x1xf32>
    %216 = vector.broadcast %215 : vector<64x1xf32> to vector<64x32xf32>
    %217 = arith.subf %211, %216 : vector<64x32xf32>
    %218 = arith.mulf %217, %217 : vector<64x32xf32>
    %cst_76 = arith.constant dense<0.000000e+00> : vector<64xf32>
    %219 = vector.multi_reduction <add>, %218, %cst_76 [1] : vector<64x32xf32> to vector<64xf32>
    %220 = vector.shape_cast %219 : vector<64xf32> to vector<64x1xf32>
    %cst_77 = arith.constant 3.200000e+01 : f32
    %221 = vector.broadcast %cst_77 : f32 to vector<64x1xf32>
    %222 = arith.divf %220, %221 : vector<64x1xf32>
    %223 = vector.broadcast %215 : vector<64x1xf32> to vector<64x32xf32>
    %224 = arith.subf %211, %223 : vector<64x32xf32>
    %cst_78 = arith.constant 9.99999997E-7 : f32
    %225 = vector.broadcast %cst_78 : f32 to vector<64x1xf32>
    %226 = arith.addf %222, %225 : vector<64x1xf32>
    %227 = math.rsqrt %226 : vector<64x1xf32>
    %228 = vector.broadcast %227 : vector<64x1xf32> to vector<64x32xf32>
    %229 = arith.mulf %224, %228 : vector<64x32xf32>
    %230 = vector.broadcast %167 : vector<1x32xf32> to vector<64x32xf32>
    %231 = arith.mulf %229, %230 : vector<64x32xf32>
    %232 = vector.broadcast %168 : vector<1x32xf32> to vector<64x32xf32>
    %233 = arith.addf %231, %232 : vector<64x32xf32>
    %234 = arith.mulf %233, %233 : vector<64x32xf32>
    %235 = arith.mulf %233, %234 : vector<64x32xf32>
    %cst_79 = arith.constant 4.471500e-02 : f32
    %236 = vector.broadcast %cst_79 : f32 to vector<64x32xf32>
    %237 = arith.mulf %236, %235 : vector<64x32xf32>
    %238 = arith.addf %233, %237 : vector<64x32xf32>
    %cst_80 = arith.constant 0.797884583 : f32
    %239 = vector.broadcast %cst_80 : f32 to vector<64x32xf32>
    %240 = arith.mulf %239, %238 : vector<64x32xf32>
    %241 = math.tanh %240 : vector<64x32xf32>
    %cst_81 = arith.constant 1.000000e+00 : f32
    %242 = vector.broadcast %cst_81 : f32 to vector<64x32xf32>
    %243 = arith.addf %242, %241 : vector<64x32xf32>
    %cst_82 = arith.constant 5.000000e-01 : f32
    %244 = vector.broadcast %cst_82 : f32 to vector<64x32xf32>
    %245 = arith.mulf %244, %243 : vector<64x32xf32>
    %246 = arith.mulf %233, %245 : vector<64x32xf32>
    %247 = arith.truncf %246 : vector<64x32xf32> to vector<64x32xbf16>
    %248 = vector.extract_strided_slice %173 {offsets = [0, 64], sizes = [64, 32], strides = [1, 1]} : vector<64x128xf32> to vector<64x32xf32>
    %cst_83 = arith.constant dense<0.000000e+00> : vector<64xf32>
    %249 = vector.multi_reduction <add>, %248, %cst_83 [1] : vector<64x32xf32> to vector<64xf32>
    %250 = vector.shape_cast %249 : vector<64xf32> to vector<64x1xf32>
    %cst_84 = arith.constant 3.200000e+01 : f32
    %251 = vector.broadcast %cst_84 : f32 to vector<64x1xf32>
    %252 = arith.divf %250, %251 : vector<64x1xf32>
    %253 = vector.broadcast %252 : vector<64x1xf32> to vector<64x32xf32>
    %254 = arith.subf %248, %253 : vector<64x32xf32>
    %255 = arith.mulf %254, %254 : vector<64x32xf32>
    %cst_85 = arith.constant dense<0.000000e+00> : vector<64xf32>
    %256 = vector.multi_reduction <add>, %255, %cst_85 [1] : vector<64x32xf32> to vector<64xf32>
    %257 = vector.shape_cast %256 : vector<64xf32> to vector<64x1xf32>
    %cst_86 = arith.constant 3.200000e+01 : f32
    %258 = vector.broadcast %cst_86 : f32 to vector<64x1xf32>
    %259 = arith.divf %257, %258 : vector<64x1xf32>
    %260 = vector.broadcast %252 : vector<64x1xf32> to vector<64x32xf32>
    %261 = arith.subf %248, %260 : vector<64x32xf32>
    %cst_87 = arith.constant 9.99999997E-7 : f32
    %262 = vector.broadcast %cst_87 : f32 to vector<64x1xf32>
    %263 = arith.addf %259, %262 : vector<64x1xf32>
    %264 = math.rsqrt %263 : vector<64x1xf32>
    %265 = vector.broadcast %264 : vector<64x1xf32> to vector<64x32xf32>
    %266 = arith.mulf %261, %265 : vector<64x32xf32>
    %267 = vector.broadcast %167 : vector<1x32xf32> to vector<64x32xf32>
    %268 = arith.mulf %266, %267 : vector<64x32xf32>
    %269 = vector.broadcast %168 : vector<1x32xf32> to vector<64x32xf32>
    %270 = arith.addf %268, %269 : vector<64x32xf32>
    %271 = arith.mulf %270, %270 : vector<64x32xf32>
    %272 = arith.mulf %270, %271 : vector<64x32xf32>
    %cst_88 = arith.constant 4.471500e-02 : f32
    %273 = vector.broadcast %cst_88 : f32 to vector<64x32xf32>
    %274 = arith.mulf %273, %272 : vector<64x32xf32>
    %275 = arith.addf %270, %274 : vector<64x32xf32>
    %cst_89 = arith.constant 0.797884583 : f32
    %276 = vector.broadcast %cst_89 : f32 to vector<64x32xf32>
    %277 = arith.mulf %276, %275 : vector<64x32xf32>
    %278 = math.tanh %277 : vector<64x32xf32>
    %cst_90 = arith.constant 1.000000e+00 : f32
    %279 = vector.broadcast %cst_90 : f32 to vector<64x32xf32>
    %280 = arith.addf %279, %278 : vector<64x32xf32>
    %cst_91 = arith.constant 5.000000e-01 : f32
    %281 = vector.broadcast %cst_91 : f32 to vector<64x32xf32>
    %282 = arith.mulf %281, %280 : vector<64x32xf32>
    %283 = arith.mulf %270, %282 : vector<64x32xf32>
    %284 = arith.truncf %283 : vector<64x32xf32> to vector<64x32xbf16>
    %285 = vector.extract_strided_slice %173 {offsets = [0, 96], sizes = [64, 32], strides = [1, 1]} : vector<64x128xf32> to vector<64x32xf32>
    %cst_92 = arith.constant dense<0.000000e+00> : vector<64xf32>
    %286 = vector.multi_reduction <add>, %285, %cst_92 [1] : vector<64x32xf32> to vector<64xf32>
    %287 = vector.shape_cast %286 : vector<64xf32> to vector<64x1xf32>
    %cst_93 = arith.constant 3.200000e+01 : f32
    %288 = vector.broadcast %cst_93 : f32 to vector<64x1xf32>
    %289 = arith.divf %287, %288 : vector<64x1xf32>
    %290 = vector.broadcast %289 : vector<64x1xf32> to vector<64x32xf32>
    %291 = arith.subf %285, %290 : vector<64x32xf32>
    %292 = arith.mulf %291, %291 : vector<64x32xf32>
    %cst_94 = arith.constant dense<0.000000e+00> : vector<64xf32>
    %293 = vector.multi_reduction <add>, %292, %cst_94 [1] : vector<64x32xf32> to vector<64xf32>
    %294 = vector.shape_cast %293 : vector<64xf32> to vector<64x1xf32>
    %cst_95 = arith.constant 3.200000e+01 : f32
    %295 = vector.broadcast %cst_95 : f32 to vector<64x1xf32>
    %296 = arith.divf %294, %295 : vector<64x1xf32>
    %297 = vector.broadcast %289 : vector<64x1xf32> to vector<64x32xf32>
    %298 = arith.subf %285, %297 : vector<64x32xf32>
    %cst_96 = arith.constant 9.99999997E-7 : f32
    %299 = vector.broadcast %cst_96 : f32 to vector<64x1xf32>
    %300 = arith.addf %296, %299 : vector<64x1xf32>
    %301 = math.rsqrt %300 : vector<64x1xf32>
    %302 = vector.broadcast %301 : vector<64x1xf32> to vector<64x32xf32>
    %303 = arith.mulf %298, %302 : vector<64x32xf32>
    %304 = vector.broadcast %167 : vector<1x32xf32> to vector<64x32xf32>
    %305 = arith.mulf %303, %304 : vector<64x32xf32>
    %306 = vector.broadcast %168 : vector<1x32xf32> to vector<64x32xf32>
    %307 = arith.addf %305, %306 : vector<64x32xf32>
    %308 = arith.mulf %307, %307 : vector<64x32xf32>
    %309 = arith.mulf %307, %308 : vector<64x32xf32>
    %cst_97 = arith.constant 4.471500e-02 : f32
    %310 = vector.broadcast %cst_97 : f32 to vector<64x32xf32>
    %311 = arith.mulf %310, %309 : vector<64x32xf32>
    %312 = arith.addf %307, %311 : vector<64x32xf32>
    %cst_98 = arith.constant 0.797884583 : f32
    %313 = vector.broadcast %cst_98 : f32 to vector<64x32xf32>
    %314 = arith.mulf %313, %312 : vector<64x32xf32>
    %315 = math.tanh %314 : vector<64x32xf32>
    %cst_99 = arith.constant 1.000000e+00 : f32
    %316 = vector.broadcast %cst_99 : f32 to vector<64x32xf32>
    %317 = arith.addf %316, %315 : vector<64x32xf32>
    %cst_100 = arith.constant 5.000000e-01 : f32
    %318 = vector.broadcast %cst_100 : f32 to vector<64x32xf32>
    %319 = arith.mulf %318, %317 : vector<64x32xf32>
    %320 = arith.mulf %307, %319 : vector<64x32xf32>
    %321 = arith.truncf %320 : vector<64x32xf32> to vector<64x32xbf16>
    %322 = tpu.concatenate %210, %247, %284, %321 in 0 : vector<64x32xbf16>, vector<64x32xbf16>, vector<64x32xbf16>, vector<64x32xbf16> -> vector<256x32xbf16>
    %cst_101 = arith.constant dense<0.000000e+00> : vector<256x16xf32>
    %323 = tpu.matmul %322, %169, %cst_101 {dimension_numbers = #tpu.dot_dimension_numbers<[1], [0], [0], [1], [0, 0, 1, 1], [], []>} : vector<256x32xbf16>, vector<32x16xbf16>, vector<256x16xf32> -> vector<256x16xf32>
    %324 = vector.broadcast %170 : vector<1x16xf32> to vector<256x16xf32>
    %325 = arith.addf %323, %324 : vector<256x16xf32>
    %326 = arith.addf %162, %325 : vector<256x16xf32>
    %327 = vector.shape_cast %326 : vector<256x16xf32> to vector<4x64x16xf32>
    %328 = arith.truncf %327 : vector<4x64x16xf32> to vector<4x64x16xbf16>
    %c0_102 = arith.constant 0 : index
    %c0_103 = arith.constant 0 : index
    %c0_104 = arith.constant 0 : index
    %329 = vector.load %arg15[%c0_102, %c0_103, %c0_104] : memref<4x64x16xbf16, #tpu.memory_space<vmem>>, vector<4x64x16xbf16>
    tpu.vector_store %arg15[%c0_102, %c0_103, %c0_104], %328 {strides = array<i32>} : memref<4x64x16xbf16, #tpu.memory_space<vmem>>, vector<4x64x16xbf16>,
    return
  }
  func.func @transform_0(%arg0: i32) -> (i32, i32) {
    %c0_i32 = arith.constant 0 : i32
    %c0_i32_0 = arith.constant 0 : i32
    return %arg0, %c0_i32 : i32, i32
  }
  func.func @transform_1(%arg0: i32) -> (i32, i32) {
    %c0_i32 = arith.constant 0 : i32
    %c0_i32_0 = arith.constant 0 : i32
    %c0_i32_1 = arith.constant 0 : i32
    return %c0_i32, %c0_i32_0 : i32, i32
  }
  func.func @transform_2(%arg0: i32) -> (i32, i32) {
    %c0_i32 = arith.constant 0 : i32
    %c0_i32_0 = arith.constant 0 : i32
    %c0_i32_1 = arith.constant 0 : i32
    return %c0_i32, %c0_i32_0 : i32, i32
  }
  func.func @transform_3(%arg0: i32) -> (i32, i32) {
    %c0_i32 = arith.constant 0 : i32
    %c0_i32_0 = arith.constant 0 : i32
    %c0_i32_1 = arith.constant 0 : i32
    return %c0_i32, %c0_i32_0 : i32, i32
  }
  func.func @transform_4(%arg0: i32) -> (i32, i32) {
    %c0_i32 = arith.constant 0 : i32
    %c0_i32_0 = arith.constant 0 : i32
    %c0_i32_1 = arith.constant 0 : i32
    return %c0_i32, %c0_i32_0 : i32, i32
  }
  func.func @transform_5(%arg0: i32) -> (i32, i32) {
    %c0_i32 = arith.constant 0 : i32
    %c0_i32_0 = arith.constant 0 : i32
    %c0_i32_1 = arith.constant 0 : i32
    return %c0_i32, %c0_i32_0 : i32, i32
  }
  func.func @transform_6(%arg0: i32) -> (i32, i32) {
    %c0_i32 = arith.constant 0 : i32
    %c0_i32_0 = arith.constant 0 : i32
    %c0_i32_1 = arith.constant 0 : i32
    return %c0_i32, %c0_i32_0 : i32, i32
  }
  func.func @transform_7(%arg0: i32) -> (i32, i32) {
    %c0_i32 = arith.constant 0 : i32
    %c0_i32_0 = arith.constant 0 : i32
    return %arg0, %c0_i32 : i32, i32
  }
  func.func @transform_8(%arg0: i32) -> (i32, i32) {
    %c0_i32 = arith.constant 0 : i32
    %c0_i32_0 = arith.constant 0 : i32
    %c0_i32_1 = arith.constant 0 : i32
    return %c0_i32, %c0_i32_0 : i32, i32
  }
  func.func @transform_9(%arg0: i32) -> (i32, i32) {
    %c0_i32 = arith.constant 0 : i32
    %c0_i32_0 = arith.constant 0 : i32
    %c0_i32_1 = arith.constant 0 : i32
    return %c0_i32, %c0_i32_0 : i32, i32
  }
  func.func @transform_10(%arg0: i32) -> (i32, i32) {
    %c0_i32 = arith.constant 0 : i32
    %c0_i32_0 = arith.constant 0 : i32
    %c0_i32_1 = arith.constant 0 : i32
    return %c0_i32, %c0_i32_0 : i32, i32
  }
  func.func @transform_11(%arg0: i32) -> (i32, i32) {
    %c0_i32 = arith.constant 0 : i32
    %c0_i32_0 = arith.constant 0 : i32
    %c0_i32_1 = arith.constant 0 : i32
    return %c0_i32, %c0_i32_0 : i32, i32
  }
  func.func @transform_12(%arg0: i32) -> (i32, i32) {
    %c0_i32 = arith.constant 0 : i32
    %c0_i32_0 = arith.constant 0 : i32
    %c0_i32_1 = arith.constant 0 : i32
    return %c0_i32, %c0_i32_0 : i32, i32
  }
  func.func @transform_13(%arg0: i32) -> (i32, i32) {
    %c0_i32 = arith.constant 0 : i32
    %c0_i32_0 = arith.constant 0 : i32
    %c0_i32_1 = arith.constant 0 : i32
    return %c0_i32, %c0_i32_0 : i32, i32
  }
  func.func @transform_14(%arg0: i32) -> (i32, i32, i32) {
    %c0_i32 = arith.constant 0 : i32
    %c0_i32_0 = arith.constant 0 : i32
    %c0_i32_1 = arith.constant 0 : i32
    return %c0_i32, %arg0, %c0_i32_0 : i32, i32, i32
  }
}

</mosaic_0001>

<bundles_post_ra>
// kernel: tpu_custom_call.1
= control target key start
LH: loop header
LB: loop body
LE: loop exit
PB: predicated region body
PF: predicated region fallthrough
CT: control target
= control target key end

     0   :  { %vm87_vm0 = vcmask 261120   ;;  %s3546_s30 = smov 8   ;;  %s3547_s23 = smov 112   ;;  %vm165_vm1 = vcmask 64512   ;;  %vm1247_vm2 = vcmask 1043456   ;;  %vm1470_vm3 = vcmask 523264   ;;  %s5492_s1 = inlined_call_operand.vmem [shape: bf16[32,32], index: 1, kind: input, shape index: {}]   ;;  %s5493_s0 = inlined_call_operand.vmem [shape: f32[64,32], index: 0, kind: input, shape index: {}]   ;;  %s5494_s3 = inlined_call_operand.vmem [shape: f32[1,8], index: 3, kind: input, shape index: {}]   ;;  %s5495_s4 = inlined_call_operand.vmem [shape: f32[1,8], index: 4, kind: input, shape index: {}]   ;;  %s5496_s2 = inlined_call_operand.vmem [shape: f32[1,32], index: 2, kind: input, shape index: {}]   ;;  %s5497_s5 = inlined_call_operand.vmem [shape: bf16[8,16], index: 5, kind: input, shape index: {}]   ;;  %s5498_s8 = inlined_call_operand.vmem [shape: bf16[64,128], index: 8, kind: input, shape index: {}]   ;;  %s5499_s7 = inlined_call_operand.vmem [shape: f32[64,64], index: 7, kind: input, shape index: {}]   ;;  %s5500_s11 = inlined_call_operand.vmem [shape: f32[1,32], index: 11, kind: input, shape index: {}]   ;;  %s5501_s10 = inlined_call_operand.vmem [shape: f32[1,32], index: 10, kind: input, shape index: {}]   ;;  %s5502_s9 = inlined_call_operand.vmem [shape: f32[1,128], index: 9, kind: input, shape index: {}]   ;;  %s5503_s12 = inlined_call_operand.vmem [shape: bf16[32,16], index: 12, kind: input, shape index: {}]   ;;  %s5504_s6 = inlined_call_operand.vmem [shape: f32[1,16], index: 6, kind: input, shape index: {}]   ;;  %s5505_s13 = inlined_call_operand.vmem [shape: f32[1,16], index: 13, kind: input, shape index: {}]   ;;  %s5506_s14 = inlined_call_operand.vmem [shape: bf16[4,64,16], index: 14, kind: output, shape index: {}]  }
   0x1   :  { %v3276_v0 = vld [vmem:[%s5492_s1 + $0x8] sm:$0xff]   ;;  %v3277_v1 = vld [vmem:[%s5492_s1] sm:$0xff]   ;;  %v50_v5 = vld [vmem:[%s5493_s0 + $0x10] sm:$0xff]  ;;  %s3548_s24 = smov 120   ;;  %s3551_s25 = smov 24   ;;  %vm2962_vm4 = vcmask 125952  }
   0x2   :  { %3168 = vmatprep.subr.bf16.mxu0 %v3276_v0  ;;  %v48_v2 = vld [vmem:[%s5493_s0] sm:$0xff]  ;;  %v49_v3 = vld [vmem:[%s5493_s0 + $0x8] sm:$0xff]  ;;  %v51_v6 = vld [vmem:[%s5493_s0 + $0x18] sm:$0xff]  ;;  %s3552_s15 = smov 32   ;;  %s3553_s19 = smov 96  }
   0x3   :  { %3169 = vmatpush3.bf16.msra.mxu0 %v3276_v0  ;;  %v56_v4 = vpack.c.bf16 %v49_v3, %v48_v2  ;;  %v52_v7 = vld [vmem:[%s5493_s0 + $0x20] sm:$0xff]  ;;  %v53_v8 = vld [vmem:[%s5493_s0 + $0x28] sm:$0xff]  ;;  %v57_v10 = vpack.c.bf16 %v51_v6, %v50_v5  ;;  %v54_v13 = vld [vmem:[%s5493_s0 + $0x30] sm:$0xff] }
   0x4   :  { %3170 = vmatprep.subr.bf16.mxu0 %v3277_v1  ;;  %v3657_v9 = vld [vmem:[%s5494_s3] ss:$0 sm:$0xff]  ;;  %v58_v12 = vpack.c.bf16 %v53_v8, %v52_v7  ;;  %v55_v14 = vld [vmem:[%s5493_s0 + $0x38] sm:$0xff]  ;;  %s3549_s0 = smov 104  }
   0x5   :  { %3172 = vmatprep.mubr.msk.bf16.mxu0 %vm87_vm0, %v56_v4  ;;  %543 = vrot.lane.b32.xlu1 %v3657_v9, %s3546_s30  ;;  %v3664_v11 = vld [vmem:[%s5495_s4] ss:$0 sm:$0xff]  ;;  %v59_v15 = vpack.c.bf16 %v55_v14, %v54_v13 }
   0x6   :  { %v2999_v16 = vld [vmem:[%s5496_s2] ss:$0 sm:$0xff] }
   0x7   :  { %3171 = vmatpush3.bf16.msra.mxu0 %v3277_v1 }
   0x9   :  { %554 = vrot.lane.b32.xlu1 %v3664_v11, %s3546_s30 }
   0xa   :  { %3173 = vmatmul.mubr.msk.bf16.vlgmr.msra.gmra.mxu0 %vm87_vm0, %v57_v10 }
   0xb   :  { %3176 = vmatprep.mubr.msk.bf16.mxu0 %vm87_vm0, %v58_v12 }
  0x12   :  { %3177 = vmatmul.mubr.msk.bf16.gmra.mxu0 %vm87_vm0, %v59_v15 }
  0x77   :  { %v3755_v39 = vpop.permute.xlu1 %543 }
  0x7b   :  { %v3757_v40 = vpop.permute.xlu1 %554 }
  0xca   :  { %v3174_v17 = vpop.f32.mrf.mxu0 }
  0xcb   :  { %v3679_v18 = vadd.f32 %v3174_v17, %v2999_v16 }
  0xcc   :  { %v134_v19 = vpop.f32.mrf.mxu0 }
  0xcd   :  { %645 = vrot.lane.b32.xlu0 %v3679_v18, %s3547_s23  ;;  %387 = vrot.lane.b32.xlu1 %v3679_v18, %s3548_s24  ;;  %v172_v22 = vsel %vm165_vm1, %v3679_v18, 0.0  ;;  %v3699_v24 = vadd.f32 %v2999_v16, %v134_v19 }
  0xce   :  { %v3175_v20 = vpop.f32.mrf.mxu0 }
  0xcf   :  { %v3685_v21 = vadd.f32 %v3175_v20, %v2999_v16  ;;  %v166_v27 = vsel %vm165_vm1, %v3699_v24, 0.0 }
  0xd0   :  { %v137_v25 = vpop.f32.mrf.mxu0 }
  0xd1   :  { %903 = vrot.lane.b32.xlu0 %v3679_v18, %s3549_s0  ;;  %389 = vrot.lane.b32.xlu1 %v3685_v21, %s3548_s24  ;;  %v175_v23 = vsel %vm165_vm1, %v3685_v21, 0.0  ;;  %v3705_v26 = vadd.f32 %v2999_v16, %v137_v25 }
  0xd2   :  { %v3178_v29 = vpop.f32.mrf.mxu0 }
  0xd3   :  { %v169_v28 = vsel %vm165_vm1, %v3705_v26, 0.0  ;;  %v3717_v32 = vadd.f32 %v3178_v29, %v2999_v16 }
  0xd4   :  { %v150_v30 = vpop.f32.mrf.mxu0 }
  0xd5   :  { %647 = vrot.lane.b32.xlu1 %v3685_v21, %s3547_s23  ;;  %v184_v34 = vsel %vm165_vm1, %v3717_v32, 0.0  ;;  %v3739_v37 = vadd.f32 %v2999_v16, %v150_v30 }
  0xd6   :  { %v3179_v31 = vpop.f32.mrf.mxu0 }
  0xd7   :  { %v3719_v33 = vadd.f32 %v3179_v31, %v2999_v16  ;;  %v178_v48 = vsel %vm165_vm1, %v3739_v37, 0.0 }
  0xd8   :  { %v153_v36 = vpop.f32.mrf.mxu0 }
  0xd9   :  { %905 = vrot.lane.b32.xlu1 %v3685_v21, %s3549_s0  ;;  %v187_v35 = vsel %vm165_vm1, %v3719_v33, 0.0  ;;  %v3741_v38 = vadd.f32 %v2999_v16, %v153_v36 }
  0xdb   :  { %v181_v53 = vsel %vm165_vm1, %v3741_v38, 0.0 }
  0xf0   :  { %173 = vadd.xlane.f32.xlu0 %v172_v22 }
  0xfd   :  { %176 = vadd.xlane.f32.xlu1 %v175_v23 }
 0x106   :  { %383 = vrot.lane.b32.xlu0 %v3699_v24, %s3548_s24 }
 0x10a   :  { %641 = vrot.lane.b32.xlu0 %v3699_v24, %s3547_s23 }
 0x10e   :  { %643 = vrot.lane.b32.xlu1 %v3705_v26, %s3547_s23  ;;  %899 = vrot.lane.b32.xlu0 %v3699_v24, %s3549_s0 }
 0x112   :  { %901 = vrot.lane.b32.xlu1 %v3705_v26, %s3549_s0 }
 0x12d   :  { %167 = vadd.xlane.f32.xlu0 %v166_v27 }
 0x136   :  { %170 = vadd.xlane.f32.xlu1 %v169_v28 }
 0x13f   :  { %v646_v41 = vpop.permute.xlu0 %645  ;;  %v388_v42 = vpop.permute.xlu1 %387 }
 0x140   :  { %v413_v51 = vsel %vm165_vm1, %v388_v42, 0.0  ;;  %v671_v56 = vsel %vm165_vm1, %v646_v41, 0.0 }
 0x143   :  { %385 = vrot.lane.b32.xlu0 %v3705_v26, %s3548_s24  ;;  %v904_v43 = vpop.permute.xlu0 %903  ;;  %v390_v44 = vpop.permute.xlu1 %389 }
 0x144   :  { %v416_v59 = vsel %vm165_vm1, %v390_v44, 0.0  ;;  %v929_v60 = vsel %vm165_vm1, %v904_v43, 0.0 }
 0x147   :  { %397 = vrot.lane.b32.xlu1 %v3719_v33, %s3548_s24  ;;  %395 = vrot.lane.b32.xlu0 %v3717_v32, %s3548_s24  ;;  %v648_v46 = vpop.permute.xlu1 %647 }
 0x148   :  { %v674_v62 = vsel %vm165_vm1, %v648_v46, 0.0 }
 0x14b   :  { %655 = vrot.lane.b32.xlu1 %v3719_v33, %s3547_s23  ;;  %653 = vrot.lane.b32.xlu0 %v3717_v32, %s3547_s23  ;;  %v906_v49 = vpop.permute.xlu1 %905 }
 0x14c   :  { %v932_v1 = vsel %vm165_vm1, %v906_v49, 0.0 }
 0x14f   :  { %913 = vrot.lane.b32.xlu1 %v3719_v33, %s3549_s0  ;;  %911 = vrot.lane.b32.xlu0 %v3717_v32, %s3549_s0 }
 0x16e   :  { %185 = vadd.xlane.f32.xlu0 %v184_v34 }
 0x173   :  { %188 = vadd.xlane.f32.xlu1 %v187_v35 }
 0x179   :  { %v3759_v45 = vpop.xlane.xlu0 %173 }
 0x17a   :  { %v193_v34 = vmul.f32 0.125, %v3759_v45 }
 0x17c   :  { %v3795_v43 = vsub.f32 %v3679_v18, %v193_v34 }
 0x17d   :  { %v384_v47 = vpop.permute.xlu0 %383 }
 0x17e   :  { %v407_v55 = vsel %vm165_vm1, %v384_v47, 0.0 }
 0x181   :  { %v642_v50 = vpop.permute.xlu0 %641 }
 0x182   :  { %v665_v0 = vsel %vm165_vm1, %v642_v50, 0.0  ;;  %v209_v50 = vmul.f32 %v3795_v43, %v3795_v43 }
 0x184   :  { %393 = vrot.lane.b32.xlu1 %v3741_v38, %s3548_s24  ;;  %391 = vrot.lane.b32.xlu0 %v3739_v37, %s3548_s24 }
 0x185   :  { %v900_v54 = vpop.permute.xlu0 %899 }
 0x186   :  { %v3764_v52 = vpop.xlane.xlu1 %176  ;;  %v923_v3 = vsel %vm165_vm1, %v900_v54, 0.0  ;;  %v221_v54 = vsel %vm165_vm1, %v209_v50, 0.0 }
 0x188   :  { %651 = vrot.lane.b32.xlu1 %v3741_v38, %s3547_s23  ;;  %649 = vrot.lane.b32.xlu0 %v3739_v37, %s3547_s23 }
 0x18a   :  { %v644_v57 = vpop.permute.xlu1 %643 }
 0x18b   :  { %v668_v5 = vsel %vm165_vm1, %v644_v57, 0.0 }
 0x18c   :  { %909 = vrot.lane.b32.xlu1 %v3741_v38, %s3549_s0  ;;  %907 = vrot.lane.b32.xlu0 %v3739_v37, %s3549_s0 }
 0x18e   :  { %v902_v63 = vpop.permute.xlu1 %901 }
 0x18f   :  { %v926_v10 = vsel %vm165_vm1, %v902_v63, 0.0 }
 0x1ab   :  { %179 = vadd.xlane.f32.xlu0 %v178_v48  ;;  %v194_v48 = vmul.f32 0.125, %v3764_v52 }
 0x1af   :  { %414 = vadd.xlane.f32.xlu0 %v413_v51  ;;  %v3806_v51 = vsub.f32 %v3685_v21, %v194_v48 }
 0x1b0   :  { %182 = vadd.xlane.f32.xlu1 %v181_v53 }
 0x1b1   :  { %v210_v57 = vmul.f32 %v3806_v51, %v3806_v51 }
 0x1b3   :  { %408 = vadd.xlane.f32.xlu0 %v407_v55 }
 0x1b4   :  { %672 = vadd.xlane.f32.xlu1 %v671_v56 }
 0x1b6   :  { %v168_v58 = vpop.xlane.xlu0 %167 }
 0x1b7   :  { %417 = vadd.xlane.f32.xlu0 %v416_v59  ;;  %v191_v44 = vmul.f32 0.125, %v168_v58  ;;  %v224_v58 = vsel %vm165_vm1, %v210_v57, 0.0 }
 0x1b8   :  { %930 = vadd.xlane.f32.xlu1 %v929_v60 }
 0x1b9   :  { %v3800_v45 = vsub.f32 %v3699_v24, %v191_v44 }
 0x1ba   :  { %v386_v61 = vpop.permute.xlu0 %385 }
 0x1bb   :  { %675 = vadd.xlane.f32.xlu0 %v674_v62  ;;  %v410_v7 = vsel %vm165_vm1, %v386_v61, 0.0  ;;  %v207_v55 = vmul.f32 %v3800_v45, %v3800_v45 }
 0x1bc   :  { %666 = vadd.xlane.f32.xlu1 %v665_v0 }
 0x1bd   :  { %v215_v56 = vsel %vm165_vm1, %v207_v55, 0.0 }
 0x1be   :  { %v396_v4 = vpop.permute.xlu0 %395 }
 0x1bf   :  { %v171_v2 = vpop.xlane.xlu1 %170  ;;  %933 = vadd.xlane.f32.xlu0 %v932_v1  ;;  %v425_v12 = vsel %vm165_vm1, %v396_v4, 0.0 }
 0x1c0   :  { %924 = vadd.xlane.f32.xlu1 %v923_v3  ;;  %v192_v53 = vmul.f32 0.125, %v171_v2 }
 0x1c2   :  { %v654_v8 = vpop.permute.xlu0 %653  ;;  %v3812_v52 = vsub.f32 %v3705_v26, %v192_v53 }
 0x1c3   :  { %v398_v6 = vpop.permute.xlu1 %397  ;;  %669 = vadd.xlane.f32.xlu0 %v668_v5  ;;  %v683_v15 = vsel %vm165_vm1, %v654_v8, 0.0 }
 0x1c4   :  { %411 = vadd.xlane.f32.xlu1 %v410_v7  ;;  %v428_v14 = vsel %vm165_vm1, %v398_v6, 0.0  ;;  %v208_v59 = vmul.f32 %v3812_v52, %v3812_v52 }
 0x1c6   :  { %v912_v16 = vpop.permute.xlu0 %911  ;;  %v218_v60 = vsel %vm165_vm1, %v208_v59, 0.0 }
 0x1c7   :  { %927 = vadd.xlane.f32.xlu0 %v926_v10  ;;  %v656_v13 = vpop.permute.xlu1 %655  ;;  %v941_v20 = vsel %vm165_vm1, %v912_v16, 0.0 }
 0x1c8   :  { %426 = vadd.xlane.f32.xlu1 %v425_v12  ;;  %v686_v17 = vsel %vm165_vm1, %v656_v13, 0.0 }
 0x1cb   :  { %429 = vadd.xlane.f32.xlu0 %v428_v14  ;;  %v914_v19 = vpop.permute.xlu1 %913 }
 0x1cc   :  { %684 = vadd.xlane.f32.xlu1 %v683_v15  ;;  %v944_v22 = vsel %vm165_vm1, %v914_v19, 0.0 }
 0x1cf   :  { %687 = vadd.xlane.f32.xlu0 %v686_v17 }
 0x1d0   :  { %942 = vadd.xlane.f32.xlu1 %v941_v20 }
 0x1d3   :  { %945 = vadd.xlane.f32.xlu0 %v944_v22 }
 0x1f7   :  { %v3785_v23 = vpop.xlane.xlu0 %185 }
 0x1fb   :  { %v392_v25 = vpop.permute.xlu0 %391 }
 0x1fc   :  { %v3787_v27 = vpop.xlane.xlu1 %188  ;;  %v419_v28 = vsel %vm165_vm1, %v392_v25, 0.0 }
 0x1fd   :  { %420 = vadd.xlane.f32.xlu1 %v419_v28 }
 0x1ff   :  { %v650_v29 = vpop.permute.xlu0 %649 }
 0x200   :  { %v394_v30 = vpop.permute.xlu1 %393  ;;  %v677_v31 = vsel %vm165_vm1, %v650_v29, 0.0 }
 0x201   :  { %678 = vadd.xlane.f32.xlu1 %v677_v31  ;;  %v422_v35 = vsel %vm165_vm1, %v394_v30, 0.0 }
 0x202   :  { %423 = vadd.xlane.f32.xlu0 %v422_v35 }
 0x203   :  { %v908_v36 = vpop.permute.xlu0 %907 }
 0x204   :  { %v652_v41 = vpop.permute.xlu1 %651  ;;  %v935_v42 = vsel %vm165_vm1, %v908_v36, 0.0 }
 0x205   :  { %936 = vadd.xlane.f32.xlu1 %v935_v42  ;;  %v680_v46 = vsel %vm165_vm1, %v652_v41, 0.0 }
 0x206   :  { %681 = vadd.xlane.f32.xlu0 %v680_v46 }
 0x208   :  { %v910_v47 = vpop.permute.xlu1 %909 }
 0x209   :  { %v938_v49 = vsel %vm165_vm1, %v910_v47, 0.0 }
 0x20a   :  { %939 = vadd.xlane.f32.xlu0 %v938_v49 }
 0x20e   :  { %222 = vadd.xlane.f32.xlu0 %v221_v54 }
 0x212   :  { %216 = vadd.xlane.f32.xlu0 %v215_v56 }
 0x216   :  { %225 = vadd.xlane.f32.xlu0 %v224_v58 }
 0x21a   :  { %219 = vadd.xlane.f32.xlu0 %v218_v60 }
 0x234   :  { %v3821_v61 = vpop.xlane.xlu0 %179 }
 0x238   :  { %v415_v62 = vpop.xlane.xlu0 %414 }
 0x239   :  { %v433_v63 = vmul.f32 0.125, %v415_v62  ;;  %v3823_v0 = vpop.xlane.xlu1 %182 }
 0x23b   :  { %v3826_v1 = vsub.f32 %v3679_v18, %v433_v63 }
 0x23c   :  { %v409_v2 = vpop.xlane.xlu0 %408 }
 0x23d   :  { %v431_v3 = vmul.f32 0.125, %v409_v2  ;;  %v673_v4 = vpop.xlane.xlu1 %672  ;;  %v449_v5 = vmul.f32 %v3826_v1, %v3826_v1 }
 0x23e   :  { %v691_v6 = vmul.f32 0.125, %v673_v4 }
 0x23f   :  { %v3831_v7 = vsub.f32 %v3699_v24, %v431_v3  ;;  %467 = vrot.lane.b32.xlu1 %v449_v5, %s3548_s24 }
 0x240   :  { %v3835_v8 = vsub.f32 %v3679_v18, %v691_v6  ;;  %v418_v10 = vpop.xlane.xlu0 %417 }
 0x241   :  { %v434_v12 = vmul.f32 0.125, %v418_v10  ;;  %v931_v13 = vpop.xlane.xlu1 %930  ;;  %v447_v14 = vmul.f32 %v3831_v7, %v3831_v7 }
 0x242   :  { %v949_v15 = vmul.f32 0.125, %v931_v13  ;;  %v707_v16 = vmul.f32 %v3835_v8, %v3835_v8 }
 0x243   :  { %v3842_v17 = vsub.f32 %v3685_v21, %v434_v12  ;;  %463 = vrot.lane.b32.xlu1 %v447_v14, %s3548_s24 }
 0x244   :  { %v3846_v19 = vsub.f32 %v3679_v18, %v949_v15  ;;  %725 = vrot.lane.b32.xlu0 %v707_v16, %s3547_s23  ;;  %v676_v20 = vpop.xlane.xlu0 %675  ;;  %v67_v15 = vld [vmem:[%s5497_s5] sm:$0xf]  ;;  %s3550_s5 = smov 16  }
 0x245   :  { %v692_v22 = vmul.f32 0.125, %v676_v20  ;;  %v667_v25 = vpop.xlane.xlu1 %666  ;;  %v450_v28 = vmul.f32 %v3842_v17, %v3842_v17  ;;  %3266 = vmatprep.subr.msk.bf16.mxu1 %vm1247_vm2, %v67_v15 }
 0x246   :  { %v689_v29 = vmul.f32 0.125, %v667_v25  ;;  %v965_v30 = vmul.f32 %v3846_v19, %v3846_v19  ;;  %v1249_v25 = vsel %vm1247_vm2, %v67_v15, 0 }
 0x247   :  { %v3854_v31 = vsub.f32 %v3685_v21, %v692_v22  ;;  %469 = vrot.lane.b32.xlu1 %v450_v28, %s3548_s24  ;;  %3181 = vmatpush3.bf16.msra.mxu1 %v1249_v25 }
 0x248   :  { %v3858_v18 = vsub.f32 %v3699_v24, %v689_v29  ;;  %983 = vrot.lane.b32.xlu0 %v965_v30, %s3549_s0  ;;  %v934_v34 = vpop.xlane.xlu0 %933 }
 0x249   :  { %v950_v35 = vmul.f32 0.125, %v934_v34  ;;  %v925_v36 = vpop.xlane.xlu1 %924  ;;  %v708_v41 = vmul.f32 %v3854_v31, %v3854_v31 }
 0x24a   :  { %v947_v42 = vmul.f32 0.125, %v925_v36  ;;  %v705_v44 = vmul.f32 %v3858_v18, %v3858_v18 }
 0x24b   :  { %v3866_v46 = vsub.f32 %v3685_v21, %v950_v35  ;;  %727 = vrot.lane.b32.xlu1 %v708_v41, %s3547_s23 }
 0x24c   :  { %v3870_v47 = vsub.f32 %v3699_v24, %v947_v42  ;;  %721 = vrot.lane.b32.xlu0 %v705_v44, %s3547_s23  ;;  %v670_v48 = vpop.xlane.xlu0 %669 }
 0x24d   :  { %v690_v49 = vmul.f32 0.125, %v670_v48  ;;  %v412_v50 = vpop.xlane.xlu1 %411  ;;  %v966_v53 = vmul.f32 %v3866_v46, %v3866_v46 }
 0x24e   :  { %v432_v54 = vmul.f32 0.125, %v412_v50  ;;  %v963_v55 = vmul.f32 %v3870_v47, %v3870_v47 }
 0x24f   :  { %v3878_v21 = vsub.f32 %v3705_v26, %v690_v49  ;;  %985 = vrot.lane.b32.xlu1 %v966_v53, %s3549_s0 }
 0x250   :  { %v3882_v24 = vsub.f32 %v3705_v26, %v432_v54  ;;  %979 = vrot.lane.b32.xlu0 %v963_v55, %s3549_s0  ;;  %v928_v56 = vpop.xlane.xlu0 %927 }
 0x251   :  { %v948_v57 = vmul.f32 0.125, %v928_v56  ;;  %v427_v58 = vpop.xlane.xlu1 %426  ;;  %v706_v59 = vmul.f32 %v3878_v21, %v3878_v21 }
 0x252   :  { %v437_v60 = vmul.f32 0.125, %v427_v58  ;;  %v448_v62 = vmul.f32 %v3882_v24, %v3882_v24 }
 0x253   :  { %v3890_v63 = vsub.f32 %v3705_v26, %v948_v57  ;;  %723 = vrot.lane.b32.xlu1 %v706_v59, %s3547_s23 }
 0x254   :  { %v3894_v2 = vsub.f32 %v3717_v32, %v437_v60  ;;  %465 = vrot.lane.b32.xlu0 %v448_v62, %s3548_s24  ;;  %v430_v3 = vpop.xlane.xlu0 %429 }
 0x255   :  { %v438_v4 = vmul.f32 0.125, %v430_v3  ;;  %v685_v5 = vpop.xlane.xlu1 %684  ;;  %v964_v6 = vmul.f32 %v3890_v63, %v3890_v63 }
 0x256   :  { %v695_v10 = vmul.f32 0.125, %v685_v5  ;;  %v453_v12 = vmul.f32 %v3894_v2, %v3894_v2 }
 0x257   :  { %v3902_v26 = vsub.f32 %v3719_v33, %v438_v4  ;;  %981 = vrot.lane.b32.xlu1 %v964_v6, %s3549_s0 }
 0x258   :  { %v3906_v13 = vsub.f32 %v3717_v32, %v695_v10  ;;  %475 = vrot.lane.b32.xlu0 %v453_v12, %s3548_s24  ;;  %v688_v14 = vpop.xlane.xlu0 %687 }
 0x259   :  { %v696_v16 = vmul.f32 0.125, %v688_v14  ;;  %v943_v20 = vpop.xlane.xlu1 %942  ;;  %v454_v22 = vmul.f32 %v3902_v26, %v3902_v26 }
 0x25a   :  { %v953_v28 = vmul.f32 0.125, %v943_v20  ;;  %v711_v29 = vmul.f32 %v3906_v13, %v3906_v13 }
 0x25b   :  { %v3917_v30 = vsub.f32 %v3719_v33, %v696_v16  ;;  %477 = vrot.lane.b32.xlu1 %v454_v22, %s3548_s24 }
 0x25c   :  { %v3921_v34 = vsub.f32 %v3717_v32, %v953_v28  ;;  %733 = vrot.lane.b32.xlu0 %v711_v29, %s3547_s23  ;;  %v946_v35 = vpop.xlane.xlu0 %945 }
 0x25d   :  { %v954_v36 = vmul.f32 0.125, %v946_v35  ;;  %v712_v41 = vmul.f32 %v3917_v30, %v3917_v30 }
 0x25e   :  { %v969_v42 = vmul.f32 %v3921_v34, %v3921_v34 }
 0x25f   :  { %v3929_v44 = vsub.f32 %v3719_v33, %v954_v36  ;;  %735 = vrot.lane.b32.xlu1 %v712_v41, %s3547_s23 }
 0x260   :  { %991 = vrot.lane.b32.xlu0 %v969_v42, %s3549_s0 }
 0x261   :  { %v970_v48 = vmul.f32 %v3929_v44, %v3929_v44 }
 0x263   :  { %993 = vrot.lane.b32.xlu1 %v970_v48, %s3549_s0 }
 0x286   :  { %v421_v49 = vpop.xlane.xlu1 %420 }
 0x287   :  { %v435_v50 = vmul.f32 0.125, %v421_v49 }
 0x289   :  { %v3937_v53 = vsub.f32 %v3739_v37, %v435_v50 }
 0x28a   :  { %v679_v54 = vpop.xlane.xlu1 %678 }
 0x28b   :  { %v693_v55 = vmul.f32 0.125, %v679_v54  ;;  %v424_v56 = vpop.xlane.xlu0 %423  ;;  %v451_v57 = vmul.f32 %v3937_v53, %v3937_v53 }
 0x28c   :  { %v436_v58 = vmul.f32 0.125, %v424_v56 }
 0x28d   :  { %v3942_v59 = vsub.f32 %v3739_v37, %v693_v55  ;;  %471 = vrot.lane.b32.xlu0 %v451_v57, %s3548_s24 }
 0x28e   :  { %v3946_v60 = vsub.f32 %v3741_v38, %v436_v58  ;;  %v937_v62 = vpop.xlane.xlu1 %936 }
 0x28f   :  { %v951_v3 = vmul.f32 0.125, %v937_v62  ;;  %v682_v4 = vpop.xlane.xlu0 %681  ;;  %v709_v5 = vmul.f32 %v3942_v59, %v3942_v59 }
 0x290   :  { %v694_v6 = vmul.f32 0.125, %v682_v4  ;;  %v452_v10 = vmul.f32 %v3946_v60, %v3946_v60 }
 0x291   :  { %v3953_v12 = vsub.f32 %v3739_v37, %v951_v3  ;;  %729 = vrot.lane.b32.xlu0 %v709_v5, %s3547_s23 }
 0x292   :  { %v3957_v14 = vsub.f32 %v3741_v38, %v694_v6  ;;  %473 = vrot.lane.b32.xlu1 %v452_v10, %s3548_s24 }
 0x293   :  { %v940_v15 = vpop.xlane.xlu0 %939  ;;  %v967_v16 = vmul.f32 %v3953_v12, %v3953_v12 }
 0x294   :  { %v952_v20 = vmul.f32 0.125, %v940_v15  ;;  %v710_v22 = vmul.f32 %v3957_v14, %v3957_v14 }
 0x295   :  { %987 = vrot.lane.b32.xlu0 %v967_v16, %s3549_s0 }
 0x296   :  { %v3966_v25 = vsub.f32 %v3741_v38, %v952_v20  ;;  %731 = vrot.lane.b32.xlu1 %v710_v22, %s3547_s23 }
 0x297   :  { %v223_v28 = vpop.xlane.xlu0 %222 }
 0x298   :  { %v241_v29 = vmul.f32 0.125, %v223_v28  ;;  %v968_v35 = vmul.f32 %v3966_v25, %v3966_v25 }
 0x29a   :  { %v249_v36 = vadd.f32 1e-06, %v241_v29  ;;  %989 = vrot.lane.b32.xlu1 %v968_v35, %s3549_s0 }
 0x29b   :  { %v217_v41 = vpop.xlane.xlu0 %216 }
 0x29c   :  { %3284 = vrsqrt.f32 %v249_v36  ;;  %v239_v42 = vmul.f32 0.125, %v217_v41 }
 0x29e   :  { %v247_v48 = vadd.f32 1e-06, %v239_v42 }
 0x29f   :  { %v226_v49 = vpop.xlane.xlu0 %225 }
 0x2a0   :  { %3286 = vrsqrt.f32 %v247_v48  ;;  %v242_v50 = vmul.f32 0.125, %v226_v49 }
 0x2a2   :  { %v250_v54 = vadd.f32 1e-06, %v242_v50 }
 0x2a3   :  { %v220_v55 = vpop.xlane.xlu0 %219 }
 0x2a4   :  { %3288 = vrsqrt.f32 %v250_v54  ;;  %v240_v56 = vmul.f32 0.125, %v220_v55 }
 0x2a6   :  { %v248_v57 = vadd.f32 1e-06, %v240_v56 }
 0x2a8   :  { %3290 = vrsqrt.f32 %v248_v57 }
 0x2a9   :  { %v3285_v58 = vpop.eup %3284 }
 0x2aa   :  { %v265_v62 = vmul.f32 %v3285_v58, %v3795_v43 }
 0x2ac   :  { %v279_v3 = vmul.f32 %v3657_v9, %v265_v62 }
 0x2ad   :  { %v3287_v4 = vpop.eup %3286 }
 0x2ae   :  { %v263_v5 = vmul.f32 %v3287_v4, %v3800_v45  ;;  %v3976_v6 = vadd.f32 %v3664_v11, %v279_v3 }
 0x2b0   :  { %v277_v10 = vmul.f32 %v3657_v9, %v263_v5  ;;  %v301_v15 = vmul.f32 %v3976_v6, %v3976_v6 }
 0x2b1   :  { %v3289_v16 = vpop.eup %3288  ;;  %v468_v20 = vpop.permute.xlu1 %467 }
 0x2b2   :  { %v266_v22 = vmul.f32 %v3289_v16, %v3806_v51  ;;  %v493_v28 = vsel %vm165_vm1, %v468_v20, 0.0  ;;  %v3984_v43 = vadd.f32 %v3664_v11, %v277_v10  ;;  %v309_v29 = vmul.f32 %v301_v15, %v3976_v6 }
 0x2b4   :  { %v280_v45 = vmul.f32 %v3657_v9, %v266_v22  ;;  %494 = vadd.xlane.f32.xlu0 %v493_v28  ;;  %v299_v35 = vmul.f32 %v3984_v43, %v3984_v43  ;;  %v317_v41 = vmul.f32 0.044715, %v309_v29 }
 0x2b5   :  { %v3291_v36 = vpop.eup %3290  ;;  %v464_v42 = vpop.permute.xlu1 %463 }
 0x2b6   :  { %v726_v48 = vpop.permute.xlu0 %725  ;;  %v264_v49 = vmul.f32 %v3291_v36, %v3812_v52  ;;  %v307_v51 = vmul.f32 %v299_v35, %v3984_v43  ;;  %v3993_v50 = vadd.f32 %v3664_v11, %v280_v45  ;;  %v325_v57 = vadd.f32 %v317_v41, %v3976_v6 }
 0x2b7   :  { %v751_v20 = vsel %vm165_vm1, %v726_v48, 0.0  ;;  %v487_v35 = vsel %vm165_vm1, %v464_v42, 0.0 }
 0x2b8   :  { %v278_v54 = vmul.f32 %v3657_v9, %v264_v49  ;;  %v315_v55 = vmul.f32 0.044715, %v307_v51  ;;  %v302_v56 = vmul.f32 %v3993_v50, %v3993_v50  ;;  %v333_v22 = vmul.f32 0.7978846, %v325_v57 }
 0x2b9   :  { %v470_v5 = vpop.permute.xlu1 %469 }
 0x2ba   :  { %v984_v58 = vpop.permute.xlu0 %983  ;;  %v4000_v62 = vadd.f32 %v3664_v11, %v278_v54  ;;  %v323_v3 = vadd.f32 %v315_v55, %v3984_v43  ;;  %v310_v52 = vmul.f32 %v302_v56, %v3993_v50  ;;  %v496_v42 = vsel %vm165_vm1, %v470_v5, 0.0 }
 0x2bb   :  { %v1009_v4 = vsel %vm165_vm1, %v984_v58, 0.0 }
 0x2bc   :  { %1010 = vadd.xlane.f32.xlu0 %v1009_v4  ;;  %v300_v10 = vmul.f32 %v4000_v62, %v4000_v62  ;;  %v331_v15 = vmul.f32 0.7978846, %v323_v3  ;;  %v318_v16 = vmul.f32 0.044715, %v310_v52 }
 0x2bd   :  { %v728_v51 = vpop.permute.xlu1 %727 }
 0x2be   :  { %752 = vadd.xlane.f32.xlu1 %v751_v20  ;;  %v722_v28 = vpop.permute.xlu0 %721  ;;  %v308_v29 = vmul.f32 %v300_v10, %v4000_v62  ;;  %v326_v45 = vadd.f32 %v318_v16, %v3993_v50  ;;  %3292 = vtanh.f32 %v331_v15  ;;  %v754_v4 = vsel %vm165_vm1, %v728_v51, 0.0 }
 0x2bf   :  { %v745_v49 = vsel %vm165_vm1, %v722_v28, 0.0  ;;  %3294 = vtanh.f32 %v333_v22 }
 0x2c0   :  { %488 = vadd.xlane.f32.xlu0 %v487_v35  ;;  %v316_v36 = vmul.f32 0.044715, %v308_v29  ;;  %v334_v41 = vmul.f32 0.7978846, %v326_v45 }
 0x2c1   :  { %v986_v3 = vpop.permute.xlu1 %985 }
 0x2c2   :  { %746 = vadd.xlane.f32.xlu1 %v745_v49  ;;  %v980_v54 = vpop.permute.xlu0 %979  ;;  %v324_v48 = vadd.f32 %v316_v36, %v4000_v62  ;;  %3296 = vtanh.f32 %v334_v41  ;;  %v1012_v29 = vsel %vm165_vm1, %v986_v3, 0.0 }
 0x2c3   :  { %v1003_v55 = vsel %vm165_vm1, %v980_v54, 0.0 }
 0x2c4   :  { %1004 = vadd.xlane.f32.xlu0 %v1003_v55  ;;  %v332_v56 = vmul.f32 0.7978846, %v324_v48 }
 0x2c5   :  { %v724_v20 = vpop.permute.xlu1 %723 }
 0x2c6   :  { %v466_v57 = vpop.permute.xlu0 %465  ;;  %3298 = vtanh.f32 %v332_v56  ;;  %v748_v49 = vsel %vm165_vm1, %v724_v20, 0.0 }
 0x2c7   :  { %v490_v58 = vsel %vm165_vm1, %v466_v57, 0.0 }
 0x2c8   :  { %497 = vadd.xlane.f32.xlu0 %v496_v42  ;;  %491 = vadd.xlane.f32.xlu1 %v490_v58 }
 0x2c9   :  { %v982_v54 = vpop.permute.xlu1 %981 }
 0x2ca   :  { %v476_v52 = vpop.permute.xlu0 %475  ;;  %v1006_v42 = vsel %vm165_vm1, %v982_v54, 0.0 }
 0x2cb   :  { %v505_v10 = vsel %vm165_vm1, %v476_v52, 0.0  ;;  %v3293_v15 = vpop.eup %3292 }
 0x2cc   :  { %755 = vadd.xlane.f32.xlu0 %v754_v4  ;;  %506 = vadd.xlane.f32.xlu1 %v505_v10  ;;  %v3295_v16 = vpop.eup %3294  ;;  %v347_v45 = vadd.f32 1.0, %v3293_v15 }
 0x2cd   :  { %v349_v36 = vadd.f32 1.0, %v3295_v16 }
 0x2ce   :  { %v734_v22 = vpop.permute.xlu0 %733  ;;  %v355_v55 = vmul.f32 0.5, %v347_v45 }
 0x2cf   :  { %v3297_v28 = vpop.eup %3296  ;;  %v763_v5 = vsel %vm165_vm1, %v734_v22, 0.0  ;;  %v357_v56 = vmul.f32 0.5, %v349_v36  ;;  %v195_v22 = vmul.f32 0.125, %v3821_v61 }
 0x2d0   :  { %1013 = vadd.xlane.f32.xlu0 %v1012_v29  ;;  %764 = vadd.xlane.f32.xlu1 %v763_v5  ;;  %v350_v35 = vadd.f32 1.0, %v3297_v28  ;;  %v363_v52 = vmul.f32 %v355_v55, %v3984_v43  ;;  %v196_v43 = vmul.f32 0.125, %v3823_v0 }
 0x2d1   :  { %v365_v10 = vmul.f32 %v357_v56, %v3976_v6  ;;  %v4031_v28 = vsub.f32 %v3739_v37, %v195_v22  ;;  %v478_v6 = vpop.permute.xlu1 %477  ;;  %v197_v22 = vmul.f32 0.125, %v3785_v23 }
 0x2d2   :  { %v358_v51 = vmul.f32 0.5, %v350_v35  ;;  %v992_v3 = vpop.permute.xlu0 %991  ;;  %v4036_v5 = vsub.f32 %v3741_v38, %v196_v43 }
 0x2d3   :  { %v3299_v41 = vpop.eup %3298  ;;  %v1021_v16 = vsel %vm165_vm1, %v992_v3, 0.0  ;;  %v211_v35 = vmul.f32 %v4031_v28, %v4031_v28 }
 0x2d4   :  { %749 = vadd.xlane.f32.xlu0 %v748_v49  ;;  %v348_v48 = vadd.f32 1.0, %v3299_v41  ;;  %v366_v58 = vmul.f32 %v358_v51, %v3993_v50  ;;  %v212_v0 = vmul.f32 %v4036_v5, %v4036_v5  ;;  %v508_v49 = vsel %vm165_vm1, %v478_v6, 0.0 }
 0x2d5   :  { %v227_v37 = vsel %vm165_vm1, %v211_v35, 0.0  ;;  %v736_v41 = vpop.permute.xlu1 %735 }
 0x2d6   :  { %v356_v57 = vmul.f32 0.5, %v348_v48  ;;  %v372_v20 = vpack.c.bf16 %v366_v58, %v365_v10  ;;  %v230_v38 = vsel %vm165_vm1, %v212_v0, 0.0  ;;  %v766_v54 = vsel %vm165_vm1, %v736_v41, 0.0 }
 0x2d7   :  { %v198_v58 = vmul.f32 0.125, %v3787_v27  ;;  %v4067_v27 = vsub.f32 %v3717_v32, %v197_v22 }
 0x2d8   :  { %1007 = vadd.xlane.f32.xlu0 %v1006_v42  ;;  %v364_v4 = vmul.f32 %v356_v57, %v4000_v62 }
 0x2d9   :  { %v994_v51 = vpop.permute.xlu1 %993  ;;  %v4055_v3 = vsub.f32 %v3719_v33, %v198_v58  ;;  %v213_v23 = vmul.f32 %v4067_v27, %v4067_v27 }
 0x2da   :  { %v371_v15 = vpack.c.bf16 %v364_v4, %v363_v52  ;;  %v1024_v55 = vsel %vm165_vm1, %v994_v51, 0.0 }
 0x2db   :  { %v214_v4 = vmul.f32 %v4055_v3, %v4055_v3 }
 0x2dc   :  { %3182 = vmatprep.mubr.msk.bf16.mxu1 %vm165_vm1, %v371_v15  ;;  %1022 = vadd.xlane.f32.xlu0 %v1021_v16 }
 0x2dd   :  { %3183 = vmatmul.mubr.msk.bf16.vlgmr.msra.gmra.mxu1 %vm165_vm1, %v372_v20  ;;  %v236_v16 = vsel %vm165_vm1, %v214_v4, 0.0 }
 0x2ff   :  { %v472_v50 = vpop.permute.xlu0 %471 }
 0x300   :  { %v499_v62 = vsel %vm165_vm1, %v472_v50, 0.0 }
 0x301   :  { %500 = vadd.xlane.f32.xlu1 %v499_v62 }
 0x303   :  { %v730_v29 = vpop.permute.xlu0 %729 }
 0x304   :  { %v757_v45 = vsel %vm165_vm1, %v730_v29, 0.0  ;;  %v474_v48 = vpop.permute.xlu1 %473 }
 0x305   :  { %758 = vadd.xlane.f32.xlu1 %v757_v45  ;;  %v502_v56 = vsel %vm165_vm1, %v474_v48, 0.0 }
 0x307   :  { %v988_v61 = vpop.permute.xlu0 %987 }
 0x308   :  { %v1015_v36 = vsel %vm165_vm1, %v988_v61, 0.0  ;;  %v732_v57 = vpop.permute.xlu1 %731 }
 0x309   :  { %228 = vadd.xlane.f32.xlu1 %v227_v37  ;;  %1016 = vadd.xlane.f32.xlu0 %v1015_v36  ;;  %v760_v42 = vsel %vm165_vm1, %v732_v57, 0.0  ;;  %v233_v36 = vsel %vm165_vm1, %v213_v23, 0.0 }
 0x30c   :  { %v990_v20 = vpop.permute.xlu1 %989 }
 0x30d   :  { %231 = vadd.xlane.f32.xlu1 %v230_v38  ;;  %509 = vadd.xlane.f32.xlu0 %v508_v49 }
 0x311   :  { %767 = vadd.xlane.f32.xlu0 %v766_v54 }
 0x315   :  { %1025 = vadd.xlane.f32.xlu0 %v1024_v55 }
 0x319   :  { %503 = vadd.xlane.f32.xlu0 %v502_v56 }
 0x31d   :  { %761 = vadd.xlane.f32.xlu0 %v760_v42 }
 0x31e   :  { %812 = vrot.lane.b32.xlu1 %v3664_v11, %s3550_s5 }
 0x333   :  { %801 = vrot.lane.b32.xlu0 %v3657_v9, %s3550_s5  ;;  %v1018_v9 = vsel %vm165_vm1, %v990_v20, 0.0 }
 0x33d   :  { %v495_v52 = vpop.xlane.xlu0 %494 }
 0x33e   :  { %v513_v10 = vmul.f32 0.125, %v495_v52 }
 0x340   :  { %v521_v15 = vadd.f32 1e-06, %v513_v10 }
 0x342   :  { %3300 = vrsqrt.f32 %v521_v15  ;;  %237 = vadd.xlane.f32.xlu1 %v236_v16 }
 0x345   :  { %v4061_v50 = vpop.xlane.xlu0 %1010 }
 0x346   :  { %1019 = vadd.xlane.f32.xlu1 %v1018_v9  ;;  %v4095_v9 = vld [vmem:[%s5494_s3] ss:$0 sm:$0xff] }
 0x347   :  { %v4064_v33 = vpop.xlane.xlu1 %752 }
 0x349   :  { %v489_v43 = vpop.xlane.xlu0 %488 }
 0x34a   :  { %v511_v62 = vmul.f32 0.125, %v489_v43 }
 0x34b   :  { %v4069_v29 = vpop.xlane.xlu1 %746 }
 0x34c   :  { %v519_v6 = vadd.f32 1e-06, %v511_v62 }
 0x34d   :  { %v4071_v45 = vpop.xlane.xlu0 %1004 }
 0x34e   :  { %3302 = vrsqrt.f32 %v519_v6 }
 0x34f   :  { %v3301_v35 = vpop.eup %3300 }
 0x350   :  { %v537_v0 = vmul.f32 %v3301_v35, %v3826_v1 }
 0x351   :  { %v492_v61 = vpop.xlane.xlu1 %491  ;;  %v498_v37 = vpop.xlane.xlu0 %497 }
 0x352   :  { %v512_v32 = vmul.f32 0.125, %v492_v61  ;;  %v514_v41 = vmul.f32 0.125, %v498_v37  ;;  %234 = vadd.xlane.f32.xlu0 %v233_v36  ;;  %v548_v51 = vmul.f32 %v3755_v39, %v537_v0 }
 0x354   :  { %v520_v38 = vadd.f32 1e-06, %v512_v32  ;;  %v522_v49 = vadd.f32 1e-06, %v514_v41  ;;  %v4080_v54 = vadd.f32 %v3757_v40, %v548_v51 }
 0x356   :  { %3304 = vrsqrt.f32 %v520_v38  ;;  %v567_v56 = vmul.f32 %v4080_v54, %v4080_v54 }
 0x357   :  { %3306 = vrsqrt.f32 %v522_v49  ;;  %1070 = vrot.lane.b32.xlu1 %v3664_v11, %s3551_s25 }
 0x358   :  { %v575_v58 = vmul.f32 %v567_v56, %v4080_v54 }
 0x35a   :  { %v583_v20 = vmul.f32 0.044715, %v575_v58 }
 0x35b   :  { %v3303_v48 = vpop.eup %3302 }
 0x35c   :  { %v535_v55 = vmul.f32 %v3303_v48, %v3831_v7  ;;  %v591_v23 = vadd.f32 %v583_v20, %v4080_v54  ;;  %v756_v48 = vpop.xlane.xlu0 %755 }
 0x35e   :  { %v546_v1 = vmul.f32 %v3755_v39, %v535_v55  ;;  %v599_v0 = vmul.f32 0.7978846, %v591_v23  ;;  %v507_v55 = vpop.xlane.xlu1 %506 }
 0x360   :  { %v557_v57 = vadd.f32 %v3757_v40, %v546_v1  ;;  %v517_v1 = vmul.f32 0.125, %v507_v55  ;;  %v769_v55 = vmul.f32 0.125, %v4069_v29 }
 0x362   :  { %v565_v42 = vmul.f32 %v557_v57, %v557_v57  ;;  %v525_v58 = vadd.f32 1e-06, %v517_v1 }
 0x363   :  { %v3305_v52 = vpop.eup %3304 }
 0x364   :  { %v3307_v4 = vpop.eup %3306  ;;  %v536_v11 = vmul.f32 %v3305_v52, %v3882_v24  ;;  %v573_v10 = vmul.f32 %v565_v42, %v557_v57  ;;  %v4101_v42 = vpop.xlane.xlu0 %1013 }
 0x365   :  { %v538_v15 = vmul.f32 %v3307_v4, %v3842_v17 }
 0x366   :  { %v547_v16 = vmul.f32 %v3755_v39, %v536_v11  ;;  %v581_v7 = vmul.f32 0.044715, %v573_v10 }
 0x367   :  { %v549_v22 = vmul.f32 %v3755_v39, %v538_v15 }
 0x368   :  { %1059 = vrot.lane.b32.xlu0 %v4095_v9, %s3551_s25  ;;  %v558_v43 = vadd.f32 %v3757_v40, %v547_v16  ;;  %v589_v62 = vadd.f32 %v581_v7, %v557_v57  ;;  %v750_v15 = vpop.xlane.xlu0 %749 }
 0x369   :  { %v560_v24 = vadd.f32 %v3757_v40, %v549_v22 }
 0x36a   :  { %v566_v6 = vmul.f32 %v558_v43, %v558_v43  ;;  %v597_v17 = vmul.f32 0.7978846, %v589_v62 }
 0x36b   :  { %v568_v35 = vmul.f32 %v560_v24, %v560_v24 }
 0x36c   :  { %v574_v61 = vmul.f32 %v566_v6, %v558_v43  ;;  %3308 = vtanh.f32 %v597_v17  ;;  %v765_v17 = vpop.xlane.xlu1 %764 }
 0x36d   :  { %v576_v37 = vmul.f32 %v568_v35, %v560_v24  ;;  %3310 = vtanh.f32 %v599_v0 }
 0x36e   :  { %v582_v36 = vmul.f32 0.044715, %v574_v61 }
 0x36f   :  { %v584_v32 = vmul.f32 0.044715, %v576_v37  ;;  %v4103_v37 = vpop.xlane.xlu0 %1007 }
 0x370   :  { %v590_v41 = vadd.f32 %v582_v36, %v558_v43 }
 0x371   :  { %v592_v38 = vadd.f32 %v584_v32, %v560_v24 }
 0x372   :  { %v598_v49 = vmul.f32 0.7978846, %v590_v41 }
 0x373   :  { %v600_v51 = vmul.f32 0.7978846, %v592_v38 }
 0x374   :  { %3312 = vtanh.f32 %v598_v49  ;;  %v771_v49 = vmul.f32 0.125, %v4064_v33 }
 0x375   :  { %3314 = vtanh.f32 %v600_v51 }
 0x376   :  { %3316 = vrsqrt.f32 %v525_v58 }
 0x379   :  { %v3309_v56 = vpop.eup %3308 }
 0x37a   :  { %v613_v52 = vadd.f32 1.0, %v3309_v56  ;;  %v3311_v4 = vpop.eup %3310  ;;  %v772_v56 = vmul.f32 0.125, %v756_v48 }
 0x37b   :  { %v615_v20 = vadd.f32 1.0, %v3311_v4  ;;  %v777_v4 = vadd.f32 1e-06, %v769_v55 }
 0x37c   :  { %v621_v7 = vmul.f32 0.5, %v613_v52  ;;  %v775_v52 = vmul.f32 0.125, %v765_v17 }
 0x37d   :  { %v623_v61 = vmul.f32 0.5, %v615_v20 }
 0x37e   :  { %v629_v23 = vmul.f32 %v621_v7, %v557_v57  ;;  %v4109_v57 = vpop.xlane.xlu0 %1022  ;;  %v783_v48 = vadd.f32 1e-06, %v775_v52 }
 0x37f   :  { %v631_v41 = vmul.f32 %v623_v61, %v4080_v54 }
 0x381   :  { %v3313_v11 = vpop.eup %3312 }
 0x382   :  { %v3315_v10 = vpop.eup %3314  ;;  %v614_v16 = vadd.f32 1.0, %v3313_v11  ;;  %v770_v11 = vmul.f32 0.125, %v750_v15 }
 0x383   :  { %v616_v22 = vadd.f32 1.0, %v3315_v10  ;;  %v3317_v58 = vpop.eup %3316  ;;  %v780_v10 = vadd.f32 1e-06, %v772_v56 }
 0x384   :  { %v622_v62 = vmul.f32 0.5, %v614_v16  ;;  %v541_v54 = vmul.f32 %v3317_v58, %v3894_v2  ;;  %v778_v20 = vadd.f32 1e-06, %v770_v11  ;;  %v1029_v58 = vmul.f32 0.125, %v4061_v50 }
 0x385   :  { %v624_v6 = vmul.f32 0.5, %v616_v22  ;;  %v1027_v11 = vmul.f32 0.125, %v4071_v45 }
 0x386   :  { %v630_v35 = vmul.f32 %v622_v62, %v558_v43  ;;  %v552_v62 = vmul.f32 %v3755_v39, %v541_v54 }
 0x387   :  { %v632_v0 = vmul.f32 %v624_v6, %v560_v24  ;;  %v779_v24 = vadd.f32 1e-06, %v771_v49 }
 0x388   :  { %v637_v36 = vpack.c.bf16 %v630_v35, %v629_v23 }
 0x389   :  { %v638_v51 = vpack.c.bf16 %v632_v0, %v631_v41  ;;  %v4117_v0 = vadd.f32 %v3757_v40, %v552_v62 }
 0x38a   :  { %v501_v32 = vpop.xlane.xlu1 %500  ;;  %1161 = vrot.lane.b32.xlu0 %v637_v36, %s3548_s24 }
 0x38b   :  { %v515_v38 = vmul.f32 0.125, %v501_v32 }
 0x38d   :  { %v523_v1 = vadd.f32 1e-06, %v515_v38 }
 0x38e   :  { %v759_v43 = vpop.xlane.xlu1 %758  ;;  %1163 = vrot.lane.b32.xlu0 %v638_v51, %s3548_s24  ;;  %v571_v51 = vmul.f32 %v4117_v0, %v4117_v0 }
 0x38f   :  { %3318 = vrsqrt.f32 %v523_v1  ;;  %v773_v33 = vmul.f32 0.125, %v759_v43 }
 0x390   :  { %3320 = vrsqrt.f32 %v779_v24 }
 0x391   :  { %3322 = vrsqrt.f32 %v777_v4  ;;  %v781_v6 = vadd.f32 1e-06, %v773_v33  ;;  %v579_v4 = vmul.f32 %v571_v51, %v4117_v0 }
 0x392   :  { %v229_v16 = vpop.xlane.xlu1 %228  ;;  %v4113_v7 = vpop.xlane.xlu0 %1016  ;;  %3324 = vrsqrt.f32 %v780_v10 }
 0x393   :  { %v243_v29 = vmul.f32 0.125, %v229_v16  ;;  %v587_v62 = vmul.f32 0.044715, %v579_v4 }
 0x395   :  { %v251_v22 = vadd.f32 1e-06, %v243_v29 }
 0x396   :  { %v232_v17 = vpop.xlane.xlu1 %231  ;;  %v510_v23 = vpop.xlane.xlu0 %509 }
 0x397   :  { %3326 = vrsqrt.f32 %v251_v22  ;;  %v244_v15 = vmul.f32 0.125, %v232_v17  ;;  %v518_v2 = vmul.f32 0.125, %v510_v23  ;;  %v4134_v22 = vadd.f32 1e-06, %v1029_v58 }
 0x398   :  { %3328 = vrsqrt.f32 %v783_v48  ;;  %v4136_v17 = vadd.f32 1e-06, %v1027_v11 }
 0x399   :  { %3330 = vrsqrt.f32 %v778_v20  ;;  %v252_v35 = vadd.f32 1e-06, %v244_v15  ;;  %v526_v61 = vadd.f32 1e-06, %v518_v2 }
 0x39a   :  { %3332 = vrsqrt.f32 %v781_v6  ;;  %v768_v36 = vpop.xlane.xlu0 %767 }
 0x39b   :  { %3334 = vrsqrt.f32 %v252_v35  ;;  %v776_v38 = vmul.f32 0.125, %v768_v36 }
 0x39c   :  { %v3319_v32 = vpop.eup %3318  ;;  %3336 = vrsqrt.f32 %v526_v61  ;;  %v4143_v61 = vmul.f32 0.125, %v4101_v42 }
 0x39d   :  { %v539_v41 = vmul.f32 %v3319_v32, %v3937_v53  ;;  %v3321_v1 = vpop.eup %3320  ;;  %v784_v24 = vadd.f32 1e-06, %v776_v38  ;;  %v4149_v38 = vld [vmem:[%s5495_s4] ss:$0 sm:$0xff] }
 0x39e   :  { %v4120_v49 = vpop.xlane.xlu0 %1025  ;;  %v3323_v43 = vpop.eup %3322 }
 0x39f   :  { %v550_v55 = vmul.f32 %v3755_v39, %v539_v41  ;;  %v3325_v53 = vpop.eup %3324  ;;  %3338 = vrsqrt.f32 %v784_v24  ;;  %v793_v2 = vmul.f32 %v3323_v43, %v3858_v18 }
 0x3a0   :  { %v796_v35 = vmul.f32 %v3325_v53, %v3854_v31 }
 0x3a1   :  { %v4126_v56 = vadd.f32 %v3757_v40, %v550_v55 }
 0x3a2   :  { %v504_v52 = vpop.xlane.xlu0 %503 }
 0x3a3   :  { %v516_v54 = vmul.f32 0.125, %v504_v52  ;;  %v569_v48 = vmul.f32 %v4126_v56, %v4126_v56  ;;  %v4167_v52 = vpop.permute.xlu1 %812 }
 0x3a4   :  { %v3327_v10 = vpop.eup %3326 }
 0x3a5   :  { %v3329_v33 = vpop.eup %3328  ;;  %v267_v16 = vmul.f32 %v3327_v10, %v4031_v28  ;;  %v524_v29 = vadd.f32 1e-06, %v516_v54  ;;  %v795_v28 = vmul.f32 %v3321_v1, %v3835_v8  ;;  %v577_v8 = vmul.f32 %v569_v48, %v4126_v56 }
 0x3a6   :  { %v3331_v20 = vpop.eup %3330  ;;  %v762_v50 = vpop.xlane.xlu0 %761  ;;  %v799_v24 = vmul.f32 %v3329_v33, %v3906_v13 }
 0x3a7   :  { %v3333_v6 = vpop.eup %3332  ;;  %v281_v45 = vmul.f32 %v4095_v9, %v267_v16  ;;  %3340 = vrsqrt.f32 %v524_v29  ;;  %v774_v23 = vmul.f32 0.125, %v762_v50  ;;  %v794_v18 = vmul.f32 %v3331_v20, %v3878_v21 }
 0x3a8   :  { %v3335_v15 = vpop.eup %3334  ;;  %v797_v31 = vmul.f32 %v3333_v6, %v3942_v59  ;;  %v585_v54 = vmul.f32 0.044715, %v577_v8 }
 0x3a9   :  { %v3337_v36 = vpop.eup %3336  ;;  %v268_v32 = vmul.f32 %v3335_v15, %v4036_v5  ;;  %v782_v41 = vadd.f32 1e-06, %v774_v23  ;;  %v4152_v51 = vadd.f32 %v4149_v38, %v281_v45  ;;  %v595_v5 = vadd.f32 %v587_v62, %v4117_v0 }
 0x3aa   :  { %v542_v42 = vmul.f32 %v3337_v36, %v3902_v26  ;;  %v4158_v55 = vpop.permute.xlu0 %801 }
 0x3ab   :  { %v282_v1 = vmul.f32 %v4095_v9, %v268_v32  ;;  %3342 = vrsqrt.f32 %v782_v41  ;;  %v303_v43 = vmul.f32 %v4152_v51, %v4152_v51  ;;  %v804_v58 = vmul.f32 %v4158_v55, %v793_v2 }
 0x3ac   :  { %v553_v21 = vmul.f32 %v3755_v39, %v542_v42  ;;  %v805_v26 = vmul.f32 %v4158_v55, %v794_v18  ;;  %v808_v59 = vmul.f32 %v4158_v55, %v797_v31  ;;  %v4184_v33 = vmul.f32 0.7978846, %v595_v5  ;;  %v3339_v31 = vpop.eup %3338 }
 0x3ad   :  { %v4172_v4 = vadd.f32 %v4149_v38, %v282_v1  ;;  %v311_v53 = vmul.f32 %v303_v43, %v4152_v51  ;;  %v4176_v11 = vadd.f32 %v4167_v52, %v804_v58  ;;  %v806_v50 = vmul.f32 %v4158_v55, %v795_v28 }
 0x3ae   :  { %v4179_v10 = vadd.f32 %v4167_v52, %v805_v26  ;;  %v4182_v13 = vadd.f32 %v3757_v40, %v553_v21  ;;  %v4187_v16 = vadd.f32 %v4167_v52, %v808_v59  ;;  %v807_v23 = vmul.f32 %v4158_v55, %v796_v35 }
 0x3af   :  { %v304_v29 = vmul.f32 %v4172_v4, %v4172_v4  ;;  %v319_v48 = vmul.f32 0.044715, %v311_v53  ;;  %v823_v20 = vmul.f32 %v4176_v11, %v4176_v11  ;;  %v593_v32 = vadd.f32 %v585_v54, %v4126_v56 }
 0x3b0   :  { %v824_v62 = vmul.f32 %v4179_v10, %v4179_v10  ;;  %v572_v6 = vmul.f32 %v4182_v13, %v4182_v13  ;;  %v827_v45 = vmul.f32 %v4187_v16, %v4187_v16  ;;  %v4209_v18 = vadd.f32 %v4167_v52, %v806_v50 }
 0x3b1   :  { %v312_v15 = vmul.f32 %v304_v29, %v4172_v4  ;;  %v327_v2 = vadd.f32 %v319_v48, %v4152_v51  ;;  %v831_v36 = vmul.f32 %v823_v20, %v4176_v11  ;;  %v4212_v1 = vadd.f32 %v4167_v52, %v807_v23 }
 0x3b2   :  { %v832_v28 = vmul.f32 %v824_v62, %v4179_v10  ;;  %v580_v41 = vmul.f32 %v572_v6, %v4182_v13  ;;  %v835_v8 = vmul.f32 %v827_v45, %v4187_v16  ;;  %v825_v59 = vmul.f32 %v4209_v18, %v4209_v18 }
 0x3b3   :  { %v320_v42 = vmul.f32 0.044715, %v312_v15  ;;  %v335_v35 = vmul.f32 0.7978846, %v327_v2  ;;  %v839_v5 = vmul.f32 0.044715, %v831_v36  ;;  %v800_v48 = vmul.f32 %v3339_v31, %v3917_v30 }
 0x3b4   :  { %v3341_v43 = vpop.eup %3340  ;;  %v840_v58 = vmul.f32 0.044715, %v832_v28  ;;  %v588_v21 = vmul.f32 0.044715, %v580_v41  ;;  %v843_v26 = vmul.f32 0.044715, %v835_v8  ;;  %v826_v62 = vmul.f32 %v4212_v1, %v4212_v1 }
 0x3b5   :  { %v540_v53 = vmul.f32 %v3341_v43, %v3946_v60  ;;  %v328_v54 = vadd.f32 %v320_v42, %v4172_v4  ;;  %3344 = vtanh.f32 %v335_v35  ;;  %v847_v29 = vadd.f32 %v839_v5, %v4176_v11 }
 0x3b6   :  { %v848_v20 = vadd.f32 %v840_v58, %v4179_v10  ;;  %v601_v50 = vmul.f32 0.7978846, %v593_v32  ;;  %v833_v15 = vmul.f32 %v825_v59, %v4209_v18  ;;  %v596_v36 = vadd.f32 %v588_v21, %v4182_v13 }
 0x3b7   :  { %v551_v6 = vmul.f32 %v3755_v39, %v540_v53  ;;  %v336_v45 = vmul.f32 0.7978846, %v328_v54  ;;  %v855_v23 = vmul.f32 0.7978846, %v847_v29  ;;  %v851_v28 = vadd.f32 %v843_v26, %v4187_v16 }
 0x3b8   :  { %v3343_v60 = vpop.eup %3342  ;;  %v856_v2 = vmul.f32 0.7978846, %v848_v20  ;;  %v834_v30 = vmul.f32 %v826_v62, %v4212_v1  ;;  %v841_v8 = vmul.f32 0.044715, %v833_v15  ;;  %v810_v31 = vmul.f32 %v4158_v55, %v799_v24 }
 0x3b9   :  { %v798_v41 = vmul.f32 %v3343_v60, %v3957_v14  ;;  %3346 = vtanh.f32 %v336_v45  ;;  %v4230_v32 = vadd.f32 %v3757_v40, %v551_v6  ;;  %v811_v42 = vmul.f32 %v4158_v55, %v800_v48 }
 0x3ba   :  { %3348 = vtanh.f32 %v855_v23  ;;  %v842_v39 = vmul.f32 0.044715, %v834_v30  ;;  %v849_v43 = vadd.f32 %v841_v8, %v4209_v18  ;;  %v1028_v14 = vmul.f32 0.125, %v4103_v37 }
 0x3bb   :  { %3350 = vtanh.f32 %v856_v2  ;;  %v570_v35 = vmul.f32 %v4230_v32, %v4230_v32  ;;  %v809_v5 = vmul.f32 %v4158_v55, %v798_v41  ;;  %v604_v58 = vmul.f32 0.7978846, %v596_v36 }
 0x3bc   :  { %v850_v40 = vadd.f32 %v842_v39, %v4212_v1  ;;  %v4241_v21 = vadd.f32 %v4167_v52, %v810_v31  ;;  %v1038_v24 = vadd.f32 1e-06, %v4143_v61  ;;  %v859_v53 = vmul.f32 0.7978846, %v851_v28 }
 0x3bd   :  { %v578_v26 = vmul.f32 %v570_v35, %v4230_v32  ;;  %v4246_v59 = vadd.f32 %v4167_v52, %v809_v5  ;;  %3352 = vtanh.f32 %v601_v50  ;;  %v857_v55 = vmul.f32 0.7978846, %v849_v43 }
 0x3be   :  { %v4249_v54 = vadd.f32 %v4167_v52, %v811_v42  ;;  %v829_v37 = vmul.f32 %v4241_v21, %v4241_v21  ;;  %3354 = vtanh.f32 %v4184_v33  ;;  %v858_v48 = vmul.f32 0.7978846, %v850_v40 }
 0x3bf   :  { %v586_v29 = vmul.f32 0.044715, %v578_v26  ;;  %v828_v61 = vmul.f32 %v4246_v59, %v4246_v59  ;;  %v1036_v20 = vadd.f32 1e-06, %v1028_v14  ;;  %3356 = vtanh.f32 %v604_v58 }
 0x3c0   :  { %v830_v62 = vmul.f32 %v4249_v54, %v4249_v54  ;;  %v837_v50 = vmul.f32 %v829_v37, %v4241_v21  ;;  %v1033_v52 = vmul.f32 0.125, %v4109_v57  ;;  %3358 = vtanh.f32 %v859_v53 }
 0x3c1   :  { %v594_v6 = vadd.f32 %v586_v29, %v4230_v32  ;;  %v836_v45 = vmul.f32 %v828_v61, %v4246_v59  ;;  %v1031_v33 = vmul.f32 0.125, %v4113_v7  ;;  %3360 = vtanh.f32 %v857_v55  ;;  %v3278_v7 = vld [vmem:[%s5498_s8 + $0x18] sm:$0xff]  }
 0x3c2   :  { %v3345_v23 = vpop.eup %3344  ;;  %v838_v15 = vmul.f32 %v830_v62, %v4249_v54  ;;  %v845_v60 = vmul.f32 0.044715, %v837_v50  ;;  %3362 = vtanh.f32 %v858_v48  ;;  %v1034_v41 = vmul.f32 0.125, %v4120_v49  ;;  %3214 = vmatprep.subr.bf16.mxu1 %v3278_v7 }
 0x3c3   :  { %v351_v2 = vadd.f32 1.0, %v3345_v23  ;;  %v602_v36 = vmul.f32 0.7978846, %v594_v6  ;;  %v844_v28 = vmul.f32 0.044715, %v836_v45  ;;  %3364 = vrsqrt.f32 %v4134_v22  ;;  %3215 = vmatpush3.bf16.msra.mxu1 %v3278_v7 }
 0x3c4   :  { %v846_v30 = vmul.f32 0.044715, %v838_v15  ;;  %v853_v57 = vadd.f32 %v845_v60, %v4241_v21  ;;  %v1041_v40 = vadd.f32 1e-06, %v1033_v52  ;;  %v1039_v55 = vadd.f32 1e-06, %v1031_v33 }
 0x3c5   :  { %3366 = vtanh.f32 %v602_v36  ;;  %v852_v8 = vadd.f32 %v844_v28, %v4246_v59  ;;  %v359_v5 = vmul.f32 0.5, %v351_v2  ;;  %v1042_v29 = vadd.f32 1e-06, %v1034_v41 }
 0x3c6   :  { %v3347_v39 = vpop.eup %3346  ;;  %3368 = vrsqrt.f32 %v4136_v17  ;;  %v854_v31 = vadd.f32 %v846_v30, %v4249_v54  ;;  %v861_v42 = vmul.f32 0.7978846, %v853_v57 }
 0x3c7   :  { %v3349_v35 = vpop.eup %3348  ;;  %3370 = vrsqrt.f32 %v1038_v24  ;;  %v352_v22 = vadd.f32 1.0, %v3347_v39  ;;  %v860_v43 = vmul.f32 0.7978846, %v852_v8  ;;  %v367_v24 = vmul.f32 %v359_v5, %v4152_v51 }
 0x3c8   :  { %v3351_v49 = vpop.eup %3350  ;;  %v871_v14 = vadd.f32 1.0, %v3349_v35  ;;  %v862_v58 = vmul.f32 0.7978846, %v854_v31  ;;  %3372 = vtanh.f32 %v861_v42 }
 0x3c9   :  { %v360_v26 = vmul.f32 0.5, %v352_v22  ;;  %v872_v53 = vadd.f32 1.0, %v3351_v49  ;;  %3374 = vtanh.f32 %v860_v43 }
 0x3ca   :  { %v879_v17 = vmul.f32 0.5, %v871_v14  ;;  %3376 = vtanh.f32 %v862_v58  ;;  %v3353_v37 = vpop.eup %3352  ;;  %v3279_v14 = vld [vmem:[%s5498_s8 + $0x10] sm:$0xff]  }
 0x3cb   :  { %v238_v61 = vpop.xlane.xlu1 %237  ;;  %v368_v48 = vmul.f32 %v360_v26, %v4172_v4  ;;  %v880_v62 = vmul.f32 0.5, %v872_v53  ;;  %v3355_v50 = vpop.eup %3354  ;;  %3378 = vrsqrt.f32 %v1036_v20  ;;  %v617_v2 = vadd.f32 1.0, %v3353_v37  ;;  %3216 = vmatprep.subr.bf16.mxu1 %v3279_v14 }
 0x3cc   :  { %v246_v6 = vmul.f32 0.125, %v238_v61  ;;  %v887_v45 = vmul.f32 %v879_v17, %v4176_v11  ;;  %v3357_v52 = vpop.eup %3356  ;;  %3380 = vrsqrt.f32 %v1041_v40  ;;  %v619_v8 = vadd.f32 1.0, %v3355_v50  ;;  %3217 = vmatpush3.bf16.msra.mxu1 %v3279_v14 }
 0x3cd   :  { %v373_v23 = vpack.c.bf16 %v368_v48, %v367_v24  ;;  %v888_v33 = vmul.f32 %v880_v62, %v4179_v10  ;;  %v3359_v15 = vpop.eup %3358  ;;  %3382 = vrsqrt.f32 %v1039_v55  ;;  %v620_v11 = vadd.f32 1.0, %v3357_v52 }
 0x3ce   :  { %v254_v60 = vadd.f32 1e-06, %v246_v6  ;;  %v3361_v36 = vpop.eup %3360  ;;  %3384 = vrsqrt.f32 %v1042_v29  ;;  %v625_v10 = vmul.f32 0.5, %v617_v2  ;;  %v875_v7 = vadd.f32 1.0, %v3359_v15 }
 0x3cf   :  { %3186 = vmatprep.mubr.msk.bf16.mxu1 %vm165_vm1, %v373_v23  ;;  %v1020_v51 = vpop.xlane.xlu1 %1019  ;;  %v895_v4 = vpack.c.bf16 %v888_v33, %v887_v45  ;;  %v3363_v28 = vpop.eup %3362  ;;  %v873_v42 = vadd.f32 1.0, %v3361_v36  ;;  %v628_v49 = vmul.f32 0.5, %v620_v11  ;;  %v627_v26 = vmul.f32 0.5, %v619_v8 }
 0x3d0   :  { %3386 = vrsqrt.f32 %v254_v60  ;;  %v1032_v20 = vmul.f32 0.125, %v1020_v51  ;;  %v3365_v30 = vpop.eup %3364  ;;  %v874_v35 = vadd.f32 1.0, %v3363_v28  ;;  %v633_v40 = vmul.f32 %v625_v10, %v4126_v56 }
 0x3d1   :  { %1173 = vrot.lane.b32.xlu1 %v895_v4, %s3547_s23  ;;  %v883_v53 = vmul.f32 0.5, %v875_v7  ;;  %v881_v61 = vmul.f32 0.5, %v873_v42  ;;  %v636_v6 = vmul.f32 %v628_v49, %v4182_v13  ;;  %v1053_v56 = vmul.f32 %v3365_v30, %v3846_v19 }
 0x3d2   :  { %v3367_v57 = vpop.eup %3366  ;;  %v1040_v41 = vadd.f32 1e-06, %v1032_v20  ;;  %v882_v24 = vmul.f32 0.5, %v874_v35  ;;  %v635_v33 = vmul.f32 %v627_v26, %v4117_v0 }
 0x3d3   :  { %v3369_v39 = vpop.eup %3368  ;;  %v618_v31 = vadd.f32 1.0, %v3367_v57  ;;  %v891_v2 = vmul.f32 %v883_v53, %v4187_v16  ;;  %v889_v51 = vmul.f32 %v881_v61, %v4209_v18 }
 0x3d4   :  { %v3371_v22 = vpop.eup %3370  ;;  %3388 = vrsqrt.f32 %v1040_v41  ;;  %v890_v13 = vmul.f32 %v882_v24, %v4212_v1  ;;  %v1051_v28 = vmul.f32 %v3369_v39, %v3870_v47  ;;  %v640_v57 = vpack.c.bf16 %v636_v6, %v635_v33 }
 0x3d5   :  { %v3373_v5 = vpop.eup %3372  ;;  %v626_v43 = vmul.f32 0.5, %v618_v31  ;;  %v1054_v19 = vmul.f32 %v3371_v22, %v3866_v46 }
 0x3d6   :  { %v3375_v58 = vpop.eup %3374  ;;  %v877_v55 = vadd.f32 1.0, %v3373_v5 }
 0x3d7   :  { %v3377_v17 = vpop.eup %3376  ;;  %v634_v37 = vmul.f32 %v626_v43, %v4230_v32  ;;  %v876_v29 = vadd.f32 1.0, %v3375_v58  ;;  %v3280_v43 = vld [vmem:[%s5498_s8 + $0x8] sm:$0xff]  }
 0x3d8   :  { %v878_v48 = vadd.f32 1.0, %v3377_v17  ;;  %v3379_v62 = vpop.eup %3378  ;;  %v885_v52 = vmul.f32 0.5, %v877_v55  ;;  %3218 = vmatprep.subr.bf16.mxu1 %v3280_v43 }
 0x3d9   :  { %v639_v50 = vpack.c.bf16 %v634_v37, %v633_v40  ;;  %v884_v45 = vmul.f32 0.5, %v876_v29  ;;  %v3381_v23 = vpop.eup %3380  ;;  %v1052_v11 = vmul.f32 %v3379_v62, %v3890_v63  ;;  %v896_v63 = vpack.c.bf16 %v890_v13, %v889_v51  ;;  %3219 = vmatpush3.bf16.msra.mxu1 %v3280_v43 }
 0x3da   :  { %v886_v15 = vmul.f32 0.5, %v878_v48  ;;  %v3383_v60 = vpop.eup %3382  ;;  %v893_v16 = vmul.f32 %v885_v52, %v4241_v21 }
 0x3db   :  { %1165 = vrot.lane.b32.xlu0 %v639_v50, %s3548_s24  ;;  %v235_v32 = vpop.xlane.xlu0 %234  ;;  %v892_v36 = vmul.f32 %v884_v45, %v4246_v59  ;;  %v3385_v4 = vpop.eup %3384  ;;  %v1057_v59 = vmul.f32 %v3381_v23, %v3921_v34  ;;  %v1055_v18 = vmul.f32 %v3383_v60, %v3953_v12 }
 0x3dc   :  { %v245_v20 = vmul.f32 0.125, %v235_v32  ;;  %v894_v0 = vmul.f32 %v886_v15, %v4249_v54  ;;  %v1058_v47 = vmul.f32 %v3385_v4, %v3929_v44  ;;  %v1071_v54 = vpop.permute.xlu1 %1070 }
 0x3dd   :  { %v3387_v30 = vpop.eup %3386  ;;  %v897_v41 = vpack.c.bf16 %v892_v36, %v891_v2 }
 0x3de   :  { %v270_v1 = vmul.f32 %v3387_v30, %v4055_v3  ;;  %v253_v10 = vadd.f32 1e-06, %v245_v20  ;;  %v898_v8 = vpack.c.bf16 %v894_v0, %v893_v16 }
 0x3df   :  { %1167 = vrot.lane.b32.xlu0 %v640_v57, %s3548_s24  ;;  %1177 = vrot.lane.b32.xlu1 %v897_v41, %s3547_s23  ;;  %v1060_v46 = vpop.permute.xlu0 %1059 }
 0x3e0   :  { %v284_v7 = vmul.f32 %v4095_v9, %v270_v1  ;;  %3390 = vrsqrt.f32 %v253_v10  ;;  %v1064_v21 = vmul.f32 %v1060_v46, %v1053_v56  ;;  %v1065_v34 = vmul.f32 %v1060_v46, %v1054_v19 }
 0x3e1   :  { %v3389_v39 = vpop.eup %3388  ;;  %v1062_v12 = vmul.f32 %v1060_v46, %v1051_v28  ;;  %v1063_v31 = vmul.f32 %v1060_v46, %v1052_v11  ;;  %v1068_v3 = vmul.f32 %v1060_v46, %v1057_v59  ;;  %v1069_v42 = vmul.f32 %v1060_v46, %v1058_v47 }
 0x3e2   :  { %v1056_v44 = vmul.f32 %v3389_v39, %v3966_v25  ;;  %v4305_v35 = vadd.f32 %v1071_v54, %v1064_v21  ;;  %v4307_v22 = vadd.f32 %v1071_v54, %v1065_v34  ;;  %v1066_v5 = vmul.f32 %v1060_v46, %v1055_v18 }
 0x3e3   :  { %1175 = vrot.lane.b32.xlu0 %v896_v63, %s3547_s23  ;;  %v4313_v49 = vadd.f32 %v1071_v54, %v1062_v12  ;;  %v4315_v14 = vadd.f32 %v1071_v54, %v1063_v31  ;;  %v4317_v58 = vadd.f32 %v1071_v54, %v1068_v3  ;;  %v4319_v40 = vadd.f32 %v1071_v54, %v1069_v42 }
 0x3e4   :  { %v1083_v25 = vmul.f32 %v4305_v35, %v4305_v35  ;;  %v1084_v26 = vmul.f32 %v4307_v22, %v4307_v22  ;;  %v1067_v53 = vmul.f32 %v1060_v46, %v1056_v44  ;;  %v4325_v55 = vadd.f32 %v1071_v54, %v1066_v5 }
 0x3e5   :  { %v1081_v17 = vmul.f32 %v4313_v49, %v4313_v49  ;;  %v1082_v37 = vmul.f32 %v4315_v14, %v4315_v14  ;;  %v1087_v29 = vmul.f32 %v4317_v58, %v4317_v58  ;;  %v1088_v61 = vmul.f32 %v4319_v40, %v4319_v40 }
 0x3e6   :  { %v1091_v24 = vmul.f32 %v1083_v25, %v4305_v35  ;;  %v1092_v48 = vmul.f32 %v1084_v26, %v4307_v22  ;;  %v4337_v62 = vadd.f32 %v1071_v54, %v1067_v53  ;;  %v1085_v50 = vmul.f32 %v4325_v55, %v4325_v55 }
 0x3e7   :  { %1179 = vrot.lane.b32.xlu0 %v898_v8, %s3547_s23  ;;  %v1089_v6 = vmul.f32 %v1081_v17, %v4313_v49  ;;  %v1090_v45 = vmul.f32 %v1082_v37, %v4315_v14  ;;  %v1095_v52 = vmul.f32 %v1087_v29, %v4317_v58  ;;  %v1096_v23 = vmul.f32 %v1088_v61, %v4319_v40 }
 0x3e8   :  { %v1099_v56 = vmul.f32 0.044715, %v1091_v24  ;;  %v1100_v33 = vmul.f32 0.044715, %v1092_v48  ;;  %v1086_v15 = vmul.f32 %v4337_v62, %v4337_v62  ;;  %v1093_v60 = vmul.f32 %v1085_v50, %v4325_v55 }
 0x3e9   :  { %v1097_v32 = vmul.f32 0.044715, %v1089_v6  ;;  %v1098_v2 = vmul.f32 0.044715, %v1090_v45  ;;  %v1103_v36 = vmul.f32 0.044715, %v1095_v52  ;;  %v4350_v51 = vadd.f32 %v4149_v38, %v284_v7 }
 0x3ea   :  { %v1107_v13 = vadd.f32 %v1099_v56, %v4305_v35  ;;  %v1108_v4 = vadd.f32 %v1100_v33, %v4307_v22  ;;  %v1104_v28 = vmul.f32 0.044715, %v1096_v23  ;;  %v1094_v19 = vmul.f32 %v1086_v15, %v4337_v62 }
 0x3eb   :  { %v1105_v20 = vadd.f32 %v1097_v32, %v4313_v49  ;;  %v1106_v0 = vadd.f32 %v1098_v2, %v4315_v14  ;;  %v1111_v30 = vadd.f32 %v1103_v36, %v4317_v58  ;;  %v1101_v11 = vmul.f32 0.044715, %v1093_v60 }
 0x3ec   :  { %v1115_v57 = vmul.f32 0.7978846, %v1107_v13  ;;  %v1116_v41 = vmul.f32 0.7978846, %v1108_v4  ;;  %v1112_v16 = vadd.f32 %v1104_v28, %v4319_v40  ;;  %v1102_v59 = vmul.f32 0.044715, %v1094_v19 }
 0x3ed   :  { %v3391_v18 = vpop.eup %3390  ;;  %v1113_v1 = vmul.f32 0.7978846, %v1105_v20  ;;  %v1114_v10 = vmul.f32 0.7978846, %v1106_v0  ;;  %v1109_v47 = vadd.f32 %v1101_v11, %v4325_v55  ;;  %v1119_v54 = vmul.f32 0.7978846, %v1111_v30 }
 0x3ee   :  { %v269_v46 = vmul.f32 %v3391_v18, %v4067_v27  ;;  %3392 = vtanh.f32 %v1115_v57  ;;  %v1110_v63 = vadd.f32 %v1102_v59, %v4337_v62  ;;  %v1120_v8 = vmul.f32 0.7978846, %v1112_v16 }
 0x3ef   :  { %3394 = vtanh.f32 %v1116_v41  ;;  %v306_v7 = vmul.f32 %v4350_v51, %v4350_v51  ;;  %v1117_v34 = vmul.f32 0.7978846, %v1109_v47 }
 0x3f0   :  { %v283_v21 = vmul.f32 %v4095_v9, %v269_v46  ;;  %3396 = vtanh.f32 %v1113_v1  ;;  %v1118_v39 = vmul.f32 0.7978846, %v1110_v63 }
 0x3f1   :  { %3398 = vtanh.f32 %v1114_v10  ;;  %v314_v12 = vmul.f32 %v306_v7, %v4350_v51 }
 0x3f2   :  { %3400 = vtanh.f32 %v1119_v54  ;;  %v4367_v27 = vadd.f32 %v4149_v38, %v283_v21  ;;  %v3281_v38 = vld [vmem:[%s5498_s8] sm:$0xff]   ;;  %s3554_s8 = smov 64  }
 0x3f3   :  { %3402 = vtanh.f32 %v1120_v8  ;;  %v322_v31 = vmul.f32 0.044715, %v314_v12  ;;  %3220 = vmatprep.subr.bf16.mxu1 %v3281_v38 }
 0x3f4   :  { %3404 = vtanh.f32 %v1117_v34  ;;  %v305_v3 = vmul.f32 %v4367_v27, %v4367_v27  ;;  %3221 = vmatpush3.bf16.msra.mxu1 %v3281_v38  ;;  %v1416_v38 = vld [vmem:[%s5499_s7 + $0x20] sm:$0xff] }
 0x3f5   :  { %3406 = vtanh.f32 %v1118_v39  ;;  %v330_v42 = vadd.f32 %v322_v31, %v4350_v51 }
 0x3f6   :  { %v313_v9 = vmul.f32 %v305_v3, %v4367_v27  ;;  %v1412_v3 = vld [vmem:[%s5499_s7] sm:$0xff] }
 0x3f7   :  { %v338_v44 = vmul.f32 0.7978846, %v330_v42  ;;  %v1413_v42 = vld [vmem:[%s5499_s7 + $0x8] sm:$0xff] }
 0x3f8   :  { %v321_v5 = vmul.f32 0.044715, %v313_v9  ;;  %v1420_v9 = vpack.c.bf16 %v1413_v42, %v1412_v3 }
 0x3f9   :  { %3408 = vtanh.f32 %v338_v44 }
 0x3fa   :  { %v329_v43 = vadd.f32 %v321_v5, %v4367_v27  ;;  %v1414_v5 = vld [vmem:[%s5499_s7 + $0x10] sm:$0xff] }
 0x3fb   :  { %v3393_v25 = vpop.eup %3392 }
 0x3fc   :  { %v3395_v26 = vpop.eup %3394  ;;  %v1131_v53 = vadd.f32 1.0, %v3393_v25  ;;  %v337_v17 = vmul.f32 0.7978846, %v329_v43  ;;  %v1162_v8 = vpop.permute.xlu0 %1161  ;;  %v1415_v43 = vld [vmem:[%s5499_s7 + $0x18] sm:$0xff]  ;;  %v1417_v25 = vld [vmem:[%s5499_s7 + $0x28] sm:$0xff] }
 0x3fd   :  { %v3397_v37 = vpop.eup %3396  ;;  %v1132_v29 = vadd.f32 1.0, %v3395_v26  ;;  %v1421_v26 = vpack.c.bf16 %v1415_v43, %v1414_v5 }
 0x3fe   :  { %v3399_v61 = vpop.eup %3398  ;;  %v1139_v24 = vmul.f32 0.5, %v1131_v53  ;;  %v1129_v48 = vadd.f32 1.0, %v3397_v37  ;;  %3410 = vtanh.f32 %v337_v17  ;;  %v1422_v53 = vpack.c.bf16 %v1417_v25, %v1416_v38  ;;  %v1418_v17 = vld [vmem:[%s5499_s7 + $0x30] sm:$0xff]  ;;  %v1419_v37 = vld [vmem:[%s5499_s7 + $0x38] sm:$0xff] }
 0x3ff   :  { %v3401_v50 = vpop.eup %3400  ;;  %v1140_v6 = vmul.f32 0.5, %v1132_v29  ;;  %v1130_v45 = vadd.f32 1.0, %v3399_v61  ;;  %v1423_v29 = vpack.c.bf16 %v1419_v37, %v1418_v17  ;;  %v4431_v61 = vld [vmem:[%s5500_s11] ss:$0 sm:$0xff] }
 0x400   :  { %v3403_v52 = vpop.eup %3402  ;;  %v1147_v23 = vmul.f32 %v1139_v24, %v4305_v35  ;;  %v1137_v56 = vmul.f32 0.5, %v1129_v48  ;;  %v1135_v33 = vadd.f32 1.0, %v3401_v50  ;;  %v4438_v24 = vld [vmem:[%s5501_s10] ss:$0 sm:$0xff]  ;;  %v4442_v48 = vpop.f32.mrf.mxu1 }
 0x401   :  { %v3405_v15 = vpop.eup %3404  ;;  %v1148_v60 = vmul.f32 %v1140_v6, %v4307_v22  ;;  %v1138_v32 = vmul.f32 0.5, %v1130_v45  ;;  %v1136_v2 = vadd.f32 1.0, %v3403_v52 }
 0x402   :  { %v3407_v36 = vpop.eup %3406  ;;  %v1145_v13 = vmul.f32 %v1137_v56, %v4313_v49  ;;  %v1143_v4 = vmul.f32 0.5, %v1135_v33  ;;  %v1133_v28 = vadd.f32 1.0, %v3405_v15  ;;  %v4444_v50 = vpop.f32.mrf.mxu1 }
 0x403   :  { %v1154_v19 = vpack.c.bf16 %v1148_v60, %v1147_v23  ;;  %v1146_v20 = vmul.f32 %v1138_v32, %v4315_v14  ;;  %v1144_v0 = vmul.f32 0.5, %v1136_v2  ;;  %v1134_v30 = vadd.f32 1.0, %v3407_v36 }
 0x404   :  { %v1151_v11 = vmul.f32 %v1143_v4, %v4317_v58  ;;  %v1141_v35 = vmul.f32 0.5, %v1133_v28  ;;  %v4446_v6 = vpop.f32.mrf.mxu1 }
 0x405   :  { %1187 = vrot.lane.b32.xlu0 %v1154_v19, %s3549_s0  ;;  %v1153_v57 = vpack.c.bf16 %v1146_v20, %v1145_v13  ;;  %v1152_v22 = vmul.f32 %v1144_v0, %v4319_v40  ;;  %v1142_v41 = vmul.f32 0.5, %v1134_v30 }
 0x406   :  { %v3409_v16 = vpop.eup %3408  ;;  %v1149_v59 = vmul.f32 %v1141_v35, %v4325_v55  ;;  %v1164_v55 = vpop.permute.xlu0 %1163 }
 0x407   :  { %1185 = vrot.lane.b32.xlu1 %v1153_v57, %s3549_s0  ;;  %v1156_v49 = vpack.c.bf16 %v1152_v22, %v1151_v11  ;;  %v1150_v18 = vmul.f32 %v1142_v41, %v4337_v62  ;;  %v354_v14 = vadd.f32 1.0, %v3409_v16  ;;  %v4448_v45 = vpop.f32.mrf.mxu1 }
 0x409   :  { %1191 = vrot.lane.b32.xlu0 %v1156_v49, %s3549_s0  ;;  %v1155_v1 = vpack.c.bf16 %v1150_v18, %v1149_v59  ;;  %v362_v47 = vmul.f32 0.5, %v354_v14 }
 0x40b   :  { %v3411_v58 = vpop.eup %3410  ;;  %1189 = vrot.lane.b32.xlu1 %v1155_v1, %s3549_s0  ;;  %v370_v54 = vmul.f32 %v362_v47, %v4350_v51 }
 0x40c   :  { %v353_v10 = vadd.f32 1.0, %v3411_v58 }
 0x40d   :  { %1925 = vrot.lane.b32.xlu0 %v4438_v24, %s3552_s15 }
 0x40e   :  { %v361_v46 = vmul.f32 0.5, %v353_v10  ;;  %v3025_v10 = vld [vmem:[%s5502_s9] ss:$0 sm:$0xff] }
 0x40f   :  { %1936 = vrot.lane.b32.xlu1 %v4431_v61, %s3552_s15 }
 0x410   :  { %v369_v40 = vmul.f32 %v361_v46, %v4367_v27 }
 0x412   :  { %v374_v63 = vpack.c.bf16 %v370_v54, %v369_v40 }
 0x414   :  { %3187 = vmatmul.mubr.msk.bf16.gmra.mxu1 %vm165_vm1, %v374_v63 }
 0x415   :  { %3190 = vmatprep.mubr.msk.bf16.mxu1 %vm165_vm1, %v1162_v8 }
 0x41c   :  { %3191 = vmatmul.mubr.msk.bf16.gmra.mxu1 %vm165_vm1, %v1164_v55 }
 0x443   :  { %v1174_v21 = vpop.permute.xlu1 %1173 }
 0x44d   :  { %v1166_v62 = vpop.permute.xlu0 %1165 }
 0x44e   :  { %3194 = vmatprep.mubr.msk.bf16.mxu1 %vm165_vm1, %v1166_v62 }
 0x451   :  { %v1168_v7 = vpop.permute.xlu0 %1167  ;;  %v1178_v51 = vpop.permute.xlu1 %1177 }
 0x452   :  { %3195 = vmatmul.mubr.msk.bf16.gmra.mxu1 %vm165_vm1, %v1168_v7 }
 0x453   :  { %3198 = vmatprep.mubr.msk.bf16.mxu1 %vm165_vm1, %v1174_v21 }
 0x455   :  { %v1176_v34 = vpop.permute.xlu0 %1175 }
 0x459   :  { %v1180_v39 = vpop.permute.xlu0 %1179 }
 0x45a   :  { %3199 = vmatmul.mubr.msk.bf16.gmra.mxu1 %vm165_vm1, %v1176_v34 }
 0x45b   :  { %3202 = vmatprep.mubr.msk.bf16.mxu1 %vm165_vm1, %v1178_v51 }
 0x462   :  { %3203 = vmatmul.mubr.msk.bf16.gmra.mxu1 %vm165_vm1, %v1180_v39 }
 0x477   :  { %v1188_v12 = vpop.permute.xlu0 %1187 }
 0x479   :  { %v1186_v27 = vpop.permute.xlu1 %1185 }
 0x47a   :  { %3206 = vmatprep.mubr.msk.bf16.mxu1 %vm165_vm1, %v1186_v27 }
 0x47b   :  { %3207 = vmatmul.mubr.msk.bf16.gmra.mxu1 %vm165_vm1, %v1188_v12  ;;  %v1192_v44 = vpop.permute.xlu0 %1191 }
 0x47d   :  { %v1190_v31 = vpop.permute.xlu1 %1189 }
 0x47e   :  { %3210 = vmatprep.mubr.msk.bf16.mxu1 %vm165_vm1, %v1190_v31 }
 0x47f   :  { %v4585_v38 = vpop.permute.xlu0 %1925 }
 0x481   :  { %v4587_v25 = vpop.permute.xlu1 %1936 }
 0x483   :  { %3211 = vmatmul.mubr.msk.bf16.gmra.mxu1 %vm165_vm1, %v1192_v44 }
 0x484   :  { %3222 = vmatprep.mubr.msk.bf16.mxu1 %vm1470_vm3, %v1420_v9 }
 0x48b   :  { %3223 = vmatmul.mubr.msk.bf16.vlgmr.msra.gmra.mxu1 %vm1470_vm3, %v1421_v26 }
 0x48c   :  { %3226 = vmatprep.mubr.msk.bf16.mxu1 %vm1470_vm3, %v1422_v53 }
 0x493   :  { %3227 = vmatmul.mubr.msk.bf16.gmra.mxu1 %vm1470_vm3, %v1423_v29 }
 0x4d4   :  { %v4450_v52 = vpop.f32.mrf.mxu1 }
 0x4d5   :  { %5509 = vst [vmem:[#allocation2_spill] sm:$0xff] %v4450_v52 }
 0x4d6   :  { %v4452_v23 = vpop.f32.mrf.mxu1 }
 0x4d7   :  { %5510 = vst [vmem:[#allocation3_spill] sm:$0xff] %v4452_v23 }
 0x4d8   :  { %v4454_v56 = vpop.f32.mrf.mxu1 }
 0x4d9   :  { %5511 = vst [vmem:[#allocation4_spill] sm:$0xff] %v4454_v56 }
 0x4da   :  { %v4456_v33 = vpop.f32.mrf.mxu1 }
 0x4db   :  { %5512 = vst [vmem:[#allocation5_spill] sm:$0xff] %v4456_v33 }
 0x4dc   :  { %v4458_v15 = vpop.f32.mrf.mxu1 }
 0x4dd   :  { %5513 = vst [vmem:[#allocation6_spill] sm:$0xff] %v4458_v15 }
 0x4de   :  { %v4460_v60 = vpop.f32.mrf.mxu1 }
 0x4df   :  { %5514 = vst [vmem:[#allocation7_spill] sm:$0xff] %v4460_v60 }
 0x4e0   :  { %v4462_v32 = vpop.f32.mrf.mxu1 }
 0x4e1   :  { %5515 = vst [vmem:[#allocation8_spill] sm:$0xff] %v4462_v32 }
 0x4e2   :  { %v4464_v2 = vpop.f32.mrf.mxu1 }
 0x4e3   :  { %5516 = vst [vmem:[#allocation9_spill] sm:$0xff] %v4464_v2 }
 0x512   :  { %v4466_v36 = vpop.f32.mrf.mxu1 }
 0x513   :  { %5517 = vst [vmem:[#allocation10_spill] sm:$0xff] %v4466_v36 }
 0x514   :  { %v4468_v13 = vpop.f32.mrf.mxu1 }
 0x515   :  { %5518 = vst [vmem:[#allocation11_spill] sm:$0xff] %v4468_v13 }
 0x516   :  { %v4470_v4 = vpop.f32.mrf.mxu1 }
 0x517   :  { %5519 = vst [vmem:[#allocation12_spill] sm:$0xff] %v4470_v4 }
 0x518   :  { %v4472_v28 = vpop.f32.mrf.mxu1 }
 0x519   :  { %5520 = vst [vmem:[#allocation13_spill] sm:$0xff] %v4472_v28 }
 0x51a   :  { %v4474_v19 = vpop.f32.mrf.mxu1 }
 0x51b   :  { %5521 = vst [vmem:[#allocation14_spill] sm:$0xff] %v4474_v19 }
 0x51c   :  { %v4476_v20 = vpop.f32.mrf.mxu1 }
 0x51d   :  { %5522 = vst [vmem:[#allocation15_spill] sm:$0xff] %v4476_v20 }
 0x51e   :  { %v4478_v0 = vpop.f32.mrf.mxu1 }
 0x51f   :  { %5523 = vst [vmem:[#allocation16_spill] sm:$0xff] %v4478_v0 }
 0x520   :  { %v4480_v30 = vpop.f32.mrf.mxu1 }
 0x521   :  { %5524 = vst [vmem:[#allocation17_spill] sm:$0xff] %v4480_v30 }
 0x522   :  { %v4482_v11 = vpop.f32.mrf.mxu1 }
 0x523   :  { %5525 = vst [vmem:[#allocation18_spill] sm:$0xff] %v4482_v11 }
 0x524   :  { %v4484_v35 = vpop.f32.mrf.mxu1 }
 0x525   :  { %5526 = vst [vmem:[#allocation19_spill] sm:$0xff] %v4484_v35 }
 0x526   :  { %v4486_v57 = vpop.f32.mrf.mxu1 }
 0x527   :  { %5527 = vst [vmem:[#allocation20_spill] sm:$0xff] %v4486_v57 }
 0x528   :  { %v4488_v22 = vpop.f32.mrf.mxu1 }
 0x529   :  { %5528 = vst [vmem:[#allocation21_spill] sm:$0xff] %v4488_v22 }
 0x53b   :  { %v4490_v41 = vpop.f32.mrf.mxu1 }
 0x53c   :  { %5529 = vst [vmem:[#allocation22_spill] sm:$0xff] %v4490_v41 }
 0x53d   :  { %v4492_v16 = vpop.f32.mrf.mxu1 }
 0x53e   :  { %5530 = vst [vmem:[#allocation23_spill] sm:$0xff] %v4492_v16 }
 0x53f   :  { %v4494_v49 = vpop.f32.mrf.mxu1 }
 0x540   :  { %5531 = vst [vmem:[#allocation24_spill] sm:$0xff] %v4494_v49  ;;  %v3282_v49 = vld [vmem:[%s5503_s12 + $0x8] sm:$0xff]  }
 0x541   :  { %v4496_v59 = vpop.f32.mrf.mxu1  ;;  %3230 = vmatprep.subr.bf16.mxu0 %v3282_v49 }
 0x542   :  { %5532 = vst [vmem:[#allocation25_spill] sm:$0xff] %v4496_v59  ;;  %3231 = vmatpush3.bf16.msra.mxu0 %v3282_v49 }
 0x543   :  { %v4498_v18 = vpop.f32.mrf.mxu1 }
 0x544   :  { %5533 = vst [vmem:[#allocation26_spill] sm:$0xff] %v4498_v18 }
 0x545   :  { %v4500_v14 = vpop.f32.mrf.mxu1 }
 0x546   :  { %5534 = vst [vmem:[#allocation27_spill] sm:$0xff] %v4500_v14 }
 0x547   :  { %v4502_v1 = vpop.f32.mrf.mxu1 }
 0x548   :  { %5535 = vst [vmem:[#allocation28_spill] sm:$0xff] %v4502_v1 }
 0x549   :  { %v4504_v58 = vpop.f32.mrf.mxu1 }
 0x54a   :  { %5536 = vst [vmem:[#allocation29_spill] sm:$0xff] %v4504_v58 }
 0x54b   :  { %v3224_v47 = vpop.f32.mrf.mxu1 }
 0x54c   :  { %v4509_v46 = vadd.f32 %v3224_v47, %v3025_v10 }
 0x54d   :  { %v1517_v40 = vpop.f32.mrf.mxu1 }
 0x54e   :  { %1769 = vrot.lane.b32.xlu1 %v4509_v46, %s3553_s19  ;;  %v1554_v55 = vsel %vm87_vm0, %v4509_v46, 0.0  ;;  %v4529_v62 = vadd.f32 %v3025_v10, %v1517_v40 }
 0x54f   :  { %v3225_v54 = vpop.f32.mrf.mxu1 }
 0x550   :  { %v4513_v63 = vadd.f32 %v3225_v54, %v3025_v10  ;;  %v1548_v51 = vsel %vm87_vm0, %v4529_v62, 0.0 }
 0x551   :  { %v1520_v7 = vpop.f32.mrf.mxu1 }
 0x552   :  { %2027 = vrot.lane.b32.xlu1 %v4509_v46, %s3554_s8  ;;  %1771 = vrot.lane.b32.xlu0 %v4513_v63, %s3553_s19  ;;  %v1557_v8 = vsel %vm87_vm0, %v4513_v63, 0.0  ;;  %v4533_v21 = vadd.f32 %v3025_v10, %v1520_v7 }
 0x553   :  { %v3228_v39 = vpop.f32.mrf.mxu1 }
 0x554   :  { %v1551_v34 = vsel %vm87_vm0, %v4533_v21, 0.0  ;;  %v4549_v12 = vadd.f32 %v3228_v39, %v3025_v10 }
 0x555   :  { %v1533_v27 = vpop.f32.mrf.mxu1 }
 0x556   :  { %2285 = vrot.lane.b32.xlu1 %v4509_v46, %s3552_s15  ;;  %2029 = vrot.lane.b32.xlu0 %v4513_v63, %s3554_s8  ;;  %v1566_v9 = vsel %vm87_vm0, %v4549_v12, 0.0  ;;  %v4569_v44 = vadd.f32 %v3025_v10, %v1533_v27 }
 0x557   :  { %v3229_v31 = vpop.f32.mrf.mxu1 }
 0x558   :  { %v4553_v3 = vadd.f32 %v3229_v31, %v3025_v10  ;;  %v1560_v7 = vsel %vm87_vm0, %v4569_v44, 0.0 }
 0x559   :  { %v1536_v5 = vpop.f32.mrf.mxu1 }
 0x55a   :  { %2287 = vrot.lane.b32.xlu0 %v4513_v63, %s3552_s15  ;;  %v1569_v42 = vsel %vm87_vm0, %v4553_v3, 0.0  ;;  %v4573_v43 = vadd.f32 %v3025_v10, %v1536_v5 }
 0x579   :  { %1558 = vadd.xlane.f32.xlu0 %v1557_v8  ;;  %v1563_v8 = vsel %vm87_vm0, %v4573_v43, 0.0 }
 0x57a   :  { %1555 = vadd.xlane.f32.xlu1 %v1554_v55 }
 0x58b   :  { %1765 = vrot.lane.b32.xlu1 %v4529_v62, %s3553_s19 }
 0x58f   :  { %1767 = vrot.lane.b32.xlu0 %v4533_v21, %s3553_s19  ;;  %2023 = vrot.lane.b32.xlu1 %v4529_v62, %s3554_s8 }
 0x593   :  { %2025 = vrot.lane.b32.xlu0 %v4533_v21, %s3554_s8  ;;  %2281 = vrot.lane.b32.xlu1 %v4529_v62, %s3552_s15 }
 0x597   :  { %2283 = vrot.lane.b32.xlu0 %v4533_v21, %s3552_s15 }
 0x5b6   :  { %1552 = vadd.xlane.f32.xlu0 %v1551_v34 }
 0x5b7   :  { %1549 = vadd.xlane.f32.xlu1 %v1548_v51 }
 0x5c0   :  { %v1770_v53 = vpop.permute.xlu1 %1769 }
 0x5c1   :  { %v1795_v34 = vsel %vm87_vm0, %v1770_v53, 0.0 }
 0x5c4   :  { %v1772_v26 = vpop.permute.xlu0 %1771  ;;  %v2028_v37 = vpop.permute.xlu1 %2027 }
 0x5c5   :  { %v2053_v31 = vsel %vm87_vm0, %v2028_v37, 0.0 }
 0x5c8   :  { %1777 = vrot.lane.b32.xlu1 %v4549_v12, %s3553_s19  ;;  %v2030_v17 = vpop.permute.xlu0 %2029  ;;  %v2286_v10 = vpop.permute.xlu1 %2285 }
 0x5c9   :  { %v2311_v5 = vsel %vm87_vm0, %v2286_v10, 0.0 }
 0x5cc   :  { %1779 = vrot.lane.b32.xlu0 %v4553_v3, %s3553_s19  ;;  %2035 = vrot.lane.b32.xlu1 %v4549_v12, %s3554_s8  ;;  %v2288_v29 = vpop.permute.xlu0 %2287 }
 0x5d0   :  { %2037 = vrot.lane.b32.xlu0 %v4553_v3, %s3554_s8  ;;  %2293 = vrot.lane.b32.xlu1 %v4549_v12, %s3552_s15 }
 0x5d4   :  { %2295 = vrot.lane.b32.xlu0 %v4553_v3, %s3552_s15 }
 0x5f3   :  { %1570 = vadd.xlane.f32.xlu0 %v1569_v42  ;;  %v1798_v42 = vsel %vm87_vm0, %v1772_v26, 0.0 }
 0x5f4   :  { %1567 = vadd.xlane.f32.xlu1 %v1566_v9 }
 0x602   :  { %v1559_v47 = vpop.xlane.xlu0 %1558 }
 0x603   :  { %v1556_v40 = vpop.xlane.xlu1 %1555 }
 0x605   :  { %1773 = vrot.lane.b32.xlu1 %v4569_v44, %s3553_s19 }
 0x606   :  { %v1768_v54 = vpop.permute.xlu0 %1767 }
 0x607   :  { %v1766_v55 = vpop.permute.xlu1 %1765 }
 0x608   :  { %v1789_v51 = vsel %vm87_vm0, %v1766_v55, 0.0 }
 0x609   :  { %1775 = vrot.lane.b32.xlu0 %v4573_v43, %s3553_s19  ;;  %2031 = vrot.lane.b32.xlu1 %v4569_v44, %s3554_s8 }
 0x60a   :  { %v2026_v39 = vpop.permute.xlu0 %2025 }
 0x60b   :  { %v2024_v27 = vpop.permute.xlu1 %2023 }
 0x60c   :  { %v2047_v55 = vsel %vm87_vm0, %v2024_v27, 0.0 }
 0x60d   :  { %2033 = vrot.lane.b32.xlu0 %v4573_v43, %s3554_s8  ;;  %2289 = vrot.lane.b32.xlu1 %v4569_v44, %s3552_s15 }
 0x60e   :  { %v2284_v9 = vpop.permute.xlu0 %2283 }
 0x611   :  { %2291 = vrot.lane.b32.xlu0 %v4573_v43, %s3552_s15 }
 0x630   :  { %1564 = vadd.xlane.f32.xlu0 %v1563_v8  ;;  %v2282_v8 = vpop.permute.xlu1 %2281 }
 0x631   :  { %1561 = vadd.xlane.f32.xlu1 %v1560_v7  ;;  %v2056_v7 = vsel %vm87_vm0, %v2030_v17, 0.0  ;;  %v2305_v37 = vsel %vm87_vm0, %v2282_v8, 0.0  ;;  %v2308_v17 = vsel %vm87_vm0, %v2284_v9, 0.0 }
 0x634   :  { %1796 = vadd.xlane.f32.xlu0 %v1795_v34 }
 0x635   :  { %1790 = vadd.xlane.f32.xlu1 %v1789_v51  ;;  %v2314_v51 = vsel %vm87_vm0, %v2288_v29, 0.0 }
 0x638   :  { %2054 = vadd.xlane.f32.xlu0 %v2053_v31  ;;  %v2050_v31 = vsel %vm87_vm0, %v2026_v39, 0.0 }
 0x639   :  { %1799 = vadd.xlane.f32.xlu1 %v1798_v42  ;;  %v1792_v42 = vsel %vm87_vm0, %v1768_v54, 0.0 }
 0x63c   :  { %2312 = vadd.xlane.f32.xlu0 %v2311_v5 }
 0x63d   :  { %2057 = vadd.xlane.f32.xlu1 %v2056_v7 }
 0x63f   :  { %v1553_v53 = vpop.xlane.xlu0 %1552 }
 0x640   :  { %2048 = vadd.xlane.f32.xlu0 %v2047_v55  ;;  %v1550_v34 = vpop.xlane.xlu1 %1549 }
 0x641   :  { %2315 = vadd.xlane.f32.xlu1 %v2314_v51 }
 0x643   :  { %v1780_v10 = vpop.permute.xlu0 %1779 }
 0x644   :  { %2306 = vadd.xlane.f32.xlu0 %v2305_v37  ;;  %v1778_v26 = vpop.permute.xlu1 %1777  ;;  %v1810_v29 = vsel %vm87_vm0, %v1780_v10, 0.0  ;;  %v1576_v10 = vmul.f32 0.03125, %v1559_v47 }
 0x645   :  { %2051 = vadd.xlane.f32.xlu1 %v2050_v31  ;;  %v1807_v7 = vsel %vm87_vm0, %v1778_v26, 0.0 }
 0x647   :  { %v2038_v5 = vpop.permute.xlu0 %2037 }
 0x648   :  { %1793 = vadd.xlane.f32.xlu0 %v1792_v42  ;;  %v2036_v27 = vpop.permute.xlu1 %2035  ;;  %v2068_v39 = vsel %vm87_vm0, %v2038_v5, 0.0 }
 0x649   :  { %2309 = vadd.xlane.f32.xlu1 %v2308_v17  ;;  %v2065_v8 = vsel %vm87_vm0, %v2036_v27, 0.0  ;;  %v1575_v27 = vmul.f32 0.03125, %v1556_v40 }
 0x64b   :  { %v2296_v51 = vpop.permute.xlu0 %2295 }
 0x64c   :  { %1808 = vadd.xlane.f32.xlu0 %v1807_v7  ;;  %v2294_v55 = vpop.permute.xlu1 %2293  ;;  %v2326_v9 = vsel %vm87_vm0, %v2296_v51, 0.0  ;;  %v1573_v51 = vmul.f32 0.03125, %v1550_v34 }
 0x64d   :  { %1811 = vadd.xlane.f32.xlu1 %v1810_v29  ;;  %v2323_v54 = vsel %vm87_vm0, %v2294_v55, 0.0  ;;  %v4618_v29 = vsub.f32 %v4513_v63, %v1576_v10  ;;  %v1574_v10 = vmul.f32 0.03125, %v1553_v53 }
 0x650   :  { %2066 = vadd.xlane.f32.xlu0 %v2065_v8 }
 0x651   :  { %2069 = vadd.xlane.f32.xlu1 %v2068_v39  ;;  %v4622_v39 = vsub.f32 %v4509_v46, %v1575_v27 }
 0x653   :  { %v1591_v34 = vmul.f32 %v4622_v39, %v4622_v39 }
 0x654   :  { %2324 = vadd.xlane.f32.xlu0 %v2323_v54 }
 0x655   :  { %2327 = vadd.xlane.f32.xlu1 %v2326_v9 }
 0x67c   :  { %v4611_v37 = vpop.xlane.xlu0 %1570 }
 0x67d   :  { %v4613_v26 = vpop.xlane.xlu1 %1567 }
 0x680   :  { %v1776_v31 = vpop.permute.xlu0 %1775 }
 0x681   :  { %v1774_v42 = vpop.permute.xlu1 %1773  ;;  %v1804_v17 = vsel %vm87_vm0, %v1776_v31, 0.0  ;;  %v1592_v31 = vmul.f32 %v4618_v29, %v4618_v29 }
 0x682   :  { %1805 = vadd.xlane.f32.xlu1 %v1804_v17  ;;  %v1801_v5 = vsel %vm87_vm0, %v1774_v42, 0.0  ;;  %v4629_v42 = vsub.f32 %v4529_v62, %v1573_v51 }
 0x683   :  { %1802 = vadd.xlane.f32.xlu0 %v1801_v5  ;;  %v1606_v27 = vsel %vm87_vm0, %v1592_v31, 0.0  ;;  %v4636_v5 = vsub.f32 %v4533_v21, %v1574_v10 }
 0x684   :  { %v2034_v7 = vpop.permute.xlu0 %2033  ;;  %v1589_v53 = vmul.f32 %v4629_v42, %v4629_v42 }
 0x685   :  { %v2032_v8 = vpop.permute.xlu1 %2031  ;;  %v2062_v55 = vsel %vm87_vm0, %v2034_v7, 0.0  ;;  %v1603_v7 = vsel %vm87_vm0, %v1591_v34, 0.0 }
 0x686   :  { %2063 = vadd.xlane.f32.xlu1 %v2062_v55  ;;  %v2059_v47 = vsel %vm87_vm0, %v2032_v8, 0.0  ;;  %v1597_v8 = vsel %vm87_vm0, %v1589_v53, 0.0  ;;  %v1590_v55 = vmul.f32 %v4636_v5, %v4636_v5 }
 0x687   :  { %2060 = vadd.xlane.f32.xlu0 %v2059_v47 }
 0x688   :  { %v2292_v40 = vpop.permute.xlu0 %2291  ;;  %v1600_v51 = vsel %vm87_vm0, %v1590_v55, 0.0 }
 0x689   :  { %v2290_v54 = vpop.permute.xlu1 %2289  ;;  %v2320_v9 = vsel %vm87_vm0, %v2292_v40, 0.0 }
 0x68a   :  { %2321 = vadd.xlane.f32.xlu1 %v2320_v9  ;;  %v2317_v17 = vsel %vm87_vm0, %v2290_v54, 0.0 }
 0x68b   :  { %2318 = vadd.xlane.f32.xlu0 %v2317_v17 }
 0x68e   :  { %1607 = vadd.xlane.f32.xlu1 %v1606_v27 }
 0x68f   :  { %1604 = vadd.xlane.f32.xlu0 %v1603_v7 }
 0x693   :  { %1598 = vadd.xlane.f32.xlu0 %v1597_v8 }
 0x697   :  { %1601 = vadd.xlane.f32.xlu0 %v1600_v51 }
 0x6b9   :  { %v4645_v47 = vpop.xlane.xlu0 %1564 }
 0x6ba   :  { %v4647_v40 = vpop.xlane.xlu1 %1561 }
 0x6bd   :  { %v1797_v54 = vpop.xlane.xlu0 %1796 }
 0x6be   :  { %v1815_v9 = vmul.f32 0.03125, %v1797_v54  ;;  %v1791_v31 = vpop.xlane.xlu1 %1790 }
 0x6bf   :  { %v1813_v55 = vmul.f32 0.03125, %v1791_v31 }
 0x6c0   :  { %v4650_v10 = vsub.f32 %v4509_v46, %v1815_v9 }
 0x6c1   :  { %v2055_v17 = vpop.xlane.xlu0 %2054 }
 0x6c2   :  { %v1831_v34 = vmul.f32 %v4650_v10, %v4650_v10  ;;  %v2073_v27 = vmul.f32 0.03125, %v2055_v17  ;;  %v1800_v7 = vpop.xlane.xlu1 %1799  ;;  %v4665_v17 = vsub.f32 %v4529_v62, %v1813_v55 }
 0x6c4   :  { %v4655_v53 = vsub.f32 %v4509_v46, %v2073_v27  ;;  %1849 = vrot.lane.b32.xlu1 %v1831_v34, %s3553_s19 }
 0x6c5   :  { %v2313_v8 = vpop.xlane.xlu0 %2312 }
 0x6c6   :  { %v2089_v51 = vmul.f32 %v4655_v53, %v4655_v53  ;;  %v2331_v54 = vmul.f32 0.03125, %v2313_v8  ;;  %v2058_v58 = vpop.xlane.xlu1 %2057  ;;  %v1816_v8 = vmul.f32 0.03125, %v1800_v7 }
 0x6c8   :  { %v4661_v9 = vsub.f32 %v4509_v46, %v2331_v54  ;;  %2107 = vrot.lane.b32.xlu1 %v2089_v51, %s3554_s8  ;;  %v1829_v51 = vmul.f32 %v4665_v17, %v4665_v17  ;;  %v4686_v7 = vsub.f32 %v4513_v63, %v1816_v8  ;;  %v3283_v8 = vld [vmem:[%s5503_s12] sm:$0xff]  }
 0x6c9   :  { %v2049_v1 = vpop.xlane.xlu0 %2048  ;;  %3232 = vmatprep.subr.bf16.mxu0 %v3283_v8 }
 0x6ca   :  { %v2347_v27 = vmul.f32 %v4661_v9, %v4661_v9  ;;  %v2071_v34 = vmul.f32 0.03125, %v2049_v1  ;;  %v2316_v14 = vpop.xlane.xlu1 %2315  ;;  %3233 = vmatpush3.bf16.msra.mxu0 %v3283_v8 }
 0x6cb   :  { %v2332_v31 = vmul.f32 0.03125, %v2316_v14 }
 0x6cc   :  { %v4670_v18 = vsub.f32 %v4529_v62, %v2071_v34  ;;  %2365 = vrot.lane.b32.xlu0 %v2347_v27, %s3552_s15  ;;  %v2074_v27 = vmul.f32 0.03125, %v2058_v58 }
 0x6cd   :  { %v2307_v46 = vpop.xlane.xlu0 %2306  ;;  %v4678_v54 = vsub.f32 %v4513_v63, %v2332_v31 }
 0x6ce   :  { %v2087_v55 = vmul.f32 %v4670_v18, %v4670_v18  ;;  %v2329_v59 = vmul.f32 0.03125, %v2307_v46  ;;  %v2052_v1 = vpop.xlane.xlu1 %2051  ;;  %v4706_v16 = vsub.f32 %v4513_v63, %v2074_v27 }
 0x6cf   :  { %v2348_v31 = vmul.f32 %v4678_v54, %v4678_v54 }
 0x6d0   :  { %v4681_v14 = vsub.f32 %v4529_v62, %v2329_v59  ;;  %1845 = vrot.lane.b32.xlu0 %v1829_v51, %s3553_s19  ;;  %2103 = vrot.lane.b32.xlu1 %v2087_v55, %s3554_s8  ;;  %v1832_v55 = vmul.f32 %v4686_v7, %v4686_v7 }
 0x6d1   :  { %v1794_v34 = vpop.xlane.xlu0 %1793 }
 0x6d2   :  { %v2345_v59 = vmul.f32 %v4681_v14, %v4681_v14  ;;  %v1814_v62 = vmul.f32 0.03125, %v1794_v34  ;;  %v2310_v46 = vpop.xlane.xlu1 %2309 }
 0x6d3   :  { %v2330_v51 = vmul.f32 0.03125, %v2310_v46  ;;  %v2072_v46 = vmul.f32 0.03125, %v2052_v1 }
 0x6d4   :  { %v4699_v58 = vsub.f32 %v4533_v21, %v1814_v62  ;;  %2367 = vrot.lane.b32.xlu1 %v2348_v31, %s3552_s15  ;;  %2361 = vrot.lane.b32.xlu0 %v2345_v59, %s3552_s15  ;;  %v2090_v31 = vmul.f32 %v4706_v16, %v4706_v16 }
 0x6d5   :  { %v1809_v34 = vpop.xlane.xlu0 %1808  ;;  %v4711_v22 = vsub.f32 %v4533_v21, %v2330_v51  ;;  %v4718_v49 = vsub.f32 %v4533_v21, %v2072_v46 }
 0x6d6   :  { %v1830_v41 = vmul.f32 %v4699_v58, %v4699_v58  ;;  %v1819_v62 = vmul.f32 0.03125, %v1809_v34 }
 0x6d7   :  { %v2346_v1 = vmul.f32 %v4711_v22, %v4711_v22  ;;  %v2088_v51 = vmul.f32 %v4718_v49, %v4718_v49 }
 0x6d8   :  { %1851 = vrot.lane.b32.xlu0 %v1832_v55, %s3553_s19  ;;  %1847 = vrot.lane.b32.xlu1 %v1830_v41, %s3553_s19  ;;  %v4723_v27 = vsub.f32 %v4549_v12, %v1819_v62 }
 0x6d9   :  { %v2067_v63 = vpop.xlane.xlu0 %2066 }
 0x6da   :  { %v2077_v59 = vmul.f32 0.03125, %v2067_v63  ;;  %v1835_v8 = vmul.f32 %v4723_v27, %v4723_v27 }
 0x6dc   :  { %2109 = vrot.lane.b32.xlu0 %v2090_v31, %s3554_s8  ;;  %2363 = vrot.lane.b32.xlu1 %v2346_v1, %s3552_s15  ;;  %v4732_v21 = vsub.f32 %v4549_v12, %v2077_v59  ;;  %v1812_v31 = vpop.xlane.xlu1 %1811 }
 0x6dd   :  { %v2325_v41 = vpop.xlane.xlu0 %2324  ;;  %v1820_v35 = vmul.f32 0.03125, %v1812_v31 }
 0x6de   :  { %v2335_v55 = vmul.f32 0.03125, %v2325_v41  ;;  %v2093_v46 = vmul.f32 %v4732_v21, %v4732_v21 }
 0x6e0   :  { %v4735_v34 = vsub.f32 %v4549_v12, %v2335_v55  ;;  %2105 = vrot.lane.b32.xlu0 %v2088_v51, %s3554_s8  ;;  %1857 = vrot.lane.b32.xlu1 %v1835_v8, %s3553_s19  ;;  %v2070_v63 = vpop.xlane.xlu1 %2069 }
 0x6e1   :  { %v2078_v0 = vmul.f32 0.03125, %v2070_v63 }
 0x6e2   :  { %v2351_v62 = vmul.f32 %v4735_v34, %v4735_v34 }
 0x6e4   :  { %2115 = vrot.lane.b32.xlu0 %v2093_v46, %s3554_s8  ;;  %2373 = vrot.lane.b32.xlu1 %v2351_v62, %s3552_s15  ;;  %v2328_v1 = vpop.xlane.xlu1 %2327 }
 0x6e5   :  { %v2336_v20 = vmul.f32 0.03125, %v2328_v1 }
 0x70b   :  { %v1806_v59 = vpop.xlane.xlu1 %1805 }
 0x70c   :  { %v1803_v41 = vpop.xlane.xlu0 %1802  ;;  %v1818_v63 = vmul.f32 0.03125, %v1806_v59 }
 0x70d   :  { %v1817_v55 = vmul.f32 0.03125, %v1803_v41  ;;  %v4755_v41 = vsub.f32 %v4553_v3, %v1820_v35 }
 0x70e   :  { %v4780_v59 = vsub.f32 %v4573_v43, %v1818_v63 }
 0x70f   :  { %v4746_v51 = vsub.f32 %v4569_v44, %v1817_v55  ;;  %v2064_v8 = vpop.xlane.xlu1 %2063  ;;  %v1836_v4 = vmul.f32 %v4755_v41, %v4755_v41 }
 0x710   :  { %v2061_v57 = vpop.xlane.xlu0 %2060  ;;  %v2076_v13 = vmul.f32 0.03125, %v2064_v8 }
 0x711   :  { %v1833_v11 = vmul.f32 %v4746_v51, %v4746_v51  ;;  %v2075_v30 = vmul.f32 0.03125, %v2061_v57 }
 0x713   :  { %v4751_v46 = vsub.f32 %v4569_v44, %v2075_v30  ;;  %v2322_v62 = vpop.xlane.xlu1 %2321  ;;  %1853 = vrot.lane.b32.xlu1 %v1833_v11, %s3553_s19  ;;  %v4764_v30 = vsub.f32 %v4553_v3, %v2078_v0  ;;  %v4767_v11 = vsub.f32 %v4553_v3, %v2336_v20 }
 0x714   :  { %v2319_v19 = vpop.xlane.xlu0 %2318 }
 0x715   :  { %v2091_v55 = vmul.f32 %v4751_v46, %v4751_v46  ;;  %v2333_v31 = vmul.f32 0.03125, %v2319_v19  ;;  %v2094_v20 = vmul.f32 %v4764_v30, %v4764_v30  ;;  %v2352_v0 = vmul.f32 %v4767_v11, %v4767_v11 }
 0x717   :  { %v4760_v28 = vsub.f32 %v4569_v44, %v2333_v31  ;;  %v1608_v57 = vpop.xlane.xlu1 %1607  ;;  %2111 = vrot.lane.b32.xlu0 %v2091_v55, %s3554_s8  ;;  %v4783_v55 = vsub.f32 %v4573_v43, %v2076_v13 }
 0x718   :  { %v1624_v1 = vmul.f32 0.03125, %v1608_v57  ;;  %v1605_v35 = vpop.xlane.xlu0 %1604  ;;  %v2334_v57 = vmul.f32 0.03125, %v2322_v62 }
 0x719   :  { %v2349_v19 = vmul.f32 %v4760_v28, %v4760_v28  ;;  %v1623_v31 = vmul.f32 0.03125, %v1605_v35  ;;  %5537 = vst [vmem:[#allocation30_spill] sm:$0xff] %v4783_v55  ;;  %v1834_v35 = vmul.f32 %v4780_v59, %v4780_v59  ;;  %v2092_v63 = vmul.f32 %v4783_v55, %v4783_v55 }
 0x71a   :  { %v1632_v36 = vadd.f32 1e-06, %v1624_v1 }
 0x71b   :  { %v1631_v2 = vadd.f32 1e-06, %v1623_v31  ;;  %1859 = vrot.lane.b32.xlu0 %v1836_v4, %s3553_s19  ;;  %2369 = vrot.lane.b32.xlu1 %v2349_v19, %s3552_s15 }
 0x71c   :  { %3412 = vrsqrt.f32 %v1632_v36  ;;  %v1599_v8 = vpop.xlane.xlu0 %1598  ;;  %v4792_v36 = vsub.f32 %v4573_v43, %v2334_v57 }
 0x71d   :  { %3414 = vrsqrt.f32 %v1631_v2  ;;  %v1621_v1 = vmul.f32 0.03125, %v1599_v8 }
 0x71e   :  { %5538 = vst [vmem:[#allocation31_spill] sm:$0xff] %v4792_v36  ;;  %v2350_v2 = vmul.f32 %v4792_v36, %v4792_v36 }
 0x71f   :  { %v1629_v4 = vadd.f32 1e-06, %v1621_v1  ;;  %2375 = vrot.lane.b32.xlu0 %v2352_v0, %s3552_s15  ;;  %2117 = vrot.lane.b32.xlu1 %v2094_v20, %s3554_s8 }
 0x720   :  { %v1602_v19 = vpop.xlane.xlu0 %1601 }
 0x721   :  { %3416 = vrsqrt.f32 %v1629_v4  ;;  %v1622_v13 = vmul.f32 0.03125, %v1602_v19 }
 0x723   :  { %v1630_v62 = vadd.f32 1e-06, %v1622_v13  ;;  %1855 = vrot.lane.b32.xlu0 %v1834_v35, %s3553_s19  ;;  %2113 = vrot.lane.b32.xlu1 %v2092_v63, %s3554_s8 }
 0x725   :  { %3418 = vrsqrt.f32 %v1630_v62 }
 0x727   :  { %2371 = vrot.lane.b32.xlu0 %v2350_v2, %s3552_s15 }
 0x729   :  { %v3413_v31 = vpop.eup %3412 }
 0x72a   :  { %v3415_v20 = vpop.eup %3414  ;;  %v1648_v0 = vmul.f32 %v3413_v31, %v4618_v29 }
 0x72b   :  { %v1647_v8 = vmul.f32 %v3415_v20, %v4622_v39 }
 0x72c   :  { %v1662_v57 = vmul.f32 %v4438_v24, %v1648_v0 }
 0x72d   :  { %v1661_v1 = vmul.f32 %v4438_v24, %v1647_v8 }
 0x72e   :  { %v3417_v4 = vpop.eup %3416  ;;  %v4804_v35 = vadd.f32 %v4431_v61, %v1662_v57 }
 0x72f   :  { %v4807_v19 = vadd.f32 %v4431_v61, %v1661_v1  ;;  %v1645_v63 = vmul.f32 %v3417_v4, %v4629_v42 }
 0x730   :  { %v1684_v13 = vmul.f32 %v4804_v35, %v4804_v35 }
 0x731   :  { %v1683_v29 = vmul.f32 %v4807_v19, %v4807_v19  ;;  %v1659_v39 = vmul.f32 %v4438_v24, %v1645_v63 }
 0x732   :  { %v3419_v62 = vpop.eup %3418  ;;  %v1692_v2 = vmul.f32 %v1684_v13, %v4804_v35 }
 0x733   :  { %v1691_v31 = vmul.f32 %v1683_v29, %v4807_v19  ;;  %v1646_v20 = vmul.f32 %v3419_v62, %v4636_v5  ;;  %v4819_v0 = vadd.f32 %v4431_v61, %v1659_v39 }
 0x734   :  { %v1700_v8 = vmul.f32 0.044715, %v1692_v2 }
 0x735   :  { %v1699_v42 = vmul.f32 0.044715, %v1691_v31  ;;  %v1660_v57 = vmul.f32 %v4438_v24, %v1646_v20  ;;  %v1681_v1 = vmul.f32 %v4819_v0, %v4819_v0 }
 0x736   :  { %v1708_v4 = vadd.f32 %v1700_v8, %v4804_v35  ;;  %v1850_v32 = vpop.permute.xlu1 %1849 }
 0x737   :  { %v1674_v63 = vadd.f32 %v4431_v61, %v1660_v57  ;;  %v1689_v13 = vmul.f32 %v1681_v1, %v4819_v0  ;;  %v1707_v29 = vadd.f32 %v1699_v42, %v4807_v19  ;;  %v1875_v42 = vsel %vm87_vm0, %v1850_v32, 0.0 }
 0x738   :  { %v1716_v5 = vmul.f32 0.7978846, %v1708_v4 }
 0x739   :  { %v1682_v62 = vmul.f32 %v1674_v63, %v1674_v63  ;;  %v1697_v39 = vmul.f32 0.044715, %v1689_v13  ;;  %v1715_v60 = vmul.f32 0.7978846, %v1707_v29 }
 0x73a   :  { %3420 = vtanh.f32 %v1716_v5  ;;  %v2108_v33 = vpop.permute.xlu1 %2107 }
 0x73b   :  { %v1690_v2 = vmul.f32 %v1682_v62, %v1674_v63  ;;  %v1705_v31 = vadd.f32 %v1697_v39, %v4819_v0  ;;  %3422 = vtanh.f32 %v1715_v60  ;;  %v2133_v62 = vsel %vm87_vm0, %v2108_v33, 0.0 }
 0x73d   :  { %v1698_v20 = vmul.f32 0.044715, %v1690_v2  ;;  %v1713_v15 = vmul.f32 0.7978846, %v1705_v31 }
 0x73e   :  { %v2366_v8 = vpop.permute.xlu0 %2365 }
 0x73f   :  { %v1706_v56 = vadd.f32 %v1698_v20, %v1674_v63  ;;  %3424 = vtanh.f32 %v1713_v15  ;;  %v2391_v4 = vsel %vm87_vm0, %v2366_v8, 0.0 }
 0x741   :  { %v1714_v57 = vmul.f32 0.7978846, %v1706_v56 }
 0x742   :  { %v2104_v1 = vpop.permute.xlu1 %2103  ;;  %v1846_v23 = vpop.permute.xlu0 %1845 }
 0x743   :  { %3426 = vtanh.f32 %v1714_v57  ;;  %v1869_v39 = vsel %vm87_vm0, %v1846_v23, 0.0  ;;  %v2127_v32 = vsel %vm87_vm0, %v2104_v1, 0.0 }
 0x746   :  { %v2368_v13 = vpop.permute.xlu1 %2367  ;;  %1876 = vadd.xlane.f32.xlu0 %v1875_v42  ;;  %v2362_v29 = vpop.permute.xlu0 %2361 }
 0x747   :  { %2392 = vadd.xlane.f32.xlu1 %v2391_v4  ;;  %v3421_v5 = vpop.eup %3420  ;;  %v2385_v57 = vsel %vm87_vm0, %v2362_v29, 0.0 }
 0x748   :  { %v3423_v60 = vpop.eup %3422  ;;  %v1732_v20 = vadd.f32 1.0, %v3421_v5 }
 0x749   :  { %v1731_v31 = vadd.f32 1.0, %v3423_v60 }
 0x74a   :  { %v1848_v2 = vpop.permute.xlu1 %1847  ;;  %2134 = vadd.xlane.f32.xlu0 %v2133_v62  ;;  %v1852_v56 = vpop.permute.xlu0 %1851  ;;  %v1740_v36 = vmul.f32 0.5, %v1732_v20 }
 0x74b   :  { %1870 = vadd.xlane.f32.xlu1 %v1869_v39  ;;  %v1739_v33 = vmul.f32 0.5, %v1731_v31  ;;  %v1872_v23 = vsel %vm87_vm0, %v1848_v2, 0.0  ;;  %v1878_v39 = vsel %vm87_vm0, %v1852_v56, 0.0 }
 0x74c   :  { %v3425_v15 = vpop.eup %3424 }
 0x74d   :  { %v1729_v8 = vadd.f32 1.0, %v3425_v15  ;;  %v1747_v29 = vmul.f32 %v1739_v33, %v4807_v19  ;;  %v1748_v15 = vmul.f32 %v1740_v36, %v4804_v35  ;;  %v1577_v19 = vmul.f32 0.03125, %v4647_v40 }
 0x74e   :  { %v2364_v42 = vpop.permute.xlu1 %2363  ;;  %2128 = vadd.xlane.f32.xlu0 %v2127_v32  ;;  %v2110_v4 = vpop.permute.xlu0 %2109  ;;  %v2394_v36 = vsel %vm87_vm0, %v2368_v13, 0.0 }
 0x74f   :  { %2386 = vadd.xlane.f32.xlu1 %v2385_v57  ;;  %v1737_v55 = vmul.f32 0.5, %v1729_v8  ;;  %v2136_v2 = vsel %vm87_vm0, %v2110_v4, 0.0  ;;  %v1754_v8 = vpack.c.bf16 %v1748_v15, %v1747_v29  ;;  %v2388_v13 = vsel %vm87_vm0, %v2364_v42, 0.0 }
 0x750   :  { %v3427_v52 = vpop.eup %3426 }
 0x751   :  { %v1730_v62 = vadd.f32 1.0, %v3427_v52  ;;  %v1745_v31 = vmul.f32 %v1737_v55, %v4819_v0  ;;  %v1578_v0 = vmul.f32 0.03125, %v4645_v47 }
 0x752   :  { %v1858_v60 = vpop.permute.xlu1 %1857  ;;  %1873 = vadd.xlane.f32.xlu0 %v1872_v23  ;;  %v2106_v5 = vpop.permute.xlu0 %2105 }
 0x753   :  { %1879 = vadd.xlane.f32.xlu1 %v1878_v39  ;;  %v1738_v1 = vmul.f32 0.5, %v1730_v62  ;;  %v1887_v32 = vsel %vm87_vm0, %v1858_v60, 0.0  ;;  %v2130_v4 = vsel %vm87_vm0, %v2106_v5, 0.0  ;;  %v4854_v40 = vsub.f32 %v4573_v43, %v1578_v0 }
 0x755   :  { %v1746_v20 = vmul.f32 %v1738_v1, %v1674_v63  ;;  %v4850_v63 = vsub.f32 %v4569_v44, %v1577_v19  ;;  %v1594_v47 = vmul.f32 %v4854_v40, %v4854_v40 }
 0x756   :  { %1888 = vadd.xlane.f32.xlu0 %v1887_v32  ;;  %v2116_v52 = vpop.permute.xlu0 %2115  ;;  %v2374_v35 = vpop.permute.xlu1 %2373 }
 0x757   :  { %2137 = vadd.xlane.f32.xlu1 %v2136_v2  ;;  %v1753_v56 = vpack.c.bf16 %v1746_v20, %v1745_v31  ;;  %v2145_v57 = vsel %vm87_vm0, %v2116_v52, 0.0  ;;  %v2403_v55 = vsel %vm87_vm0, %v2374_v35, 0.0  ;;  %v1593_v33 = vmul.f32 %v4850_v63, %v4850_v63 }
 0x758   :  { %v1612_v44 = vsel %vm87_vm0, %v1594_v47, 0.0  ;;  %v1579_v20 = vmul.f32 0.03125, %v4613_v26 }
 0x759   :  { %3234 = vmatprep.mubr.msk.bf16.mxu0 %vm87_vm0, %v1753_v56  ;;  %v1609_v23 = vsel %vm87_vm0, %v1593_v33, 0.0 }
 0x75a   :  { %3235 = vmatmul.mubr.msk.bf16.vlgmr.msra.gmra.mxu0 %vm87_vm0, %v1754_v8  ;;  %2146 = vadd.xlane.f32.xlu0 %v2145_v57  ;;  %v4874_v52 = vsub.f32 %v4549_v12, %v1579_v20  ;;  %v1580_v8 = vmul.f32 0.03125, %v4611_v37 }
 0x75b   :  { %2395 = vadd.xlane.f32.xlu1 %v2394_v36 }
 0x75e   :  { %2404 = vadd.xlane.f32.xlu0 %v2403_v55 }
 0x75f   :  { %2131 = vadd.xlane.f32.xlu1 %v2130_v4 }
 0x763   :  { %2389 = vadd.xlane.f32.xlu1 %v2388_v13 }
 0x767   :  { %1610 = vadd.xlane.f32.xlu1 %v1609_v23 }
 0x76b   :  { %1613 = vadd.xlane.f32.xlu1 %v1612_v44 }
 0x785   :  { %v1854_v62 = vpop.permute.xlu1 %1853 }
 0x786   :  { %v1881_v39 = vsel %vm87_vm0, %v1854_v62, 0.0 }
 0x787   :  { %1882 = vadd.xlane.f32.xlu0 %v1881_v39 }
 0x789   :  { %v2112_v43 = vpop.permute.xlu0 %2111 }
 0x78a   :  { %v2139_v2 = vsel %vm87_vm0, %v2112_v43, 0.0 }
 0x78d   :  { %v2370_v60 = vpop.permute.xlu1 %2369  ;;  %v1860_v42 = vpop.permute.xlu0 %1859 }
 0x78e   :  { %v1890_v5 = vsel %vm87_vm0, %v1860_v42, 0.0  ;;  %v2397_v56 = vsel %vm87_vm0, %v2370_v60, 0.0 }
 0x78f   :  { %1891 = vadd.xlane.f32.xlu1 %v1890_v5 }
 0x791   :  { %v2118_v1 = vpop.permute.xlu1 %2117  ;;  %v2376_v29 = vpop.permute.xlu0 %2375 }
 0x792   :  { %v2148_v15 = vsel %vm87_vm0, %v2118_v1, 0.0  ;;  %v2406_v57 = vsel %vm87_vm0, %v2376_v29, 0.0  ;;  %v4901_v29 = vld [vmem:[%s5501_s10] ss:$0 sm:$0xff] }
 0x793   :  { %2149 = vadd.xlane.f32.xlu1 %v2148_v15 }
 0x795   :  { %v1856_v32 = vpop.permute.xlu0 %1855  ;;  %v2114_v19 = vpop.permute.xlu1 %2113 }
 0x796   :  { %v1884_v31 = vsel %vm87_vm0, %v1856_v32, 0.0  ;;  %v2142_v12 = vsel %vm87_vm0, %v2114_v19, 0.0 }
 0x797   :  { %1885 = vadd.xlane.f32.xlu1 %v1884_v31 }
 0x799   :  { %v2372_v36 = vpop.permute.xlu0 %2371 }
 0x79a   :  { %v2400_v13 = vsel %vm87_vm0, %v2372_v36, 0.0 }
 0x79d   :  { %2183 = vrot.lane.b32.xlu0 %v4438_v24, %s3554_s8  ;;  %v1595_v24 = vmul.f32 %v4874_v52, %v4874_v52 }
 0x79f   :  { %v1615_v26 = vsel %vm87_vm0, %v1595_v24, 0.0 }
 0x7a8   :  { %2194 = vrot.lane.b32.xlu1 %v4431_v61, %s3554_s8  ;;  %v4882_v61 = vsub.f32 %v4553_v3, %v1580_v8  ;;  %v4914_v8 = vld [vmem:[%s5500_s11] ss:$0 sm:$0xff] }
 0x7aa   :  { %v1596_v35 = vmul.f32 %v4882_v61, %v4882_v61 }
 0x7ac   :  { %v1618_v55 = vsel %vm87_vm0, %v1596_v35, 0.0 }
 0x7bc   :  { %2140 = vadd.xlane.f32.xlu0 %v2139_v2 }
 0x7c0   :  { %2398 = vadd.xlane.f32.xlu0 %v2397_v56 }
 0x7c4   :  { %2407 = vadd.xlane.f32.xlu0 %v2406_v57 }
 0x7c8   :  { %1616 = vadd.xlane.f32.xlu0 %v1615_v26 }
 0x7cc   :  { %2143 = vadd.xlane.f32.xlu1 %v2142_v12 }
 0x7cf   :  { %v1877_v37 = vpop.xlane.xlu0 %1876 }
 0x7d0   :  { %v1895_v0 = vmul.f32 0.03125, %v1877_v37  ;;  %v4889_v4 = vpop.xlane.xlu1 %2392  ;;  %1619 = vadd.xlane.f32.xlu1 %v1618_v55 }
 0x7d2   :  { %v1903_v3 = vadd.f32 1e-06, %v1895_v0 }
 0x7d3   :  { %v4892_v33 = vpop.xlane.xlu0 %2134 }
 0x7d4   :  { %3428 = vrsqrt.f32 %v1903_v3  ;;  %v1871_v23 = vpop.xlane.xlu1 %1870  ;;  %2401 = vadd.xlane.f32.xlu1 %v2400_v13 }
 0x7d5   :  { %v1893_v47 = vmul.f32 0.03125, %v1871_v23 }
 0x7d7   :  { %v1901_v44 = vadd.f32 1e-06, %v1893_v47  ;;  %v4894_v62 = vpop.xlane.xlu0 %2128 }
 0x7d8   :  { %v4896_v39 = vpop.xlane.xlu1 %2386 }
 0x7d9   :  { %3430 = vrsqrt.f32 %v1901_v44 }
 0x7db   :  { %v1874_v43 = vpop.xlane.xlu0 %1873 }
 0x7dc   :  { %v1894_v60 = vmul.f32 0.03125, %v1874_v43  ;;  %v1880_v42 = vpop.xlane.xlu1 %1879 }
 0x7dd   :  { %v1896_v5 = vmul.f32 0.03125, %v1880_v42 }
 0x7de   :  { %v1902_v1 = vadd.f32 1e-06, %v1894_v60  ;;  %2441 = vrot.lane.b32.xlu0 %v4901_v29, %s3553_s19 }
 0x7df   :  { %v1904_v15 = vadd.f32 1e-06, %v1896_v5 }
 0x7e0   :  { %3432 = vrsqrt.f32 %v1902_v1  ;;  %v4905_v32 = vpop.xlane.xlu1 %2137 }
 0x7e1   :  { %v3429_v31 = vpop.eup %3428  ;;  %3434 = vrsqrt.f32 %v1904_v15 }
 0x7e2   :  { %v1919_v20 = vmul.f32 %v3429_v31, %v4650_v10 }
 0x7e4   :  { %v1930_v2 = vmul.f32 %v4585_v38, %v1919_v20  ;;  %v4909_v56 = vpop.xlane.xlu1 %2395 }
 0x7e5   :  { %2452 = vrot.lane.b32.xlu1 %v4914_v8, %s3553_s19 }
 0x7e6   :  { %v3431_v57 = vpop.eup %3430  ;;  %v4919_v24 = vadd.f32 %v4587_v25, %v1930_v2 }
 0x7e7   :  { %v1917_v26 = vmul.f32 %v3431_v57, %v4665_v17  ;;  %v1889_v57 = vpop.xlane.xlu0 %1888 }
 0x7e8   :  { %v4922_v19 = vpop.xlane.xlu1 %2131  ;;  %v1949_v10 = vmul.f32 %v4919_v24, %v4919_v24 }
 0x7e9   :  { %v1928_v12 = vmul.f32 %v4585_v38, %v1917_v26 }
 0x7ea   :  { %v1957_v37 = vmul.f32 %v1949_v10, %v4919_v24 }
 0x7eb   :  { %v4928_v36 = vadd.f32 %v4587_v25, %v1928_v12 }
 0x7ec   :  { %v4930_v35 = vpop.xlane.xlu1 %2389  ;;  %v1965_v43 = vmul.f32 0.044715, %v1957_v37 }
 0x7ed   :  { %v3433_v55 = vpop.eup %3432  ;;  %v1947_v0 = vmul.f32 %v4928_v36, %v4928_v36 }
 0x7ee   :  { %v3435_v3 = vpop.eup %3434  ;;  %v1918_v17 = vmul.f32 %v3433_v55, %v4699_v58  ;;  %v1973_v2 = vadd.f32 %v1965_v43, %v4919_v24 }
 0x7ef   :  { %v1920_v13 = vmul.f32 %v3435_v3, %v4686_v7  ;;  %v1955_v23 = vmul.f32 %v1947_v0, %v4928_v36  ;;  %v1899_v3 = vmul.f32 0.03125, %v1889_v57 }
 0x7f0   :  { %v1929_v47 = vmul.f32 %v4585_v38, %v1918_v17  ;;  %v1611_v44 = vpop.xlane.xlu1 %1610 }
 0x7f1   :  { %v1931_v60 = vmul.f32 %v4585_v38, %v1920_v13  ;;  %v1625_v42 = vmul.f32 0.03125, %v1611_v44  ;;  %v1963_v5 = vmul.f32 0.044715, %v1955_v23  ;;  %v1981_v13 = vmul.f32 0.7978846, %v1973_v2 }
 0x7f2   :  { %v4941_v1 = vadd.f32 %v4587_v25, %v1929_v47  ;;  %v1907_v43 = vadd.f32 1e-06, %v1899_v3  ;;  %v2151_v2 = vmul.f32 0.03125, %v4894_v62 }
 0x7f3   :  { %v1633_v15 = vadd.f32 1e-06, %v1625_v42  ;;  %v1971_v31 = vadd.f32 %v1963_v5, %v4928_v36  ;;  %v4945_v58 = vadd.f32 %v4587_v25, %v1931_v60 }
 0x7f4   :  { %v1614_v7 = vpop.xlane.xlu1 %1613  ;;  %v1948_v20 = vmul.f32 %v4941_v1, %v4941_v1 }
 0x7f5   :  { %3436 = vrsqrt.f32 %v1633_v15  ;;  %v1626_v26 = vmul.f32 0.03125, %v1614_v7  ;;  %v1979_v10 = vmul.f32 0.7978846, %v1971_v31  ;;  %v1950_v12 = vmul.f32 %v4945_v58, %v4945_v58  ;;  %v2147_v7 = vpop.xlane.xlu0 %2146 }
 0x7f6   :  { %v1956_v37 = vmul.f32 %v1948_v20, %v4941_v1  ;;  %v2153_v31 = vmul.f32 0.03125, %v4892_v33 }
 0x7f7   :  { %v1634_v55 = vadd.f32 1e-06, %v1626_v26  ;;  %v1958_v0 = vmul.f32 %v1950_v12, %v4945_v58  ;;  %3438 = vtanh.f32 %v1979_v10  ;;  %v2154_v10 = vmul.f32 0.03125, %v4905_v32 }
 0x7f8   :  { %v1964_v17 = vmul.f32 0.044715, %v1956_v37  ;;  %v2157_v12 = vmul.f32 0.03125, %v2147_v7 }
 0x7f9   :  { %3440 = vrsqrt.f32 %v1634_v55  ;;  %v1966_v23 = vmul.f32 0.044715, %v1958_v0  ;;  %v2161_v0 = vadd.f32 1e-06, %v2153_v31 }
 0x7fa   :  { %v1972_v47 = vadd.f32 %v1964_v17, %v4941_v1  ;;  %3442 = vtanh.f32 %v1981_v13  ;;  %v2159_v17 = vadd.f32 1e-06, %v2151_v2  ;;  %v2162_v13 = vadd.f32 1e-06, %v2154_v10 }
 0x7fb   :  { %v1974_v44 = vadd.f32 %v1966_v23, %v4945_v58  ;;  %v2152_v23 = vmul.f32 0.03125, %v4922_v19  ;;  %v2165_v32 = vadd.f32 1e-06, %v2157_v12 }
 0x7fc   :  { %v1980_v60 = vmul.f32 0.7978846, %v1972_v47 }
 0x7fd   :  { %v1982_v42 = vmul.f32 0.7978846, %v1974_v44  ;;  %v2160_v2 = vadd.f32 1e-06, %v2152_v23 }
 0x7fe   :  { %3444 = vtanh.f32 %v1980_v60  ;;  %v4973_v60 = vpop.xlane.xlu0 %2404 }
 0x7ff   :  { %3446 = vtanh.f32 %v1982_v42 }
 0x800   :  { %3448 = vrsqrt.f32 %v1907_v43 }
 0x801   :  { %3450 = vrsqrt.f32 %v2161_v0 }
 0x802   :  { %v3437_v5 = vpop.eup %3436  ;;  %3452 = vrsqrt.f32 %v2159_v17 }
 0x803   :  { %v1649_v15 = vmul.f32 %v3437_v5, %v4850_v63  ;;  %3454 = vrsqrt.f32 %v2162_v13 }
 0x804   :  { %v3439_v20 = vpop.eup %3438  ;;  %3456 = vrsqrt.f32 %v2165_v32 }
 0x805   :  { %v1663_v57 = vmul.f32 %v4901_v29, %v1649_v15  ;;  %v1995_v3 = vadd.f32 1.0, %v3439_v20  ;;  %3458 = vrsqrt.f32 %v2160_v2 }
 0x806   :  { %v3441_v26 = vpop.eup %3440 }
 0x807   :  { %v1650_v37 = vmul.f32 %v3441_v26, %v4854_v40  ;;  %v4963_v55 = vadd.f32 %v4914_v8, %v1663_v57  ;;  %v3443_v63 = vpop.eup %3442  ;;  %v2003_v5 = vmul.f32 0.5, %v1995_v3 }
 0x808   :  { %v1997_v15 = vadd.f32 1.0, %v3443_v63 }
 0x809   :  { %v1664_v33 = vmul.f32 %v4901_v29, %v1650_v37  ;;  %v1685_v62 = vmul.f32 %v4963_v55, %v4963_v55  ;;  %v2011_v3 = vmul.f32 %v2003_v5, %v4928_v36  ;;  %v4996_v5 = vld [vmem:[%s5505_s13] ss:$0 sm:$0xff] }
 0x80a   :  { %v2005_v17 = vmul.f32 0.5, %v1997_v15 }
 0x80b   :  { %v3445_v47 = vpop.eup %3444  ;;  %v4970_v44 = vadd.f32 %v4914_v8, %v1664_v33  ;;  %v1693_v40 = vmul.f32 %v1685_v62, %v4963_v55 }
 0x80c   :  { %v3447_v43 = vpop.eup %3446  ;;  %v1996_v42 = vadd.f32 1.0, %v3445_v47 }
 0x80d   :  { %v3449_v31 = vpop.eup %3448  ;;  %v1998_v7 = vadd.f32 1.0, %v3447_v43  ;;  %v1686_v19 = vmul.f32 %v4970_v44, %v4970_v44  ;;  %v1701_v20 = vmul.f32 0.044715, %v1693_v40 }
 0x80e   :  { %v2004_v57 = vmul.f32 0.5, %v1996_v42  ;;  %v1923_v37 = vmul.f32 %v3449_v31, %v4723_v27  ;;  %v2013_v27 = vmul.f32 %v2005_v17, %v4919_v24  ;;  %v4990_v42 = vld [vmem:[%s5504_s6] ss:$0 sm:$0xff]  ;;  %v3451_v24 = vpop.eup %3450 }
 0x80f   :  { %v2006_v26 = vmul.f32 0.5, %v1998_v7  ;;  %v1694_v10 = vmul.f32 %v1686_v19, %v4970_v44  ;;  %v1709_v12 = vadd.f32 %v1701_v20, %v4963_v55  ;;  %v3453_v7 = vpop.eup %3452  ;;  %v1294_v2 = vadd.f32 %v4442_v48, %v4990_v42 }
 0x810   :  { %v1883_v0 = vpop.xlane.xlu0 %1882  ;;  %v2012_v63 = vmul.f32 %v2004_v57, %v4941_v1  ;;  %v1934_v43 = vmul.f32 %v4585_v38, %v1923_v37  ;;  %v3455_v20 = vpop.eup %3454  ;;  %v1297_v48 = vadd.f32 %v4446_v6, %v4990_v42 }
 0x811   :  { %v1897_v33 = vmul.f32 0.03125, %v1883_v0  ;;  %v1702_v62 = vmul.f32 0.044715, %v1694_v10  ;;  %v1717_v47 = vmul.f32 0.7978846, %v1709_v12  ;;  %v2014_v23 = vmul.f32 %v2006_v26, %v4945_v58  ;;  %v3457_v10 = vpop.eup %3456 }
 0x812   :  { %v2019_v13 = vpack.c.bf16 %v2012_v63, %v2011_v3  ;;  %v4999_v15 = vadd.f32 %v4587_v25, %v1934_v43  ;;  %v1286_v12 = vadd.f32 %v4990_v42, %v4444_v50  ;;  %v2178_v6 = vmul.f32 %v3455_v20, %v4706_v16 }
 0x813   :  { %v1905_v32 = vadd.f32 1e-06, %v1897_v33  ;;  %v1710_v40 = vadd.f32 %v1702_v62, %v4970_v44  ;;  %3460 = vtanh.f32 %v1717_v47  ;;  %v2020_v1 = vpack.c.bf16 %v2014_v23, %v2013_v27 }
 0x814   :  { %2543 = vrot.lane.b32.xlu0 %v2019_v13, %s3553_s19  ;;  %v1953_v3 = vmul.f32 %v4999_v15, %v4999_v15  ;;  %v1289_v62 = vadd.f32 %v4990_v42, %v4448_v45  ;;  %v2177_v47 = vmul.f32 %v3451_v24, %v4655_v53  ;;  %v3459_v13 = vpop.eup %3458  ;;  %v5014_v23 = vpop.permute.xlu0 %2183 }
 0x815   :  { %3462 = vrsqrt.f32 %v1905_v32  ;;  %v1718_v36 = vmul.f32 0.7978846, %v1710_v40 }
 0x816   :  { %v1961_v53 = vmul.f32 %v1953_v3, %v4999_v15 }
 0x817   :  { %3464 = vtanh.f32 %v1718_v36 }
 0x818   :  { %v1892_v58 = vpop.xlane.xlu1 %1891  ;;  %2545 = vrot.lane.b32.xlu0 %v2020_v1, %s3553_s19  ;;  %v2175_v1 = vmul.f32 %v3453_v7, %v4670_v18  ;;  %v2176_v18 = vmul.f32 %v3459_v13, %v4718_v49 }
 0x819   :  { %v1900_v31 = vmul.f32 0.03125, %v1892_v58  ;;  %v2181_v58 = vmul.f32 %v3457_v10, %v4732_v21  ;;  %v2188_v21 = vmul.f32 %v5014_v23, %v2177_v47 }
 0x81a   :  { %v3236_v19 = vpop.f32.mrf.mxu0  ;;  %v2187_v13 = vmul.f32 %v5014_v23, %v2176_v18 }
 0x81b   :  { %v1908_v57 = vadd.f32 1e-06, %v1900_v31  ;;  %v2684_v26 = vadd.f32 %v3236_v19, %v4996_v5 }
 0x81c   :  { %v2675_v37 = vpop.f32.mrf.mxu0  ;;  %v2150_v0 = vpop.xlane.xlu1 %2149 }
 0x81d   :  { %3466 = vrsqrt.f32 %v1908_v57  ;;  %v2804_v63 = vadd.f32 %v2684_v26, %v1294_v2  ;;  %v2676_v17 = vadd.f32 %v4996_v5, %v2675_v37  ;;  %v2158_v33 = vmul.f32 0.03125, %v2150_v0 }
 0x81e   :  { %v3237_v50 = vpop.f32.mrf.mxu0 }
 0x81f   :  { %v3089_v32 = vpack.c.bf16 %v2804_v63, %v2804_v63  ;;  %v2802_v40 = vadd.f32 %v2676_v17, %v1286_v12  ;;  %v2166_v43 = vadd.f32 1e-06, %v2158_v33  ;;  %v2687_v27 = vadd.f32 %v3237_v50, %v4996_v5 }
 0x820   :  { %v3461_v36 = vpop.eup %3460  ;;  %v2678_v45 = vpop.f32.mrf.mxu0  ;;  %v2189_v12 = vmul.f32 %v5014_v23, %v2178_v6  ;;  %v2192_v63 = vmul.f32 %v5014_v23, %v2181_v58  ;;  %v2186_v17 = vmul.f32 %v5014_v23, %v2175_v1  ;;  %v1969_v1 = vmul.f32 0.044715, %v1961_v53 }
 0x821   :  { %v1886_v31 = vpop.xlane.xlu1 %1885  ;;  %2965 = vst.msk [vmem:[%s5506_s14 + $0x8] sm:$0xf] %vm2962_vm4, %v3089_v32  ;;  %v3087_v24 = vpack.c.bf16 %v2802_v40, %v2802_v40  ;;  %3468 = vrsqrt.f32 %v2166_v43  ;;  %v2805_v19 = vadd.f32 %v2687_v27, %v1297_v48  ;;  %v2679_v2 = vadd.f32 %v4996_v5, %v2678_v45 }
 0x822   :  { %v3463_v57 = vpop.eup %3462  ;;  %v1898_v16 = vmul.f32 0.03125, %v1886_v31  ;;  %v1733_v7 = vadd.f32 1.0, %v3461_v36 }
 0x823   :  { %v1921_v20 = vmul.f32 %v3463_v57, %v4746_v51  ;;  %2963 = vst.msk [vmem:[%s5506_s14] sm:$0xf] %vm2962_vm4, %v3087_v24  ;;  %v3090_v26 = vpack.c.bf16 %v2805_v19, %v2805_v19  ;;  %v2803_v10 = vadd.f32 %v2679_v2, %v1289_v62 }
 0x824   :  { %v3465_v37 = vpop.eup %3464  ;;  %v1906_v0 = vadd.f32 1e-06, %v1898_v16  ;;  %v1741_v49 = vmul.f32 0.5, %v1733_v7 }
 0x825   :  { %v5034_v3 = vpop.permute.xlu1 %2194  ;;  %v1932_v51 = vmul.f32 %v4585_v38, %v1921_v20  ;;  %2966 = vst.msk [vmem:[%s5506_s14 + $0xc] sm:$0xf] %vm2962_vm4, %v3090_v26  ;;  %v3088_v33 = vpack.c.bf16 %v2803_v10, %v2803_v10  ;;  %v1734_v48 = vadd.f32 1.0, %v3465_v37  ;;  %v1977_v26 = vadd.f32 %v1969_v1, %v4999_v15 }
 0x826   :  { %v5044_v62 = vadd.f32 %v5034_v3, %v2188_v21  ;;  %3470 = vrsqrt.f32 %v1906_v0  ;;  %v5047_v47 = vadd.f32 %v5034_v3, %v2189_v12  ;;  %v5050_v50 = vadd.f32 %v5034_v3, %v2192_v63 }
 0x827   :  { %2964 = vst.msk [vmem:[%s5506_s14 + $0x4] sm:$0xf] %vm2962_vm4, %v3088_v33  ;;  %v1742_v32 = vmul.f32 0.5, %v1734_v48  ;;  %v5060_v43 = vadd.f32 %v4587_v25, %v1932_v51  ;;  %v5063_v27 = vadd.f32 %v5034_v3, %v2186_v17  ;;  %v1749_v36 = vmul.f32 %v1741_v49, %v4963_v55 }
 0x828   :  { %v2207_v40 = vmul.f32 %v5044_v62, %v5044_v62  ;;  %v2208_v6 = vmul.f32 %v5047_v47, %v5047_v47  ;;  %v5069_v58 = vadd.f32 %v5034_v3, %v2187_v13  ;;  %v2211_v19 = vmul.f32 %v5050_v50, %v5050_v50 }
 0x829   :  { %v1750_v45 = vmul.f32 %v1742_v32, %v4970_v44  ;;  %v1951_v24 = vmul.f32 %v5060_v43, %v5060_v43  ;;  %v2205_v53 = vmul.f32 %v5063_v27, %v5063_v27  ;;  %v1985_v13 = vmul.f32 0.7978846, %v1977_v26 }
 0x82a   :  { %v2215_v31 = vmul.f32 %v2207_v40, %v5044_v62  ;;  %v3467_v2 = vpop.eup %3466  ;;  %v2216_v55 = vmul.f32 %v2208_v6, %v5047_v47  ;;  %v2206_v21 = vmul.f32 %v5069_v58, %v5069_v58  ;;  %v2219_v10 = vmul.f32 %v2211_v19, %v5050_v50 }
 0x82b   :  { %v1924_v57 = vmul.f32 %v3467_v2, %v4755_v41  ;;  %v1755_v18 = vpack.c.bf16 %v1750_v45, %v1749_v36  ;;  %v1959_v44 = vmul.f32 %v1951_v24, %v5060_v43  ;;  %v2213_v41 = vmul.f32 %v2205_v53, %v5063_v27 }
 0x82c   :  { %v2223_v16 = vmul.f32 0.044715, %v2215_v31  ;;  %v2224_v7 = vmul.f32 0.044715, %v2216_v55  ;;  %v2214_v51 = vmul.f32 %v2206_v21, %v5069_v58  ;;  %v2227_v32 = vmul.f32 0.044715, %v2219_v10 }
 0x82d   :  { %v1935_v20 = vmul.f32 %v4585_v38, %v1924_v57  ;;  %3238 = vmatprep.mubr.msk.bf16.mxu0 %vm87_vm0, %v1755_v18  ;;  %v1967_v17 = vmul.f32 0.044715, %v1959_v44  ;;  %v2221_v36 = vmul.f32 0.044715, %v2213_v41  ;;  %3472 = vtanh.f32 %v1985_v13 }
 0x82e   :  { %v3469_v12 = vpop.eup %3468  ;;  %v2231_v37 = vadd.f32 %v2223_v16, %v5044_v62  ;;  %v2232_v63 = vadd.f32 %v2224_v7, %v5047_v47  ;;  %v2222_v19 = vmul.f32 0.044715, %v2214_v51  ;;  %v2235_v53 = vadd.f32 %v2227_v32, %v5050_v50 }
 0x82f   :  { %v2182_v0 = vmul.f32 %v3469_v12, %v4764_v30  ;;  %v5092_v49 = vadd.f32 %v4587_v25, %v1935_v20  ;;  %v1975_v24 = vadd.f32 %v1967_v17, %v5060_v43  ;;  %v2229_v18 = vadd.f32 %v2221_v36, %v5063_v27 }
 0x830   :  { %v2239_v40 = vmul.f32 0.7978846, %v2231_v37  ;;  %v2240_v6 = vmul.f32 0.7978846, %v2232_v63  ;;  %v2230_v21 = vadd.f32 %v2222_v19, %v5069_v58  ;;  %v2243_v10 = vmul.f32 0.7978846, %v2235_v53 }
 0x831   :  { %v2193_v33 = vmul.f32 %v5014_v23, %v2182_v0  ;;  %v1954_v48 = vmul.f32 %v5092_v49, %v5092_v49  ;;  %v1983_v44 = vmul.f32 0.7978846, %v1975_v24  ;;  %v2237_v12 = vmul.f32 0.7978846, %v2229_v18 }
 0x832   :  { %3474 = vtanh.f32 %v2239_v40  ;;  %v2238_v0 = vmul.f32 0.7978846, %v2230_v21  ;;  %v2411_v17 = vmul.f32 0.03125, %v4889_v4  ;;  %v2409_v51 = vmul.f32 0.03125, %v4896_v39 }
 0x833   :  { %v3471_v1 = vpop.eup %3470  ;;  %v1962_v30 = vmul.f32 %v1954_v48, %v5092_v49  ;;  %v5101_v45 = vadd.f32 %v5034_v3, %v2193_v33  ;;  %3476 = vtanh.f32 %v2240_v6  ;;  %v2412_v48 = vmul.f32 0.03125, %v4909_v56 }
 0x834   :  { %v1922_v31 = vmul.f32 %v3471_v1, %v4780_v59  ;;  %v2419_v36 = vadd.f32 1e-06, %v2411_v17  ;;  %v2415_v1 = vmul.f32 0.03125, %v4973_v60  ;;  %v2417_v6 = vadd.f32 1e-06, %v2409_v51 }
 0x835   :  { %v1970_v2 = vmul.f32 0.044715, %v1962_v30  ;;  %v2212_v55 = vmul.f32 %v5101_v45, %v5101_v45  ;;  %v2420_v4 = vadd.f32 1e-06, %v2412_v48 }
 0x836   :  { %v1933_v57 = vmul.f32 %v4585_v38, %v1922_v31  ;;  %v2410_v31 = vmul.f32 0.03125, %v4930_v35 }
 0x837   :  { %v1978_v16 = vadd.f32 %v1970_v2, %v5092_v49  ;;  %v2220_v59 = vmul.f32 %v2212_v55, %v5101_v45  ;;  %v2423_v55 = vadd.f32 1e-06, %v2415_v1 }
 0x838   :  { %v5113_v7 = vadd.f32 %v4587_v25, %v1933_v57  ;;  %v2418_v57 = vadd.f32 1e-06, %v2410_v31 }
 0x839   :  { %v1986_v20 = vmul.f32 0.7978846, %v1978_v16  ;;  %v2228_v26 = vmul.f32 0.044715, %v2220_v59 }
 0x83a   :  { %v1952_v38 = vmul.f32 %v5113_v7, %v5113_v7  ;;  %v3473_v13 = vpop.eup %3472 }
 0x83b   :  { %3478 = vtanh.f32 %v1986_v20  ;;  %v2236_v37 = vadd.f32 %v2228_v26, %v5101_v45  ;;  %v2001_v19 = vadd.f32 1.0, %v3473_v13 }
 0x83c   :  { %v1960_v41 = vmul.f32 %v1952_v38, %v5113_v7  ;;  %3480 = vtanh.f32 %v1983_v44 }
 0x83d   :  { %v2244_v63 = vmul.f32 0.7978846, %v2236_v37  ;;  %3482 = vtanh.f32 %v2243_v10  ;;  %v2009_v44 = vmul.f32 0.5, %v2001_v19 }
 0x83e   :  { %v1968_v25 = vmul.f32 0.044715, %v1960_v41  ;;  %3484 = vtanh.f32 %v2237_v12 }
 0x83f   :  { %3486 = vtanh.f32 %v2244_v63  ;;  %v3475_v40 = vpop.eup %3474  ;;  %v2017_v63 = vmul.f32 %v2009_v44, %v4999_v15 }
 0x840   :  { %v1976_v33 = vadd.f32 %v1968_v25, %v5113_v7  ;;  %3488 = vtanh.f32 %v2238_v0  ;;  %v3477_v30 = vpop.eup %3476  ;;  %v2255_v2 = vadd.f32 1.0, %v3475_v40 }
 0x841   :  { %v2256_v53 = vadd.f32 1.0, %v3477_v30 }
 0x842   :  { %v1984_v32 = vmul.f32 0.7978846, %v1976_v33  ;;  %v2263_v20 = vmul.f32 0.5, %v2255_v2 }
 0x843   :  { %v2264_v38 = vmul.f32 0.5, %v2256_v53 }
 0x844   :  { %3490 = vtanh.f32 %v1984_v32  ;;  %v2271_v48 = vmul.f32 %v2263_v20, %v5044_v62 }
 0x845   :  { %v2141_v24 = vpop.xlane.xlu0 %2140  ;;  %3492 = vrsqrt.f32 %v2419_v36  ;;  %v2272_v40 = vmul.f32 %v2264_v38, %v5047_v47 }
 0x846   :  { %v2155_v39 = vmul.f32 0.03125, %v2141_v24  ;;  %3494 = vrsqrt.f32 %v2417_v6 }
 0x847   :  { %3496 = vrsqrt.f32 %v2420_v4 }
 0x848   :  { %v3479_v56 = vpop.eup %3478  ;;  %v2163_v18 = vadd.f32 1e-06, %v2155_v39  ;;  %v2278_v39 = vpack.c.bf16 %v2272_v40, %v2271_v48 }
 0x849   :  { %v3481_v16 = vpop.eup %3480  ;;  %v2399_v60 = vpop.xlane.xlu0 %2398  ;;  %v2002_v59 = vadd.f32 1.0, %v3479_v56 }
 0x84a   :  { %v3483_v21 = vpop.eup %3482  ;;  %3498 = vrsqrt.f32 %v2163_v18  ;;  %v2413_v35 = vmul.f32 0.03125, %v2399_v60  ;;  %v1999_v13 = vadd.f32 1.0, %v3481_v16 }
 0x84b   :  { %v3485_v26 = vpop.eup %3484  ;;  %3500 = vrsqrt.f32 %v2423_v55  ;;  %v2010_v10 = vmul.f32 0.5, %v2002_v59  ;;  %v2259_v17 = vadd.f32 1.0, %v3483_v21 }
 0x84c   :  { %v3487_v12 = vpop.eup %3486  ;;  %3502 = vrsqrt.f32 %v2418_v57  ;;  %v2421_v37 = vadd.f32 1e-06, %v2413_v35  ;;  %v2253_v1 = vadd.f32 1.0, %v3485_v26  ;;  %v2007_v19 = vmul.f32 0.5, %v1999_v13 }
 0x84d   :  { %v3489_v41 = vpop.eup %3488  ;;  %v2408_v0 = vpop.xlane.xlu0 %2407  ;;  %v2018_v25 = vmul.f32 %v2010_v10, %v5092_v49  ;;  %v2260_v51 = vadd.f32 1.0, %v3487_v12  ;;  %v2267_v4 = vmul.f32 0.5, %v2259_v17 }
 0x84e   :  { %3504 = vrsqrt.f32 %v2421_v37  ;;  %v2416_v33 = vmul.f32 0.03125, %v2408_v0  ;;  %v2254_v6 = vadd.f32 1.0, %v3489_v41  ;;  %v2261_v2 = vmul.f32 0.5, %v2253_v1 }
 0x84f   :  { %v2022_v32 = vpack.c.bf16 %v2018_v25, %v2017_v63  ;;  %v2268_v36 = vmul.f32 0.5, %v2260_v51  ;;  %v2275_v16 = vmul.f32 %v2267_v4, %v5050_v50  ;;  %v2015_v44 = vmul.f32 %v2007_v19, %v5060_v43 }
 0x850   :  { %v2424_v30 = vadd.f32 1e-06, %v2416_v33  ;;  %v2262_v56 = vmul.f32 0.5, %v2254_v6  ;;  %v2269_v20 = vmul.f32 %v2261_v2, %v5063_v27 }
 0x851   :  { %v3491_v31 = vpop.eup %3490  ;;  %2549 = vrot.lane.b32.xlu0 %v2022_v32, %s3553_s19  ;;  %v1617_v15 = vpop.xlane.xlu0 %1616  ;;  %v2276_v62 = vmul.f32 %v2268_v36, %v5101_v45 }
 0x852   :  { %3506 = vrsqrt.f32 %v2424_v30  ;;  %v1627_v49 = vmul.f32 0.03125, %v1617_v15  ;;  %v2000_v24 = vadd.f32 1.0, %v3491_v31  ;;  %v3493_v55 = vpop.eup %3492  ;;  %v2270_v37 = vmul.f32 %v2262_v56, %v5069_v58 }
 0x853   :  { %v3495_v57 = vpop.eup %3494  ;;  %v2280_v45 = vpack.c.bf16 %v2276_v62, %v2275_v16  ;;  %v2435_v58 = vmul.f32 %v3493_v55, %v4661_v9 }
 0x854   :  { %v1635_v53 = vadd.f32 1e-06, %v1627_v49  ;;  %v2008_v47 = vmul.f32 0.5, %v2000_v24  ;;  %v3497_v60 = vpop.eup %3496  ;;  %v2277_v25 = vpack.c.bf16 %v2270_v37, %v2269_v20  ;;  %v2433_v40 = vmul.f32 %v3495_v57, %v4681_v14 }
 0x855   :  { %v2144_v18 = vpop.xlane.xlu1 %2143  ;;  %2557 = vrot.lane.b32.xlu0 %v2278_v39, %s3554_s8  ;;  %v5142_v63 = vpop.permute.xlu0 %2441  ;;  %v2436_v33 = vmul.f32 %v3497_v60, %v4678_v54 }
 0x856   :  { %3508 = vrsqrt.f32 %v1635_v53  ;;  %v2156_v59 = vmul.f32 0.03125, %v2144_v18  ;;  %v2016_v21 = vmul.f32 %v2008_v47, %v5113_v7  ;;  %v2446_v9 = vmul.f32 %v5142_v63, %v2435_v58 }
 0x857   :  { %v3499_v35 = vpop.eup %3498  ;;  %v2447_v54 = vmul.f32 %v5142_v63, %v2436_v33  ;;  %v2444_v4 = vmul.f32 %v5142_v63, %v2433_v40 }
 0x858   :  { %v3501_v26 = vpop.eup %3500  ;;  %v2179_v10 = vmul.f32 %v3499_v35, %v4751_v46  ;;  %v2164_v38 = vadd.f32 1e-06, %v2156_v59  ;;  %v2021_v12 = vpack.c.bf16 %v2016_v21, %v2015_v44 }
 0x859   :  { %v3503_v41 = vpop.eup %3502  ;;  %v1620_v50 = vpop.xlane.xlu1 %1619  ;;  %2561 = vrot.lane.b32.xlu0 %v2280_v45, %s3554_s8  ;;  %v2439_v36 = vmul.f32 %v3501_v26, %v4735_v34 }
 0x85a   :  { %v2190_v0 = vmul.f32 %v5014_v23, %v2179_v10  ;;  %3510 = vrsqrt.f32 %v2164_v38  ;;  %v1628_v43 = vmul.f32 0.03125, %v1620_v50  ;;  %2547 = vrot.lane.b32.xlu1 %v2021_v12, %s3553_s19  ;;  %v2434_v1 = vmul.f32 %v3503_v41, %v4711_v22  ;;  %v5539_v38 = vld [vmem:[#allocation30_spill] sm:$0xff] }
 0x85b   :  { %v3505_v7 = vpop.eup %3504  ;;  %v2450_v15 = vmul.f32 %v5142_v63, %v2439_v36 }
 0x85c   :  { %v1636_v27 = vadd.f32 1e-06, %v1628_v43  ;;  %v5145_v46 = vadd.f32 %v5034_v3, %v2190_v0  ;;  %v2437_v17 = vmul.f32 %v3505_v7, %v4760_v28  ;;  %v2445_v14 = vmul.f32 %v5142_v63, %v2434_v1 }
 0x85d   :  { %v2402_v51 = vpop.xlane.xlu1 %2401 }
 0x85e   :  { %3512 = vrsqrt.f32 %v1636_v27  ;;  %v2414_v48 = vmul.f32 0.03125, %v2402_v51  ;;  %2555 = vrot.lane.b32.xlu1 %v2277_v25, %s3554_s8  ;;  %v2209_v13 = vmul.f32 %v5145_v46, %v5145_v46  ;;  %v5166_v34 = vmul.f32 %v5142_v63, %v2437_v17 }
 0x85f   :  { %v3507_v32 = vpop.eup %3506 }
 0x860   :  { %v2440_v28 = vmul.f32 %v3507_v32, %v4767_v11  ;;  %v2422_v30 = vadd.f32 1e-06, %v2414_v48  ;;  %v2217_v6 = vmul.f32 %v2209_v13, %v5145_v46 }
 0x861   :  { %v5160_v31 = vpop.permute.xlu1 %2452 }
 0x862   :  { %3514 = vrsqrt.f32 %v2422_v30  ;;  %v5169_v22 = vadd.f32 %v5160_v31, %v2446_v9  ;;  %v5172_v11 = vadd.f32 %v5160_v31, %v2447_v54  ;;  %v2451_v49 = vmul.f32 %v5142_v63, %v2440_v28 }
 0x863   :  { %v3509_v24 = vpop.eup %3508  ;;  %v5176_v19 = vadd.f32 %v5160_v31, %v2450_v15  ;;  %v2225_v39 = vmul.f32 0.044715, %v2217_v6  ;;  %v5179_v62 = vadd.f32 %v5160_v31, %v2444_v4  ;;  %v5182_v2 = vadd.f32 %v5160_v31, %v2445_v14 }
 0x864   :  { %v1651_v55 = vmul.f32 %v3509_v24, %v4874_v52  ;;  %v2465_v53 = vmul.f32 %v5169_v22, %v5169_v22  ;;  %v2466_v47 = vmul.f32 %v5172_v11, %v5172_v11  ;;  %v5190_v56 = vadd.f32 %v5160_v31, %v2451_v49 }
 0x865   :  { %v2469_v57 = vmul.f32 %v5176_v19, %v5176_v19  ;;  %v2233_v18 = vadd.f32 %v2225_v39, %v5145_v46  ;;  %v2463_v16 = vmul.f32 %v5179_v62, %v5179_v62  ;;  %v2464_v52 = vmul.f32 %v5182_v2, %v5182_v2  ;;  %v5540_v39 = vld [vmem:[#allocation31_spill] sm:$0xff] }
 0x866   :  { %v1665_v60 = vmul.f32 %v4901_v29, %v1651_v55  ;;  %v2473_v59 = vmul.f32 %v2465_v53, %v5169_v22  ;;  %v2474_v44 = vmul.f32 %v2466_v47, %v5172_v11  ;;  %v2470_v21 = vmul.f32 %v5190_v56, %v5190_v56 }
 0x867   :  { %v3511_v35 = vpop.eup %3510  ;;  %v2477_v45 = vmul.f32 %v2469_v57, %v5176_v19  ;;  %v2241_v20 = vmul.f32 0.7978846, %v2233_v18  ;;  %v2471_v26 = vmul.f32 %v2463_v16, %v5179_v62  ;;  %v2472_v10 = vmul.f32 %v2464_v52, %v5182_v2 }
 0x868   :  { %v2180_v12 = vmul.f32 %v3511_v35, %v5539_v38  ;;  %v2481_v37 = vmul.f32 0.044715, %v2473_v59  ;;  %v2482_v41 = vmul.f32 0.044715, %v2474_v44  ;;  %v2478_v50 = vmul.f32 %v2470_v21, %v5190_v56 }
 0x869   :  { %v2485_v0 = vmul.f32 0.044715, %v2477_v45  ;;  %3516 = vtanh.f32 %v2241_v20  ;;  %v5210_v43 = vadd.f32 %v4914_v8, %v1665_v60  ;;  %v2479_v7 = vmul.f32 0.044715, %v2471_v26 }
 0x86a   :  { %v2191_v27 = vmul.f32 %v5014_v23, %v2180_v12  ;;  %v2489_v25 = vadd.f32 %v2481_v37, %v5169_v22  ;;  %v2490_v58 = vadd.f32 %v2482_v41, %v5172_v11  ;;  %v2486_v17 = vmul.f32 0.044715, %v2478_v50 }
 0x86b   :  { %v3513_v51 = vpop.eup %3512  ;;  %v2493_v33 = vadd.f32 %v2485_v0, %v5176_v19  ;;  %v1687_v48 = vmul.f32 %v5210_v43, %v5210_v43  ;;  %v2480_v13 = vmul.f32 0.044715, %v2472_v10  ;;  %v2487_v32 = vadd.f32 %v2479_v7, %v5179_v62 }
 0x86c   :  { %v1652_v40 = vmul.f32 %v3513_v51, %v4882_v61  ;;  %v2497_v36 = vmul.f32 0.7978846, %v2489_v25  ;;  %v2498_v1 = vmul.f32 0.7978846, %v2490_v58  ;;  %v2494_v23 = vadd.f32 %v2486_v17, %v5190_v56 }
 0x86d   :  { %v2501_v9 = vmul.f32 0.7978846, %v2493_v33  ;;  %v5222_v28 = vadd.f32 %v5034_v3, %v2191_v27  ;;  %v1695_v30 = vmul.f32 %v1687_v48, %v5210_v43  ;;  %v2488_v54 = vadd.f32 %v2480_v13, %v5182_v2 }
 0x86e   :  { %v1666_v6 = vmul.f32 %v4901_v29, %v1652_v40  ;;  %3518 = vtanh.f32 %v2497_v36  ;;  %v2502_v15 = vmul.f32 0.7978846, %v2494_v23  ;;  %v2495_v4 = vmul.f32 0.7978846, %v2487_v32 }
 0x86f   :  { %v3515_v14 = vpop.eup %3514  ;;  %3520 = vtanh.f32 %v2498_v1  ;;  %v2210_v61 = vmul.f32 %v5222_v28, %v5222_v28  ;;  %v1703_v49 = vmul.f32 0.044715, %v1695_v30  ;;  %v2496_v24 = vmul.f32 0.7978846, %v2488_v54 }
 0x870   :  { %v2438_v55 = vmul.f32 %v3515_v14, %v5540_v39  ;;  %3522 = vtanh.f32 %v2501_v9  ;;  %v5231_v3 = vadd.f32 %v4914_v8, %v1666_v6  ;;  %v5235_v53 = vadd.f32 %v5160_v31, %v5166_v34 }
 0x871   :  { %3524 = vtanh.f32 %v2502_v15  ;;  %v2218_v29 = vmul.f32 %v2210_v61, %v5222_v28  ;;  %v1711_v47 = vadd.f32 %v1703_v49, %v5210_v43 }
 0x872   :  { %v2449_v57 = vmul.f32 %v5142_v63, %v2438_v55  ;;  %v1688_v18 = vmul.f32 %v5231_v3, %v5231_v3  ;;  %3526 = vtanh.f32 %v2495_v4  ;;  %v2467_v16 = vmul.f32 %v5235_v53, %v5235_v53 }
 0x873   :  { %v2226_v8 = vmul.f32 0.044715, %v2218_v29  ;;  %v1719_v52 = vmul.f32 0.7978846, %v1711_v47  ;;  %3528 = vtanh.f32 %v2496_v24 }
 0x874   :  { %v1696_v34 = vmul.f32 %v1688_v18, %v5231_v3  ;;  %v5246_v60 = vadd.f32 %v5160_v31, %v2449_v57  ;;  %v2475_v59 = vmul.f32 %v2467_v16, %v5235_v53 }
 0x875   :  { %v2234_v44 = vadd.f32 %v2226_v8, %v5222_v28  ;;  %3530 = vtanh.f32 %v1719_v52 }
 0x876   :  { %v3517_v63 = vpop.eup %3516  ;;  %v1704_v21 = vmul.f32 0.044715, %v1696_v34  ;;  %v2468_v35 = vmul.f32 %v5246_v60, %v5246_v60  ;;  %v2483_v45 = vmul.f32 0.044715, %v2475_v59 }
 0x877   :  { %v2242_v20 = vmul.f32 0.7978846, %v2234_v44  ;;  %v2257_v61 = vadd.f32 1.0, %v3517_v63 }
 0x878   :  { %v1712_v26 = vadd.f32 %v1704_v21, %v5231_v3  ;;  %v2476_v10 = vmul.f32 %v2468_v35, %v5246_v60  ;;  %v2491_v38 = vadd.f32 %v2483_v45, %v5235_v53 }
 0x879   :  { %3532 = vtanh.f32 %v2242_v20  ;;  %v2265_v57 = vmul.f32 0.5, %v2257_v61 }
 0x87a   :  { %v1720_v31 = vmul.f32 0.7978846, %v1712_v26  ;;  %v2484_v12 = vmul.f32 0.044715, %v2476_v10  ;;  %v2499_v37 = vmul.f32 0.7978846, %v2491_v38 }
 0x87b   :  { %v3519_v41 = vpop.eup %3518 }
 0x87c   :  { %v3521_v50 = vpop.eup %3520  ;;  %v2513_v0 = vadd.f32 1.0, %v3519_v41  ;;  %3534 = vtanh.f32 %v1720_v31  ;;  %v2492_v7 = vadd.f32 %v2484_v12, %v5246_v60 }
 0x87d   :  { %v3523_v27 = vpop.eup %3522  ;;  %v2514_v25 = vadd.f32 1.0, %v3521_v50  ;;  %3536 = vtanh.f32 %v2499_v37 }
 0x87e   :  { %v3525_v58 = vpop.eup %3524  ;;  %v2521_v17 = vmul.f32 0.5, %v2513_v0  ;;  %v2517_v51 = vadd.f32 1.0, %v3523_v27  ;;  %v2500_v33 = vmul.f32 0.7978846, %v2492_v7 }
 0x87f   :  { %v3527_v48 = vpop.eup %3526  ;;  %v2522_v13 = vmul.f32 0.5, %v2514_v25  ;;  %v2518_v32 = vadd.f32 1.0, %v3525_v58  ;;  %v5541_v58 = vld [vmem:[#allocation2_spill] sm:$0xff] }
 0x880   :  { %v3529_v40 = vpop.eup %3528  ;;  %v2529_v36 = vmul.f32 %v2521_v17, %v5169_v22  ;;  %v2511_v1 = vadd.f32 1.0, %v3527_v48  ;;  %3538 = vtanh.f32 %v2500_v33  ;;  %v2525_v9 = vmul.f32 0.5, %v2517_v51  ;;  %v5542_v48 = vld [vmem:[#allocation3_spill] sm:$0xff] }
 0x881   :  { %v2530_v23 = vmul.f32 %v2522_v13, %v5172_v11  ;;  %v2526_v30 = vmul.f32 0.5, %v2518_v32  ;;  %v2512_v54 = vadd.f32 1.0, %v3529_v40  ;;  %v1310_v17 = vadd.f32 %v5541_v58, %v4990_v42 }
 0x882   :  { %v2519_v6 = vmul.f32 0.5, %v2511_v1  ;;  %v3531_v15 = vpop.eup %3530  ;;  %v2533_v22 = vmul.f32 %v2525_v9, %v5176_v19  ;;  %v1302_v13 = vadd.f32 %v4990_v42, %v5542_v48  ;;  %v5543_v1 = vld [vmem:[#allocation4_spill] sm:$0xff] }
 0x883   :  { %v2536_v4 = vpack.c.bf16 %v2530_v23, %v2529_v36  ;;  %v2534_v14 = vmul.f32 %v2526_v30, %v5190_v56  ;;  %v2520_v49 = vmul.f32 0.5, %v2512_v54  ;;  %v1735_v11 = vadd.f32 1.0, %v3531_v15  ;;  %v5544_v15 = vld [vmem:[#allocation5_spill] sm:$0xff] }
 0x884   :  { %v2527_v24 = vmul.f32 %v2519_v6, %v5179_v62  ;;  %v2273_v62 = vmul.f32 %v2265_v57, %v5145_v46  ;;  %v1313_v23 = vadd.f32 %v5543_v1, %v4990_v42  ;;  %v5546_v57 = vld [vmem:[#allocation7_spill] sm:$0xff] }
 0x885   :  { %2569 = vrot.lane.b32.xlu0 %v2536_v4, %s3552_s15  ;;  %v2528_v39 = vmul.f32 %v2520_v49, %v5182_v2  ;;  %v2538_v29 = vpack.c.bf16 %v2534_v14, %v2533_v22  ;;  %v1743_v34 = vmul.f32 0.5, %v1735_v11  ;;  %v1305_v4 = vadd.f32 %v4990_v42, %v5544_v15  ;;  %v5545_v22 = vld [vmem:[#allocation6_spill] sm:$0xff] }
 0x886   :  { %v3533_v55 = vpop.eup %3532  ;;  %v2544_v38 = vpop.permute.xlu0 %2543 }
 0x887   :  { %v2258_v47 = vadd.f32 1.0, %v3533_v55  ;;  %v2535_v18 = vpack.c.bf16 %v2528_v39, %v2527_v24  ;;  %v1751_v21 = vmul.f32 %v1743_v34, %v5210_v43  ;;  %v1326_v39 = vadd.f32 %v5545_v22, %v4990_v42  ;;  %v5547_v34 = vld [vmem:[#allocation8_spill] sm:$0xff] }
 0x889   :  { %v3535_v16 = vpop.eup %3534  ;;  %2573 = vrot.lane.b32.xlu0 %v2538_v29, %s3552_s15  ;;  %v2266_v56 = vmul.f32 0.5, %v2258_v47 }
 0x88a   :  { %v3537_v8 = vpop.eup %3536  ;;  %v1736_v52 = vadd.f32 1.0, %v3535_v16 }
 0x88b   :  { %v2274_v59 = vmul.f32 %v2266_v56, %v5222_v28  ;;  %v2515_v19 = vadd.f32 1.0, %v3537_v8 }
 0x88c   :  { %v1744_v44 = vmul.f32 0.5, %v1736_v52 }
 0x88d   :  { %v3539_v2 = vpop.eup %3538  ;;  %v2279_v63 = vpack.c.bf16 %v2274_v59, %v2273_v62  ;;  %v2523_v20 = vmul.f32 0.5, %v2515_v19  ;;  %v1329_v62 = vadd.f32 %v5547_v34, %v4990_v42 }
 0x88e   :  { %v1752_v35 = vmul.f32 %v1744_v44, %v5231_v3  ;;  %v2516_v45 = vadd.f32 1.0, %v3539_v2  ;;  %v2546_v3 = vpop.permute.xlu0 %2545 }
 0x88f   :  { %2559 = vrot.lane.b32.xlu1 %v2279_v63, %s3554_s8  ;;  %v2531_v46 = vmul.f32 %v2523_v20, %v5235_v53  ;;  %v5548_v63 = vld [vmem:[#allocation9_spill] sm:$0xff] }
 0x890   :  { %v1756_v26 = vpack.c.bf16 %v1752_v35, %v1751_v21  ;;  %v2524_v10 = vmul.f32 0.5, %v2516_v45  ;;  %v1321_v21 = vadd.f32 %v4990_v42, %v5548_v63 }
 0x892   :  { %3239 = vmatmul.mubr.msk.bf16.gmra.mxu0 %vm87_vm0, %v1756_v26  ;;  %v2532_v28 = vmul.f32 %v2524_v10, %v5246_v60 }
 0x893   :  { %2567 = vrot.lane.b32.xlu1 %v2535_v18, %s3552_s15  ;;  %3242 = vmatprep.mubr.msk.bf16.mxu0 %vm87_vm0, %v2544_v38  ;;  %v1318_v18 = vadd.f32 %v4990_v42, %v5546_v57 }
 0x894   :  { %v2537_v43 = vpack.c.bf16 %v2532_v28, %v2531_v46  ;;  %v5549_v28 = vld [vmem:[#allocation10_spill] sm:$0xff] }
 0x897   :  { %2571 = vrot.lane.b32.xlu1 %v2537_v43, %s3552_s15  ;;  %v1342_v43 = vadd.f32 %v5549_v28, %v4990_v42 }
 0x89a   :  { %3243 = vmatmul.mubr.msk.bf16.gmra.mxu0 %vm87_vm0, %v2546_v3 }
 0x8c3   :  { %v2550_v12 = vpop.permute.xlu0 %2549 }
 0x8c7   :  { %v2558_v53 = vpop.permute.xlu0 %2557 }
 0x8cb   :  { %v2562_v41 = vpop.permute.xlu0 %2561 }
 0x8cc   :  { %v2548_v31 = vpop.permute.xlu1 %2547 }
 0x8cd   :  { %3246 = vmatprep.mubr.msk.bf16.mxu0 %vm87_vm0, %v2548_v31 }
 0x8ce   :  { %3247 = vmatmul.mubr.msk.bf16.gmra.mxu0 %vm87_vm0, %v2550_v12  ;;  %v5550_v12 = vld [vmem:[#allocation11_spill] sm:$0xff] }
 0x8d0   :  { %v2556_v37 = vpop.permute.xlu1 %2555 }
 0x8d1   :  { %3250 = vmatprep.mubr.msk.bf16.mxu0 %vm87_vm0, %v2556_v37  ;;  %v1334_v37 = vadd.f32 %v4990_v42, %v5550_v12 }
 0x8d6   :  { %3251 = vmatmul.mubr.msk.bf16.gmra.mxu0 %vm87_vm0, %v2558_v53 }
 0x8f7   :  { %v2570_v0 = vpop.permute.xlu0 %2569 }
 0x8fb   :  { %v2574_v27 = vpop.permute.xlu0 %2573 }
 0x901   :  { %v2560_v60 = vpop.permute.xlu1 %2559 }
 0x902   :  { %3254 = vmatprep.mubr.msk.bf16.mxu0 %vm87_vm0, %v2560_v60 }
 0x903   :  { %3255 = vmatmul.mubr.msk.bf16.gmra.mxu0 %vm87_vm0, %v2562_v41 }
 0x905   :  { %v2568_v50 = vpop.permute.xlu1 %2567 }
 0x906   :  { %3258 = vmatprep.mubr.msk.bf16.mxu0 %vm87_vm0, %v2568_v50  ;;  %v5551_v50 = vld [vmem:[#allocation12_spill] sm:$0xff] }
 0x909   :  { %v2572_v7 = vpop.permute.xlu1 %2571 }
 0x90b   :  { %3259 = vmatmul.mubr.msk.bf16.gmra.mxu0 %vm87_vm0, %v2570_v0  ;;  %v1345_v0 = vadd.f32 %v5551_v50, %v4990_v42 }
 0x90c   :  { %3262 = vmatprep.mubr.msk.bf16.mxu0 %vm87_vm0, %v2572_v7 }
 0x913   :  { %3263 = vmatmul.mubr.msk.bf16.gmra.mxu0 %vm87_vm0, %v2574_v27 }
 0x952   :  { %v3240_v25 = vpop.f32.mrf.mxu0 }
 0x953   :  { %v2700_v51 = vadd.f32 %v3240_v25, %v4996_v5 }
 0x954   :  { %v2691_v33 = vpop.f32.mrf.mxu0 }
 0x955   :  { %v2808_v32 = vadd.f32 %v2700_v51, %v1310_v17  ;;  %v2692_v40 = vadd.f32 %v4996_v5, %v2691_v33  ;;  %v5552_v17 = vld [vmem:[#allocation13_spill] sm:$0xff] }
 0x956   :  { %v3241_v36 = vpop.f32.mrf.mxu0  ;;  %v1337_v51 = vadd.f32 %v4990_v42, %v5552_v17 }
 0x957   :  { %v3093_v9 = vpack.c.bf16 %v2808_v32, %v2808_v32  ;;  %v2806_v30 = vadd.f32 %v2692_v40, %v1302_v13  ;;  %v2703_v54 = vadd.f32 %v3241_v36, %v4996_v5  ;;  %v5361_v40 = vld [vmem:[%s5504_s6] ss:$0 sm:$0xff] }
 0x958   :  { %v2694_v6 = vpop.f32.mrf.mxu0  ;;  %v5553_v36 = vld [vmem:[#allocation14_spill] sm:$0xff] }
 0x959   :  { %2969 = vst.msk [vmem:[%s5506_s14 + $0x18] sm:$0xf] %vm2962_vm4, %v3093_v9  ;;  %v3091_v14 = vpack.c.bf16 %v2806_v30, %v2806_v30  ;;  %v2809_v61 = vadd.f32 %v2703_v54, %v1313_v23  ;;  %v2695_v49 = vadd.f32 %v4996_v5, %v2694_v6  ;;  %v1358_v1 = vadd.f32 %v5361_v40, %v5553_v36  ;;  %v5554_v54 = vld [vmem:[#allocation15_spill] sm:$0xff] }
 0x95a   :  { %v3244_v24 = vpop.f32.mrf.mxu0  ;;  %v1350_v6 = vadd.f32 %v5361_v40, %v5554_v54 }
 0x95b   :  { %2967 = vst.msk [vmem:[%s5506_s14 + $0x10] sm:$0xf] %vm2962_vm4, %v3091_v14  ;;  %v3094_v55 = vpack.c.bf16 %v2809_v61, %v2809_v61  ;;  %v2807_v11 = vadd.f32 %v2695_v49, %v1305_v4  ;;  %v2716_v29 = vadd.f32 %v3244_v24, %v4996_v5  ;;  %v5555_v49 = vld [vmem:[#allocation16_spill] sm:$0xff] }
 0x95c   :  { %v2707_v47 = vpop.f32.mrf.mxu0  ;;  %v1361_v24 = vadd.f32 %v5361_v40, %v5555_v49 }
 0x95d   :  { %2970 = vst.msk [vmem:[%s5506_s14 + $0x1c] sm:$0xf] %vm2962_vm4, %v3094_v55  ;;  %v3092_v16 = vpack.c.bf16 %v2807_v11, %v2807_v11  ;;  %v2812_v56 = vadd.f32 %v2716_v29, %v1326_v39  ;;  %v2708_v8 = vadd.f32 %v4996_v5, %v2707_v47  ;;  %v5556_v29 = vld [vmem:[#allocation17_spill] sm:$0xff] }
 0x95e   :  { %v3245_v52 = vpop.f32.mrf.mxu0  ;;  %v1353_v47 = vadd.f32 %v5361_v40, %v5556_v29 }
 0x95f   :  { %2968 = vst.msk [vmem:[%s5506_s14 + $0x14] sm:$0xf] %vm2962_vm4, %v3092_v16  ;;  %v3097_v59 = vpack.c.bf16 %v2812_v56, %v2812_v56  ;;  %v2810_v19 = vadd.f32 %v2708_v8, %v1318_v18  ;;  %v2719_v44 = vadd.f32 %v3245_v52, %v4996_v5 }
 0x960   :  { %v2710_v2 = vpop.f32.mrf.mxu0 }
 0x961   :  { %2973 = vst.msk [vmem:[%s5506_s14 + $0x28] sm:$0xf] %vm2962_vm4, %v3097_v59  ;;  %v3095_v35 = vpack.c.bf16 %v2810_v19, %v2810_v19  ;;  %v2813_v45 = vadd.f32 %v2719_v44, %v1329_v62  ;;  %v2711_v20 = vadd.f32 %v4996_v5, %v2710_v2  ;;  %v5557_v62 = vld [vmem:[#allocation18_spill] sm:$0xff]  ;;  %v5558_v2 = vld [vmem:[#allocation19_spill] sm:$0xff] }
 0x962   :  { %v1374_v59 = vadd.f32 %v5361_v40, %v5557_v62  ;;  %v1366_v63 = vadd.f32 %v5361_v40, %v5558_v2 }
 0x963   :  { %2971 = vst.msk [vmem:[%s5506_s14 + $0x20] sm:$0xf] %vm2962_vm4, %v3095_v35  ;;  %v3098_v26 = vpack.c.bf16 %v2813_v45, %v2813_v45  ;;  %v2811_v10 = vadd.f32 %v2711_v20, %v1321_v21  ;;  %v5559_v20 = vld [vmem:[#allocation20_spill] sm:$0xff] }
 0x965   :  { %2974 = vst.msk [vmem:[%s5506_s14 + $0x2c] sm:$0xf] %vm2962_vm4, %v3098_v26  ;;  %v3096_v38 = vpack.c.bf16 %v2811_v10, %v2811_v10  ;;  %v1377_v26 = vadd.f32 %v5361_v40, %v5559_v20 }
 0x967   :  { %2972 = vst.msk [vmem:[%s5506_s14 + $0x24] sm:$0xf] %vm2962_vm4, %v3096_v38 }
 0x98e   :  { %v3248_v46 = vpop.f32.mrf.mxu0 }
 0x98f   :  { %v2732_v3 = vadd.f32 %v3248_v46, %v4996_v5 }
 0x990   :  { %v2723_v31 = vpop.f32.mrf.mxu0 }
 0x991   :  { %v2816_v53 = vadd.f32 %v2732_v3, %v1342_v43  ;;  %v2724_v60 = vadd.f32 %v4996_v5, %v2723_v31  ;;  %v5560_v43 = vld [vmem:[#allocation21_spill] sm:$0xff] }
 0x992   :  { %v3249_v41 = vpop.f32.mrf.mxu0  ;;  %v1369_v3 = vadd.f32 %v5361_v40, %v5560_v43 }
 0x993   :  { %v3101_v7 = vpack.c.bf16 %v2816_v53, %v2816_v53  ;;  %v2814_v27 = vadd.f32 %v2724_v60, %v1334_v37  ;;  %v2735_v25 = vadd.f32 %v3249_v41, %v4996_v5  ;;  %v5561_v60 = vld [vmem:[#allocation22_spill] sm:$0xff] }
 0x994   :  { %v2726_v58 = vpop.f32.mrf.mxu0  ;;  %v1390_v41 = vadd.f32 %v5361_v40, %v5561_v60 }
 0x995   :  { %2977 = vst.msk [vmem:[%s5506_s14 + $0x38] sm:$0xf] %vm2962_vm4, %v3101_v7  ;;  %v3099_v33 = vpack.c.bf16 %v2814_v27, %v2814_v27  ;;  %v2817_v48 = vadd.f32 %v2735_v25, %v1345_v0  ;;  %v2727_v13 = vadd.f32 %v4996_v5, %v2726_v58  ;;  %v5372_v5 = vld [vmem:[%s5505_s13] ss:$0 sm:$0xff]  ;;  %v5562_v25 = vld [vmem:[#allocation23_spill] sm:$0xff] }
 0x996   :  { %v3252_v32 = vpop.f32.mrf.mxu0  ;;  %v1382_v58 = vadd.f32 %v5361_v40, %v5562_v25 }
 0x997   :  { %2975 = vst.msk [vmem:[%s5506_s14 + $0x30] sm:$0xf] %vm2962_vm4, %v3099_v33  ;;  %v3102_v42 = vpack.c.bf16 %v2817_v48, %v2817_v48  ;;  %v2815_v23 = vadd.f32 %v2727_v13, %v1337_v51  ;;  %v2748_v9 = vadd.f32 %v5372_v5, %v3252_v32  ;;  %v5563_v13 = vld [vmem:[#allocation24_spill] sm:$0xff] }
 0x998   :  { %v2739_v30 = vpop.f32.mrf.mxu0  ;;  %v1393_v32 = vadd.f32 %v5361_v40, %v5563_v13 }
 0x999   :  { %2978 = vst.msk [vmem:[%s5506_s14 + $0x3c] sm:$0xf] %vm2962_vm4, %v3102_v42  ;;  %v3100_v15 = vpack.c.bf16 %v2815_v23, %v2815_v23  ;;  %v2820_v4 = vadd.f32 %v2748_v9, %v1358_v1  ;;  %v2740_v14 = vadd.f32 %v5372_v5, %v2739_v30  ;;  %v5564_v9 = vld [vmem:[#allocation25_spill] sm:$0xff] }
 0x99a   :  { %v3253_v61 = vpop.f32.mrf.mxu0  ;;  %v1385_v30 = vadd.f32 %v5361_v40, %v5564_v9 }
 0x99b   :  { %2976 = vst.msk [vmem:[%s5506_s14 + $0x34] sm:$0xf] %vm2962_vm4, %v3100_v15  ;;  %v3105_v22 = vpack.c.bf16 %v2820_v4, %v2820_v4  ;;  %v2818_v39 = vadd.f32 %v2740_v14, %v1350_v6  ;;  %v2751_v55 = vadd.f32 %v5372_v5, %v3253_v61  ;;  %v5565_v14 = vld [vmem:[#allocation26_spill] sm:$0xff] }
 0x99c   :  { %v2742_v11 = vpop.f32.mrf.mxu0  ;;  %v1406_v61 = vadd.f32 %v5361_v40, %v5565_v14 }
 0x99d   :  { %2981 = vst.msk [vmem:[%s5506_s14 + $0x48] sm:$0xf] %vm2962_vm4, %v3105_v22  ;;  %v3103_v57 = vpack.c.bf16 %v2818_v39, %v2818_v39  ;;  %v2821_v18 = vadd.f32 %v2751_v55, %v1361_v24  ;;  %v2743_v16 = vadd.f32 %v5372_v5, %v2742_v11  ;;  %v5566_v55 = vld [vmem:[#allocation27_spill] sm:$0xff] }
 0x99e   :  { %v1398_v11 = vadd.f32 %v5361_v40, %v5566_v55 }
 0x99f   :  { %2979 = vst.msk [vmem:[%s5506_s14 + $0x40] sm:$0xf] %vm2962_vm4, %v3103_v57  ;;  %v3106_v56 = vpack.c.bf16 %v2821_v18, %v2821_v18  ;;  %v2819_v8 = vadd.f32 %v2743_v16, %v1353_v47  ;;  %v5567_v16 = vld [vmem:[#allocation28_spill] sm:$0xff] }
 0x9a1   :  { %2982 = vst.msk [vmem:[%s5506_s14 + $0x4c] sm:$0xf] %vm2962_vm4, %v3106_v56  ;;  %v3104_v52 = vpack.c.bf16 %v2819_v8, %v2819_v8  ;;  %v1409_v56 = vadd.f32 %v5361_v40, %v5567_v16 }
 0x9a3   :  { %2980 = vst.msk [vmem:[%s5506_s14 + $0x44] sm:$0xf] %vm2962_vm4, %v3104_v52 }
 0x9c3   :  { %v3256_v34 = vpop.f32.mrf.mxu0 }
 0x9c4   :  { %v2764_v19 = vadd.f32 %v5372_v5, %v3256_v34 }
 0x9c5   :  { %v2755_v44 = vpop.f32.mrf.mxu0 }
 0x9c6   :  { %v2824_v21 = vadd.f32 %v2764_v19, %v1374_v59  ;;  %v2756_v35 = vadd.f32 %v5372_v5, %v2755_v44  ;;  %v5568_v59 = vld [vmem:[#allocation29_spill] sm:$0xff] }
 0x9c7   :  { %v3257_v45 = vpop.f32.mrf.mxu0  ;;  %v1401_v19 = vadd.f32 %v5361_v40, %v5568_v59 }
 0x9c8   :  { %v3109_v10 = vpack.c.bf16 %v2824_v21, %v2824_v21  ;;  %v2822_v38 = vadd.f32 %v2756_v35, %v1366_v63  ;;  %v2767_v46 = vadd.f32 %v5372_v5, %v3257_v45 }
 0x9c9   :  { %v2758_v28 = vpop.f32.mrf.mxu0 }
 0x9ca   :  { %2985 = vst.msk [vmem:[%s5506_s14 + $0x58] sm:$0xf] %vm2962_vm4, %v3109_v10  ;;  %v3107_v31 = vpack.c.bf16 %v2822_v38, %v2822_v38  ;;  %v2825_v12 = vadd.f32 %v2767_v46, %v1377_v26  ;;  %v2759_v37 = vadd.f32 %v5372_v5, %v2758_v28 }
 0x9cb   :  { %v3260_v53 = vpop.f32.mrf.mxu0 }
 0x9cc   :  { %2983 = vst.msk [vmem:[%s5506_s14 + $0x50] sm:$0xf] %vm2962_vm4, %v3107_v31  ;;  %v3110_v50 = vpack.c.bf16 %v2825_v12, %v2825_v12  ;;  %v2823_v0 = vadd.f32 %v2759_v37, %v1369_v3  ;;  %v2780_v7 = vadd.f32 %v5372_v5, %v3260_v53 }
 0x9cd   :  { %v2771_v27 = vpop.f32.mrf.mxu0 }
 0x9ce   :  { %2986 = vst.msk [vmem:[%s5506_s14 + $0x5c] sm:$0xf] %vm2962_vm4, %v3110_v50  ;;  %v3108_v17 = vpack.c.bf16 %v2823_v0, %v2823_v0  ;;  %v2828_v51 = vadd.f32 %v2780_v7, %v1390_v41  ;;  %v2772_v33 = vadd.f32 %v5372_v5, %v2771_v27 }
 0x9cf   :  { %v3261_v48 = vpop.f32.mrf.mxu0 }
 0x9d0   :  { %2984 = vst.msk [vmem:[%s5506_s14 + $0x54] sm:$0xf] %vm2962_vm4, %v3108_v17  ;;  %v3113_v36 = vpack.c.bf16 %v2828_v51, %v2828_v51  ;;  %v2826_v1 = vadd.f32 %v2772_v33, %v1382_v58  ;;  %v2783_v42 = vadd.f32 %v5372_v5, %v3261_v48 }
 0x9d1   :  { %v2774_v23 = vpop.f32.mrf.mxu0 }
 0x9d2   :  { %2989 = vst.msk [vmem:[%s5506_s14 + $0x68] sm:$0xf] %vm2962_vm4, %v3113_v36  ;;  %v3111_v54 = vpack.c.bf16 %v2826_v1, %v2826_v1  ;;  %v2829_v6 = vadd.f32 %v2783_v42, %v1393_v32  ;;  %v2775_v15 = vadd.f32 %v5372_v5, %v2774_v23 }
 0x9d3   :  { %v3264_v4 = vpop.f32.mrf.mxu0 }
 0x9d4   :  { %2987 = vst.msk [vmem:[%s5506_s14 + $0x60] sm:$0xf] %vm2962_vm4, %v3111_v54  ;;  %v3114_v49 = vpack.c.bf16 %v2829_v6, %v2829_v6  ;;  %v2827_v24 = vadd.f32 %v2775_v15, %v1385_v30  ;;  %v2796_v22 = vadd.f32 %v5372_v5, %v3264_v4 }
 0x9d5   :  { %v2787_v39 = vpop.f32.mrf.mxu0 }
 0x9d6   :  { %2990 = vst.msk [vmem:[%s5506_s14 + $0x6c] sm:$0xf] %vm2962_vm4, %v3114_v49  ;;  %v3112_v29 = vpack.c.bf16 %v2827_v24, %v2827_v24  ;;  %v2832_v47 = vadd.f32 %v2796_v22, %v1406_v61  ;;  %v2788_v57 = vadd.f32 %v5372_v5, %v2787_v39 }
 0x9d7   :  { %v3265_v18 = vpop.f32.mrf.mxu0 }
 0x9d8   :  { %2988 = vst.msk [vmem:[%s5506_s14 + $0x64] sm:$0xf] %vm2962_vm4, %v3112_v29  ;;  %v3117_v8 = vpack.c.bf16 %v2832_v47, %v2832_v47  ;;  %v2830_v52 = vadd.f32 %v2788_v57, %v1398_v11  ;;  %v2799_v34 = vadd.f32 %v5372_v5, %v3265_v18 }
 0x9d9   :  { %v2790_v62 = vpop.f32.mrf.mxu0 }
 0x9da   :  { %2993 = vst.msk [vmem:[%s5506_s14 + $0x78] sm:$0xf] %vm2962_vm4, %v3117_v8  ;;  %v3115_v44 = vpack.c.bf16 %v2830_v52, %v2830_v52  ;;  %v2833_v2 = vadd.f32 %v2799_v34, %v1409_v56  ;;  %v2791_v63 = vadd.f32 %v5372_v5, %v2790_v62 }
 0x9dc   :  { %2991 = vst.msk [vmem:[%s5506_s14 + $0x70] sm:$0xf] %vm2962_vm4, %v3115_v44  ;;  %v3118_v21 = vpack.c.bf16 %v2833_v2, %v2833_v2  ;;  %v2831_v35 = vadd.f32 %v2791_v63, %v1401_v19 }
 0x9de   :  { %2994 = vst.msk [vmem:[%s5506_s14 + $0x7c] sm:$0xf] %vm2962_vm4, %v3118_v21  ;;  %v3116_v40 = vpack.c.bf16 %v2831_v35, %v2831_v35 }
 0x9e0   :  { %2992 = vst.msk [vmem:[%s5506_s14 + $0x74] sm:$0xf] %vm2962_vm4, %v3116_v40 }

</bundles_post_ra>
